<compile_context>
chip_gen: v5e
topology: v5e:2x2
jax: 0.10.0
libtpu: 0.0.40
codegen_flags: <defaults>
</compile_context>

<pallas_src>
import jax
import jax.numpy as jnp
from jax.experimental import pallas as pl
from jax.experimental.pallas import tpu as pltpu

_EPS = 1e-5  # PyTorch BatchNorm2d default


# ----------------------------------------------------------------------------
# Kernels
# ----------------------------------------------------------------------------
def _conv_tail(n, Cin, H, W, xpad, patch, w_ref, y_ref, s1_ref, s2_ref):
    """Shared conv3x3 body: im2col into bf16 scratch -> one MXU contraction ->
    stream pre-BN output + accumulate per-channel sum / sum-of-squares."""
    HW = H * W
    # im2col over the 9 taps, written straight into the preallocated bf16 patch.
    # TODO(synk): lane-align xpad / use pltpu.roll-based shifts to avoid the 9
    #             (8,128)-crossing relayouts on large shapes.
    for dy in range(3):
        for dx in range(3):
            idx = dy * 3 + dx
            patch[idx * Cin:(idx + 1) * Cin, :] = (
                xpad[:, dy:dy + H, dx:dx + W]
                .reshape(Cin, HW).astype(jnp.bfloat16))
    # Single MXU contraction of depth 9*Cin, bf16 inputs, f32 accumulation.
    acc = jnp.dot(w_ref[...], patch[...],
                  preferred_element_type=jnp.float32)             # (Cout, HW)
    y_ref[0] = acc                     # pre-BN output, streamed per batch element
    s1_ref[...] += jnp.sum(acc, axis=1, keepdims=True)            # (Cout, 1)
    s2_ref[...] += jnp.sum(acc * acc, axis=1, keepdims=True)


def _make_conv1_kernel(C2, C1, H, W, H1, W1, py0, px0):
    """Fused: bilinear x2 upsample of x1 + F.pad + concat([x2, x1], ch) +
    Conv3x3(pad=1) -> streamed pre-BN output + BN statistics."""
    Cin = C2 + C1
    Ho, Wo = 2 * H1, 2 * W1

    def kernel(x2_ref, x1_ref, mh_ref, mwt_ref, w_ref,
               y_ref, s1_ref, s2_ref, xpad, patch):
        n = pl.program_id(0)

        @pl.when(n == 0)
        def _():
            # Zero once: interior is fully overwritten every step; the 1-px conv
            # halo and the F.pad border stay zero across grid iterations.
            xpad[...] = jnp.zeros_like(xpad)
            s1_ref[...] = jnp.zeros_like(s1_ref)
            s2_ref[...] = jnp.zeros_like(s2_ref)

        # Separable bilinear upsample (align_corners=True), fused in VMEM.
        # W pass batched over channels into one matmul.
        t = jnp.dot(x1_ref[0].reshape(C1 * H1, W1), mwt_ref[...],
                    preferred_element_type=jnp.float32).reshape(C1, H1, Wo)
        # H pass per channel; each result lands directly in its padded/concat
        # position inside the halo buffer (no extra pad/concat passes).
        # TODO(synk): batch the H pass into a single matmul for large C1 (needs
        #             a lane-preserving (C1,H1,Wo)->(H1,C1*Wo) relayout).
        for c in range(C1):
            xpad[C2 + c, 1 + py0:1 + py0 + Ho, 1 + px0:1 + px0 + Wo] = jnp.dot(
                mh_ref[...], t[c], preferred_element_type=jnp.float32)

        # Skip connection occupies channels [0, C2).
        xpad[0:C2, 1:H + 1, 1:W + 1] = x2_ref[0]

        _conv_tail(n, Cin, H, W, xpad, patch, w_ref, y_ref, s1_ref, s2_ref)

    return kernel


def _make_conv2_kernel(Cin, H, W):
    """conv1's BatchNorm affine + ReLU folded into the input assembly, then
    Conv3x3(pad=1) -> streamed pre-BN output + BN statistics."""

    def kernel(y1_ref, sc_ref, sh_ref, w_ref, y_ref, s1_ref, s2_ref, xpad, patch):
        n = pl.program_id(0)

        @pl.when(n == 0)
        def _():
            xpad[...] = jnp.zeros_like(xpad)
            s1_ref[...] = jnp.zeros_like(s1_ref)
            s2_ref[...] = jnp.zeros_like(s2_ref)

        # BN(conv1) + ReLU applied on the fly (f32), then written into the halo.
        h = jnp.maximum(y1_ref[0] * sc_ref[...] + sh_ref[...], 0.0)   # (Cin, HW)
        xpad[:, 1:H + 1, 1:W + 1] = h.reshape(Cin, H, W)

        _conv_tail(n, Cin, H, W, xpad, patch, w_ref, y_ref, s1_ref, s2_ref)

    return kernel


def _bn_relu_kernel(y_ref, sc_ref, sh_ref, o_ref):
    # Elementwise finalize: y * scale + shift, ReLU. Lane-dense (HW = k*128).
    o_ref[...] = jnp.maximum(y_ref[...] * sc_ref[...] + sh_ref[...], 0.0)


# ----------------------------------------------------------------------------
# Host-side helpers
# ----------------------------------------------------------------------------
def _interp_matrix(n_in, n_out):
    # 1-D bilinear interpolation matrix, align_corners=True semantics.
    src = jnp.arange(n_out, dtype=jnp.float32) * (n_in - 1) / (n_out - 1)
    i0 = jnp.clip(jnp.floor(src).astype(jnp.int32), 0, n_in - 1)
    i1 = jnp.clip(i0 + 1, 0, n_in - 1)
    w1 = src - i0.astype(jnp.float32)
    w0 = 1.0 - w1
    rows = jnp.arange(n_out)
    m = jnp.zeros((n_out, n_in), jnp.float32)
    m = m.at[rows, i0].add(w0)
    m = m.at[rows, i1].add(w1)
    return m


def _flatten_weight(w):
    # PyTorch (Cout, Cin, 3, 3) -> (Cout, 9*Cin), column order (dy*3+dx)*Cin + ci,
    # cast to bf16 (native MXU input rate); accumulation stays f32.
    Cout, Cin = w.shape[0], w.shape[1]
    return jnp.transpose(w, (0, 2, 3, 1)).reshape(Cout, 9 * Cin).astype(jnp.bfloat16)


def _bn_scale_shift(s_sum, s_sq, gamma, beta, count, eps=_EPS):
    # Train-mode BatchNorm: biased batch variance over N*H*W.
    # TODO(synk): E[x^2]-E[x]^2 in f32 can cancel for huge activations; a
    #             two-pass (mean-then-var) reduction would be more robust.
    mean = s_sum[:, 0] / count
    var = jnp.maximum(s_sq[:, 0] / count - mean * mean, 0.0)
    scale = gamma * jax.lax.rsqrt(var + eps)
    shift = beta - mean * scale
    return (scale.astype(jnp.float32).reshape(-1, 1),
            shift.astype(jnp.float32).reshape(-1, 1))


def _vmem_limit(block_bytes, scratch_bytes):
    # double-buffered blocks + scratch + headroom, capped at v7x physical VMEM.
    return int(min(2 * block_bytes + scratch_bytes + (16 << 20), 64 << 20))


# ----------------------------------------------------------------------------
# pallas_call wrappers
# ----------------------------------------------------------------------------
def conv1_fused(x2, x1, w, py0, px0):
    """Fused upsample(x1) + pad + concat([x2, x1]) + Conv3x3 -> (pre-BN y, s1, s2)."""
    N, C2, H, W = x2.shape
    _, C1, H1, W1 = x1.shape
    Ho, Wo = 2 * H1, 2 * W1
    Cout = w.shape[0]
    Cin = C2 + C1
    HW = H * W

    mh = _interp_matrix(H1, Ho)          # (Ho, H1)
    mwt = _interp_matrix(W1, Wo).T       # (W1, Wo)
    w_flat = _flatten_weight(w)          # (Cout, 9*Cin) bf16

    block_bytes = (4 * (C2 * H * W + C1 * H1 * W1 + Ho * H1 + W1 * Wo
                        + Cout * HW + 2 * Cout) + 2 * Cout * 9 * Cin)
    scratch_bytes = 4 * Cin * (H + 2) * (W + 2) + 2 * 9 * Cin * HW

    y, s1, s2 = pl.pallas_call(
        _make_conv1_kernel(C2, C1, H, W, H1, W1, py0, px0),
        out_shape=(jax.ShapeDtypeStruct((N, Cout, HW), jnp.float32),
                   jax.ShapeDtypeStruct((Cout, 1), jnp.float32),
                   jax.ShapeDtypeStruct((Cout, 1), jnp.float32)),
        grid=(N,),
        in_specs=[
            pl.BlockSpec((1, C2, H, W), lambda n: (n, 0, 0, 0)),
            pl.BlockSpec((1, C1, H1, W1), lambda n: (n, 0, 0, 0)),
            pl.BlockSpec((Ho, H1), lambda n: (0, 0)),
            pl.BlockSpec((W1, Wo), lambda n: (0, 0)),
            pl.BlockSpec((Cout, 9 * Cin), lambda n: (0, 0)),
        ],
        out_specs=[
            pl.BlockSpec((1, Cout, HW), lambda n: (n, 0, 0)),   # streamed per n
            pl.BlockSpec((Cout, 1), lambda n: (0, 0)),          # resident BN sum
            pl.BlockSpec((Cout, 1), lambda n: (0, 0)),          # resident BN sum^2
        ],
        scratch_shapes=[
            pltpu.VMEM((Cin, H + 2, W + 2), jnp.float32),       # halo + pad + concat
            pltpu.VMEM((9 * Cin, HW), jnp.bfloat16),            # im2col patch
        ],
        # "arbitrary": BN statistics accumulate across the batch axis.
        compiler_params=pltpu.CompilerParams(
            dimension_semantics=("arbitrary",),
            vmem_limit_bytes=_vmem_limit(block_bytes, scratch_bytes)),
    )(x2, x1, mh, mwt, w_flat)
    return y, s1, s2


def conv2_fused(y1, sc1, sh1, w, H, W):
    """Fused BN1-affine + ReLU + Conv3x3 -> (pre-BN y, s1, s2). y1 is (N, Cin, H*W)."""
    N, Cin, HW = y1.shape
    Cout = w.shape[0]
    w_flat = _flatten_weight(w)

    block_bytes = 4 * (Cin * HW + 2 * Cin + Cout * HW + 2 * Cout) + 2 * Cout * 9 * Cin
    scratch_bytes = 4 * Cin * (H + 2) * (W + 2) + 2 * 9 * Cin * HW

    y, s1, s2 = pl.pallas_call(
        _make_conv2_kernel(Cin, H, W),
        out_shape=(jax.ShapeDtypeStruct((N, Cout, HW), jnp.float32),
                   jax.ShapeDtypeStruct((Cout, 1), jnp.float32),
                   jax.ShapeDtypeStruct((Cout, 1), jnp.float32)),
        grid=(N,),
        in_specs=[
            pl.BlockSpec((1, Cin, HW), lambda n: (n, 0, 0)),
            pl.BlockSpec((Cin, 1), lambda n: (0, 0)),
            pl.BlockSpec((Cin, 1), lambda n: (0, 0)),
            pl.BlockSpec((Cout, 9 * Cin), lambda n: (0, 0)),
        ],
        out_specs=[
            pl.BlockSpec((1, Cout, HW), lambda n: (n, 0, 0)),
            pl.BlockSpec((Cout, 1), lambda n: (0, 0)),
            pl.BlockSpec((Cout, 1), lambda n: (0, 0)),
        ],
        scratch_shapes=[
            pltpu.VMEM((Cin, H + 2, W + 2), jnp.float32),
            pltpu.VMEM((9 * Cin, HW), jnp.bfloat16),
        ],
        compiler_params=pltpu.CompilerParams(
            dimension_semantics=("arbitrary",),
            vmem_limit_bytes=_vmem_limit(block_bytes, scratch_bytes)),
    )(y1, sc1, sh1, w_flat)
    return y, s1, s2


def bn_relu_finalize(y, sc, sh, H, W):
    """Elementwise BN affine + ReLU over the streamed conv2 output."""
    N, Cout, HW = y.shape
    block_bytes = 4 * (2 * Cout * HW + 2 * Cout)
    out = pl.pallas_call(
        _bn_relu_kernel,
        out_shape=jax.ShapeDtypeStruct((N, Cout, HW), jnp.float32),
        grid=(N,),
        in_specs=[
            pl.BlockSpec((1, Cout, HW), lambda n: (n, 0, 0)),
            pl.BlockSpec((Cout, 1), lambda n: (0, 0)),
            pl.BlockSpec((Cout, 1), lambda n: (0, 0)),
        ],
        out_specs=pl.BlockSpec((1, Cout, HW), lambda n: (n, 0, 0)),
        compiler_params=pltpu.CompilerParams(
            dimension_semantics=("parallel",),
            vmem_limit_bytes=_vmem_limit(block_bytes, 0)),
    )(y, sc, sh)
    return out.reshape(N, Cout, H, W)   # free metadata reshape (channel-major)


# ----------------------------------------------------------------------------
# Forward
# ----------------------------------------------------------------------------
def up_forward(x1_nchw, x2_nchw, params, eps=_EPS):
    """Forward of Up(bilinear=True). Inputs/outputs are NCHW like PyTorch."""
    N, C1, H1, W1 = x1_nchw.shape
    _, C2, H, W = x2_nchw.shape

    diffY, diffX = H - 2 * H1, W - 2 * W1
    assert diffY >= 0 and diffX >= 0  # TODO(synk): negative diff (crop) not supported
    py0, px0 = diffY // 2, diffX // 2

    # Conv biases are intentionally NOT applied: BatchNorm with batch statistics
    # exactly cancels any per-channel constant added before it (same output).
    y1, s1a, s1b = conv1_fused(x2_nchw, x1_nchw, params["w1"], py0, px0)
    sc1, sh1 = _bn_scale_shift(s1a, s1b, params["g1"], params["be1"], N * H * W, eps)

    y2, s2a, s2b = conv2_fused(y1, sc1, sh1, params["w2"], H, W)
    sc2, sh2 = _bn_scale_shift(s2a, s2b, params["g2"], params["be2"], N * H * W, eps)

    return bn_relu_finalize(y2, sc2, sh2, H, W)


def init_params(key, in_channels, out_channels):
    ks = jax.random.split(key, 8)
    return {
        "w1": 0.1 * jax.random.normal(ks[0], (out_channels, in_channels, 3, 3), jnp.float32),
        "b1": 0.1 * jax.random.normal(ks[1], (out_channels,), jnp.float32),   # unused (cancelled by BN)
        "g1": 1.0 + 0.1 * jax.random.normal(ks[2], (out_channels,), jnp.float32),
        "be1": 0.1 * jax.random.normal(ks[3], (out_channels,), jnp.float32),
        "w2": 0.1 * jax.random.normal(ks[4], (out_channels, out_channels, 3, 3), jnp.float32),
        "b2": 0.1 * jax.random.normal(ks[5], (out_channels,), jnp.float32),   # unused (cancelled by BN)
        "g2": 1.0 + 0.1 * jax.random.normal(ks[6], (out_channels,), jnp.float32),
        "be2": 0.1 * jax.random.normal(ks[7], (out_channels,), jnp.float32),
    }


if __name__ == "__main__":
    key = jax.random.PRNGKey(0)
    k1, k2, kp = jax.random.split(key, 3)

    # Up(in_channels=8, out_channels=4, bilinear=True)
    # x1: decoder feature (smaller spatial, 4 channels) -> upsampled & padded
    # x2: skip connection (larger spatial, 4 channels)
    x1 = jax.random.normal(k1, (2, 4, 7, 7), jnp.float32)     # NCHW
    x2 = jax.random.normal(k2, (2, 4, 16, 16), jnp.float32)   # NCHW
    params = init_params(kp, in_channels=8, out_channels=4)

    out = up_forward(x1, x2, params)
    out = jax.block_until_ready(out)
    assert out.shape == (2, 4, 16, 16), out.shape
    assert out.dtype == jnp.float32
    assert bool(jnp.all(jnp.isfinite(out)))
    print("KERNEL_OK")
</pallas_src>

<mosaic_0001>
module attributes {stable_mosaic.version = 11 : i64} {
  func.func @kernel(%arg0: i32, %arg1: memref<1x4x16x16xf32, #tpu.memory_space<vmem>>, %arg2: memref<1x4x7x7xf32, #tpu.memory_space<vmem>>, %arg3: memref<14x7xf32, #tpu.memory_space<vmem>>, %arg4: memref<7x14xf32, #tpu.memory_space<vmem>>, %arg5: memref<4x72xbf16, #tpu.memory_space<vmem>>, %arg6: memref<1x4x256xf32, #tpu.memory_space<vmem>>, %arg7: memref<4x1xf32, #tpu.memory_space<vmem>>, %arg8: memref<4x1xf32, #tpu.memory_space<vmem>>, %arg9: memref<8x18x18xf32, #tpu.memory_space<vmem>>, %arg10: memref<72x256xbf16, #tpu.memory_space<vmem>>) attributes {dimension_semantics = [#tpu.dimension_semantics<arbitrary>], iteration_bounds = array<i64: 2>, scalar_prefetch = 0 : i64, scratch_operands = 2 : i64, tpu.core_type = #tpu.core_type<tc>, window_params = [{transform_indices = @transform_0, window_bounds = array<i64: 1, 4, 16, 16>}, {transform_indices = @transform_1, window_bounds = array<i64: 1, 4, 7, 7>}, {pipeline_mode = #tpu.pipeline_mode<synchronous>, transform_indices = @transform_2, window_bounds = array<i64: 14, 7>}, {pipeline_mode = #tpu.pipeline_mode<synchronous>, transform_indices = @transform_3, window_bounds = array<i64: 7, 14>}, {pipeline_mode = #tpu.pipeline_mode<synchronous>, transform_indices = @transform_4, window_bounds = array<i64: 4, 72>}, {transform_indices = @transform_5, window_bounds = array<i64: 1, 4, 256>}, {pipeline_mode = #tpu.pipeline_mode<synchronous>, transform_indices = @transform_6, window_bounds = array<i64: 4, 1>}, {pipeline_mode = #tpu.pipeline_mode<synchronous>, transform_indices = @transform_7, window_bounds = array<i64: 4, 1>}]} {
    %c0_i32 = arith.constant 0 : i32
    %0 = arith.cmpi eq, %arg0, %c0_i32 : i32
    %1 = arith.extui %0 : i1 to i32
    %c0_i32_0 = arith.constant 0 : i32
    %2 = arith.cmpi ne, %1, %c0_i32_0 : i32
    scf.if %2 {
      %cst_86 = arith.constant 0.000000e+00 : f32
      %93 = vector.broadcast %cst_86 : f32 to vector<8x18x18xf32>
      %c0_87 = arith.constant 0 : index
      %c0_88 = arith.constant 0 : index
      %c0_89 = arith.constant 0 : index
      %94 = vector.load %arg9[%c0_87, %c0_88, %c0_89] : memref<8x18x18xf32, #tpu.memory_space<vmem>>, vector<8x18x18xf32>
      tpu.vector_store %arg9[%c0_87, %c0_88, %c0_89], %93 {strides = array<i32>} : memref<8x18x18xf32, #tpu.memory_space<vmem>>, vector<8x18x18xf32>,
      %cst_90 = arith.constant 0.000000e+00 : f32
      %95 = vector.broadcast %cst_90 : f32 to vector<4x1xf32>
      %c0_91 = arith.constant 0 : index
      %c0_92 = arith.constant 0 : index
      %96 = vector.load %arg7[%c0_91, %c0_92] : memref<4x1xf32, #tpu.memory_space<vmem>>, vector<4x1xf32>
      tpu.vector_store %arg7[%c0_91, %c0_92], %95 {strides = array<i32>} : memref<4x1xf32, #tpu.memory_space<vmem>>, vector<4x1xf32>,
      %cst_93 = arith.constant 0.000000e+00 : f32
      %97 = vector.broadcast %cst_93 : f32 to vector<4x1xf32>
      %c0_94 = arith.constant 0 : index
      %c0_95 = arith.constant 0 : index
      %98 = vector.load %arg8[%c0_94, %c0_95] : memref<4x1xf32, #tpu.memory_space<vmem>>, vector<4x1xf32>
      tpu.vector_store %arg8[%c0_94, %c0_95], %97 {strides = array<i32>} : memref<4x1xf32, #tpu.memory_space<vmem>>, vector<4x1xf32>,
    } else {
    }
    %c0 = arith.constant 0 : index
    %c0_1 = arith.constant 0 : index
    %c0_2 = arith.constant 0 : index
    %c0_3 = arith.constant 0 : index
    %3 = vector.load %arg2[%c0, %c0_1, %c0_2, %c0_3] : memref<1x4x7x7xf32, #tpu.memory_space<vmem>>, vector<1x4x7x7xf32>
    %4 = vector.shape_cast %3 : vector<1x4x7x7xf32> to vector<4x7x7xf32>
    %5 = vector.shape_cast %4 : vector<4x7x7xf32> to vector<28x7xf32>
    %c0_4 = arith.constant 0 : index
    %c0_5 = arith.constant 0 : index
    %6 = vector.load %arg4[%c0_4, %c0_5] : memref<7x14xf32, #tpu.memory_space<vmem>>, vector<7x14xf32>
    %cst = arith.constant dense<0.000000e+00> : vector<28x14xf32>
    %7 = tpu.matmul %5, %6, %cst {dimension_numbers = #tpu.dot_dimension_numbers<[1], [0], [0], [1], [0, 0, 1, 1], [], []>} : vector<28x7xf32>, vector<7x14xf32>, vector<28x14xf32> -> vector<28x14xf32>
    %8 = vector.shape_cast %7 : vector<28x14xf32> to vector<4x7x14xf32>
    %c0_6 = arith.constant 0 : index
    %c0_7 = arith.constant 0 : index
    %9 = vector.load %arg3[%c0_6, %c0_7] : memref<14x7xf32, #tpu.memory_space<vmem>>, vector<14x7xf32>
    %10 = vector.extract_strided_slice %8 {offsets = [0, 0, 0], sizes = [1, 7, 14], strides = [1, 1, 1]} : vector<4x7x14xf32> to vector<1x7x14xf32>
    %11 = vector.shape_cast %10 : vector<1x7x14xf32> to vector<7x14xf32>
    %cst_8 = arith.constant dense<0.000000e+00> : vector<14x14xf32>
    %12 = tpu.matmul %9, %11, %cst_8 {dimension_numbers = #tpu.dot_dimension_numbers<[1], [0], [0], [1], [0, 0, 1, 1], [], []>} : vector<14x7xf32>, vector<7x14xf32>, vector<14x14xf32> -> vector<14x14xf32>
    %c4 = arith.constant 4 : index
    %c2 = arith.constant 2 : index
    %c2_9 = arith.constant 2 : index
    %13 = vector.load %arg9[%c4, %c2, %c2_9] : memref<8x18x18xf32, #tpu.memory_space<vmem>>, vector<1x14x14xf32>
    %14 = vector.shape_cast %13 : vector<1x14x14xf32> to vector<14x14xf32>
    %15 = vector.shape_cast %12 : vector<14x14xf32> to vector<1x14x14xf32>
    tpu.vector_store %arg9[%c4, %c2, %c2_9], %15 {strides = array<i32>} : memref<8x18x18xf32, #tpu.memory_space<vmem>>, vector<1x14x14xf32>,
    %c0_10 = arith.constant 0 : index
    %c0_11 = arith.constant 0 : index
    %16 = vector.load %arg3[%c0_10, %c0_11] : memref<14x7xf32, #tpu.memory_space<vmem>>, vector<14x7xf32>
    %17 = vector.extract_strided_slice %8 {offsets = [1, 0, 0], sizes = [1, 7, 14], strides = [1, 1, 1]} : vector<4x7x14xf32> to vector<1x7x14xf32>
    %18 = vector.shape_cast %17 : vector<1x7x14xf32> to vector<7x14xf32>
    %cst_12 = arith.constant dense<0.000000e+00> : vector<14x14xf32>
    %19 = tpu.matmul %16, %18, %cst_12 {dimension_numbers = #tpu.dot_dimension_numbers<[1], [0], [0], [1], [0, 0, 1, 1], [], []>} : vector<14x7xf32>, vector<7x14xf32>, vector<14x14xf32> -> vector<14x14xf32>
    %c5 = arith.constant 5 : index
    %c2_13 = arith.constant 2 : index
    %c2_14 = arith.constant 2 : index
    %20 = vector.load %arg9[%c5, %c2_13, %c2_14] : memref<8x18x18xf32, #tpu.memory_space<vmem>>, vector<1x14x14xf32>
    %21 = vector.shape_cast %20 : vector<1x14x14xf32> to vector<14x14xf32>
    %22 = vector.shape_cast %19 : vector<14x14xf32> to vector<1x14x14xf32>
    tpu.vector_store %arg9[%c5, %c2_13, %c2_14], %22 {strides = array<i32>} : memref<8x18x18xf32, #tpu.memory_space<vmem>>, vector<1x14x14xf32>,
    %c0_15 = arith.constant 0 : index
    %c0_16 = arith.constant 0 : index
    %23 = vector.load %arg3[%c0_15, %c0_16] : memref<14x7xf32, #tpu.memory_space<vmem>>, vector<14x7xf32>
    %24 = vector.extract_strided_slice %8 {offsets = [2, 0, 0], sizes = [1, 7, 14], strides = [1, 1, 1]} : vector<4x7x14xf32> to vector<1x7x14xf32>
    %25 = vector.shape_cast %24 : vector<1x7x14xf32> to vector<7x14xf32>
    %cst_17 = arith.constant dense<0.000000e+00> : vector<14x14xf32>
    %26 = tpu.matmul %23, %25, %cst_17 {dimension_numbers = #tpu.dot_dimension_numbers<[1], [0], [0], [1], [0, 0, 1, 1], [], []>} : vector<14x7xf32>, vector<7x14xf32>, vector<14x14xf32> -> vector<14x14xf32>
    %c6 = arith.constant 6 : index
    %c2_18 = arith.constant 2 : index
    %c2_19 = arith.constant 2 : index
    %27 = vector.load %arg9[%c6, %c2_18, %c2_19] : memref<8x18x18xf32, #tpu.memory_space<vmem>>, vector<1x14x14xf32>
    %28 = vector.shape_cast %27 : vector<1x14x14xf32> to vector<14x14xf32>
    %29 = vector.shape_cast %26 : vector<14x14xf32> to vector<1x14x14xf32>
    tpu.vector_store %arg9[%c6, %c2_18, %c2_19], %29 {strides = array<i32>} : memref<8x18x18xf32, #tpu.memory_space<vmem>>, vector<1x14x14xf32>,
    %c0_20 = arith.constant 0 : index
    %c0_21 = arith.constant 0 : index
    %30 = vector.load %arg3[%c0_20, %c0_21] : memref<14x7xf32, #tpu.memory_space<vmem>>, vector<14x7xf32>
    %31 = vector.extract_strided_slice %8 {offsets = [3, 0, 0], sizes = [1, 7, 14], strides = [1, 1, 1]} : vector<4x7x14xf32> to vector<1x7x14xf32>
    %32 = vector.shape_cast %31 : vector<1x7x14xf32> to vector<7x14xf32>
    %cst_22 = arith.constant dense<0.000000e+00> : vector<14x14xf32>
    %33 = tpu.matmul %30, %32, %cst_22 {dimension_numbers = #tpu.dot_dimension_numbers<[1], [0], [0], [1], [0, 0, 1, 1], [], []>} : vector<14x7xf32>, vector<7x14xf32>, vector<14x14xf32> -> vector<14x14xf32>
    %c7 = arith.constant 7 : index
    %c2_23 = arith.constant 2 : index
    %c2_24 = arith.constant 2 : index
    %34 = vector.load %arg9[%c7, %c2_23, %c2_24] : memref<8x18x18xf32, #tpu.memory_space<vmem>>, vector<1x14x14xf32>
    %35 = vector.shape_cast %34 : vector<1x14x14xf32> to vector<14x14xf32>
    %36 = vector.shape_cast %33 : vector<14x14xf32> to vector<1x14x14xf32>
    tpu.vector_store %arg9[%c7, %c2_23, %c2_24], %36 {strides = array<i32>} : memref<8x18x18xf32, #tpu.memory_space<vmem>>, vector<1x14x14xf32>,
    %c0_25 = arith.constant 0 : index
    %c0_26 = arith.constant 0 : index
    %c0_27 = arith.constant 0 : index
    %c0_28 = arith.constant 0 : index
    %37 = vector.load %arg1[%c0_25, %c0_26, %c0_27, %c0_28] : memref<1x4x16x16xf32, #tpu.memory_space<vmem>>, vector<1x4x16x16xf32>
    %38 = vector.shape_cast %37 : vector<1x4x16x16xf32> to vector<4x16x16xf32>
    %c0_29 = arith.constant 0 : index
    %c1 = arith.constant 1 : index
    %c1_30 = arith.constant 1 : index
    %39 = vector.load %arg9[%c0_29, %c1, %c1_30] : memref<8x18x18xf32, #tpu.memory_space<vmem>>, vector<4x16x16xf32>
    tpu.vector_store %arg9[%c0_29, %c1, %c1_30], %38 {strides = array<i32>} : memref<8x18x18xf32, #tpu.memory_space<vmem>>, vector<4x16x16xf32>,
    %c0_31 = arith.constant 0 : index
    %c0_32 = arith.constant 0 : index
    %c0_33 = arith.constant 0 : index
    %40 = vector.load %arg9[%c0_31, %c0_32, %c0_33] : memref<8x18x18xf32, #tpu.memory_space<vmem>>, vector<8x16x16xf32>
    %41 = vector.shape_cast %40 : vector<8x16x16xf32> to vector<8x256xf32>
    %42 = arith.truncf %41 : vector<8x256xf32> to vector<8x256xbf16>
    %c0_34 = arith.constant 0 : index
    %c0_35 = arith.constant 0 : index
    %43 = vector.load %arg10[%c0_34, %c0_35] : memref<72x256xbf16, #tpu.memory_space<vmem>>, vector<8x256xbf16>
    tpu.vector_store %arg10[%c0_34, %c0_35], %42 {strides = array<i32>} : memref<72x256xbf16, #tpu.memory_space<vmem>>, vector<8x256xbf16>,
    %c0_36 = arith.constant 0 : index
    %c0_37 = arith.constant 0 : index
    %c1_38 = arith.constant 1 : index
    %44 = vector.load %arg9[%c0_36, %c0_37, %c1_38] : memref<8x18x18xf32, #tpu.memory_space<vmem>>, vector<8x16x16xf32>
    %45 = vector.shape_cast %44 : vector<8x16x16xf32> to vector<8x256xf32>
    %46 = arith.truncf %45 : vector<8x256xf32> to vector<8x256xbf16>
    %c8 = arith.constant 8 : index
    %c0_39 = arith.constant 0 : index
    %47 = vector.load %arg10[%c8, %c0_39] : memref<72x256xbf16, #tpu.memory_space<vmem>>, vector<8x256xbf16>
    tpu.vector_store %arg10[%c8, %c0_39], %46 {strides = array<i32>} : memref<72x256xbf16, #tpu.memory_space<vmem>>, vector<8x256xbf16>,
    %c0_40 = arith.constant 0 : index
    %c0_41 = arith.constant 0 : index
    %c2_42 = arith.constant 2 : index
    %48 = vector.load %arg9[%c0_40, %c0_41, %c2_42] : memref<8x18x18xf32, #tpu.memory_space<vmem>>, vector<8x16x16xf32>
    %49 = vector.shape_cast %48 : vector<8x16x16xf32> to vector<8x256xf32>
    %50 = arith.truncf %49 : vector<8x256xf32> to vector<8x256xbf16>
    %c16 = arith.constant 16 : index
    %c0_43 = arith.constant 0 : index
    %51 = vector.load %arg10[%c16, %c0_43] : memref<72x256xbf16, #tpu.memory_space<vmem>>, vector<8x256xbf16>
    tpu.vector_store %arg10[%c16, %c0_43], %50 {strides = array<i32>} : memref<72x256xbf16, #tpu.memory_space<vmem>>, vector<8x256xbf16>,
    %c0_44 = arith.constant 0 : index
    %c1_45 = arith.constant 1 : index
    %c0_46 = arith.constant 0 : index
    %52 = vector.load %arg9[%c0_44, %c1_45, %c0_46] : memref<8x18x18xf32, #tpu.memory_space<vmem>>, vector<8x16x16xf32>
    %53 = vector.shape_cast %52 : vector<8x16x16xf32> to vector<8x256xf32>
    %54 = arith.truncf %53 : vector<8x256xf32> to vector<8x256xbf16>
    %c24 = arith.constant 24 : index
    %c0_47 = arith.constant 0 : index
    %55 = vector.load %arg10[%c24, %c0_47] : memref<72x256xbf16, #tpu.memory_space<vmem>>, vector<8x256xbf16>
    tpu.vector_store %arg10[%c24, %c0_47], %54 {strides = array<i32>} : memref<72x256xbf16, #tpu.memory_space<vmem>>, vector<8x256xbf16>,
    %c0_48 = arith.constant 0 : index
    %c1_49 = arith.constant 1 : index
    %c1_50 = arith.constant 1 : index
    %56 = vector.load %arg9[%c0_48, %c1_49, %c1_50] : memref<8x18x18xf32, #tpu.memory_space<vmem>>, vector<8x16x16xf32>
    %57 = vector.shape_cast %56 : vector<8x16x16xf32> to vector<8x256xf32>
    %58 = arith.truncf %57 : vector<8x256xf32> to vector<8x256xbf16>
    %c32 = arith.constant 32 : index
    %c0_51 = arith.constant 0 : index
    %59 = vector.load %arg10[%c32, %c0_51] : memref<72x256xbf16, #tpu.memory_space<vmem>>, vector<8x256xbf16>
    tpu.vector_store %arg10[%c32, %c0_51], %58 {strides = array<i32>} : memref<72x256xbf16, #tpu.memory_space<vmem>>, vector<8x256xbf16>,
    %c0_52 = arith.constant 0 : index
    %c1_53 = arith.constant 1 : index
    %c2_54 = arith.constant 2 : index
    %60 = vector.load %arg9[%c0_52, %c1_53, %c2_54] : memref<8x18x18xf32, #tpu.memory_space<vmem>>, vector<8x16x16xf32>
    %61 = vector.shape_cast %60 : vector<8x16x16xf32> to vector<8x256xf32>
    %62 = arith.truncf %61 : vector<8x256xf32> to vector<8x256xbf16>
    %c40 = arith.constant 40 : index
    %c0_55 = arith.constant 0 : index
    %63 = vector.load %arg10[%c40, %c0_55] : memref<72x256xbf16, #tpu.memory_space<vmem>>, vector<8x256xbf16>
    tpu.vector_store %arg10[%c40, %c0_55], %62 {strides = array<i32>} : memref<72x256xbf16, #tpu.memory_space<vmem>>, vector<8x256xbf16>,
    %c0_56 = arith.constant 0 : index
    %c2_57 = arith.constant 2 : index
    %c0_58 = arith.constant 0 : index
    %64 = vector.load %arg9[%c0_56, %c2_57, %c0_58] : memref<8x18x18xf32, #tpu.memory_space<vmem>>, vector<8x16x16xf32>
    %65 = vector.shape_cast %64 : vector<8x16x16xf32> to vector<8x256xf32>
    %66 = arith.truncf %65 : vector<8x256xf32> to vector<8x256xbf16>
    %c48 = arith.constant 48 : index
    %c0_59 = arith.constant 0 : index
    %67 = vector.load %arg10[%c48, %c0_59] : memref<72x256xbf16, #tpu.memory_space<vmem>>, vector<8x256xbf16>
    tpu.vector_store %arg10[%c48, %c0_59], %66 {strides = array<i32>} : memref<72x256xbf16, #tpu.memory_space<vmem>>, vector<8x256xbf16>,
    %c0_60 = arith.constant 0 : index
    %c2_61 = arith.constant 2 : index
    %c1_62 = arith.constant 1 : index
    %68 = vector.load %arg9[%c0_60, %c2_61, %c1_62] : memref<8x18x18xf32, #tpu.memory_space<vmem>>, vector<8x16x16xf32>
    %69 = vector.shape_cast %68 : vector<8x16x16xf32> to vector<8x256xf32>
    %70 = arith.truncf %69 : vector<8x256xf32> to vector<8x256xbf16>
    %c56 = arith.constant 56 : index
    %c0_63 = arith.constant 0 : index
    %71 = vector.load %arg10[%c56, %c0_63] : memref<72x256xbf16, #tpu.memory_space<vmem>>, vector<8x256xbf16>
    tpu.vector_store %arg10[%c56, %c0_63], %70 {strides = array<i32>} : memref<72x256xbf16, #tpu.memory_space<vmem>>, vector<8x256xbf16>,
    %c0_64 = arith.constant 0 : index
    %c2_65 = arith.constant 2 : index
    %c2_66 = arith.constant 2 : index
    %72 = vector.load %arg9[%c0_64, %c2_65, %c2_66] : memref<8x18x18xf32, #tpu.memory_space<vmem>>, vector<8x16x16xf32>
    %73 = vector.shape_cast %72 : vector<8x16x16xf32> to vector<8x256xf32>
    %74 = arith.truncf %73 : vector<8x256xf32> to vector<8x256xbf16>
    %c64 = arith.constant 64 : index
    %c0_67 = arith.constant 0 : index
    %75 = vector.load %arg10[%c64, %c0_67] : memref<72x256xbf16, #tpu.memory_space<vmem>>, vector<8x256xbf16>
    tpu.vector_store %arg10[%c64, %c0_67], %74 {strides = array<i32>} : memref<72x256xbf16, #tpu.memory_space<vmem>>, vector<8x256xbf16>,
    %c0_68 = arith.constant 0 : index
    %c0_69 = arith.constant 0 : index
    %76 = vector.load %arg5[%c0_68, %c0_69] : memref<4x72xbf16, #tpu.memory_space<vmem>>, vector<4x72xbf16>
    %c0_70 = arith.constant 0 : index
    %c0_71 = arith.constant 0 : index
    %77 = vector.load %arg10[%c0_70, %c0_71] : memref<72x256xbf16, #tpu.memory_space<vmem>>, vector<72x256xbf16>
    %cst_72 = arith.constant dense<0.000000e+00> : vector<4x256xf32>
    %78 = tpu.matmul %76, %77, %cst_72 {dimension_numbers = #tpu.dot_dimension_numbers<[1], [0], [0], [1], [0, 0, 1, 1], [], []>} : vector<4x72xbf16>, vector<72x256xbf16>, vector<4x256xf32> -> vector<4x256xf32>
    %c0_73 = arith.constant 0 : index
    %c0_74 = arith.constant 0 : index
    %c0_75 = arith.constant 0 : index
    %79 = vector.load %arg6[%c0_73, %c0_74, %c0_75] : memref<1x4x256xf32, #tpu.memory_space<vmem>>, vector<1x4x256xf32>
    %80 = vector.shape_cast %79 : vector<1x4x256xf32> to vector<4x256xf32>
    %81 = vector.shape_cast %78 : vector<4x256xf32> to vector<1x4x256xf32>
    tpu.vector_store %arg6[%c0_73, %c0_74, %c0_75], %81 {strides = array<i32>} : memref<1x4x256xf32, #tpu.memory_space<vmem>>, vector<1x4x256xf32>,
    %c0_76 = arith.constant 0 : index
    %c0_77 = arith.constant 0 : index
    %82 = vector.load %arg7[%c0_76, %c0_77] : memref<4x1xf32, #tpu.memory_space<vmem>>, vector<4x1xf32>
    %cst_78 = arith.constant dense<0.000000e+00> : vector<4xf32>
    %83 = vector.multi_reduction <add>, %78, %cst_78 [1] : vector<4x256xf32> to vector<4xf32>
    %84 = vector.shape_cast %83 : vector<4xf32> to vector<4x1xf32>
    %85 = arith.addf %82, %84 : vector<4x1xf32>
    %c0_79 = arith.constant 0 : index
    %c0_80 = arith.constant 0 : index
    %86 = vector.load %arg7[%c0_79, %c0_80] : memref<4x1xf32, #tpu.memory_space<vmem>>, vector<4x1xf32>
    tpu.vector_store %arg7[%c0_79, %c0_80], %85 {strides = array<i32>} : memref<4x1xf32, #tpu.memory_space<vmem>>, vector<4x1xf32>,
    %c0_81 = arith.constant 0 : index
    %c0_82 = arith.constant 0 : index
    %87 = vector.load %arg8[%c0_81, %c0_82] : memref<4x1xf32, #tpu.memory_space<vmem>>, vector<4x1xf32>
    %88 = arith.mulf %78, %78 : vector<4x256xf32>
    %cst_83 = arith.constant dense<0.000000e+00> : vector<4xf32>
    %89 = vector.multi_reduction <add>, %88, %cst_83 [1] : vector<4x256xf32> to vector<4xf32>
    %90 = vector.shape_cast %89 : vector<4xf32> to vector<4x1xf32>
    %91 = arith.addf %87, %90 : vector<4x1xf32>
    %c0_84 = arith.constant 0 : index
    %c0_85 = arith.constant 0 : index
    %92 = vector.load %arg8[%c0_84, %c0_85] : memref<4x1xf32, #tpu.memory_space<vmem>>, vector<4x1xf32>
    tpu.vector_store %arg8[%c0_84, %c0_85], %91 {strides = array<i32>} : memref<4x1xf32, #tpu.memory_space<vmem>>, vector<4x1xf32>,
    return
  }
  func.func @transform_0(%arg0: i32) -> (i32, i32, i32, i32) {
    %c0_i32 = arith.constant 0 : i32
    %c0_i32_0 = arith.constant 0 : i32
    %c0_i32_1 = arith.constant 0 : i32
    %c0_i32_2 = arith.constant 0 : i32
    return %arg0, %c0_i32, %c0_i32_0, %c0_i32_1 : i32, i32, i32, i32
  }
  func.func @transform_1(%arg0: i32) -> (i32, i32, i32, i32) {
    %c0_i32 = arith.constant 0 : i32
    %c0_i32_0 = arith.constant 0 : i32
    %c0_i32_1 = arith.constant 0 : i32
    %c0_i32_2 = arith.constant 0 : i32
    return %arg0, %c0_i32, %c0_i32_0, %c0_i32_1 : i32, i32, i32, i32
  }
  func.func @transform_2(%arg0: i32) -> (i32, i32) {
    %c0_i32 = arith.constant 0 : i32
    %c0_i32_0 = arith.constant 0 : i32
    %c0_i32_1 = arith.constant 0 : i32
    return %c0_i32, %c0_i32_0 : i32, i32
  }
  func.func @transform_3(%arg0: i32) -> (i32, i32) {
    %c0_i32 = arith.constant 0 : i32
    %c0_i32_0 = arith.constant 0 : i32
    %c0_i32_1 = arith.constant 0 : i32
    return %c0_i32, %c0_i32_0 : i32, i32
  }
  func.func @transform_4(%arg0: i32) -> (i32, i32) {
    %c0_i32 = arith.constant 0 : i32
    %c0_i32_0 = arith.constant 0 : i32
    %c0_i32_1 = arith.constant 0 : i32
    return %c0_i32, %c0_i32_0 : i32, i32
  }
  func.func @transform_5(%arg0: i32) -> (i32, i32, i32) {
    %c0_i32 = arith.constant 0 : i32
    %c0_i32_0 = arith.constant 0 : i32
    %c0_i32_1 = arith.constant 0 : i32
    return %arg0, %c0_i32, %c0_i32_0 : i32, i32, i32
  }
  func.func @transform_6(%arg0: i32) -> (i32, i32) {
    %c0_i32 = arith.constant 0 : i32
    %c0_i32_0 = arith.constant 0 : i32
    %c0_i32_1 = arith.constant 0 : i32
    return %c0_i32, %c0_i32_0 : i32, i32
  }
  func.func @transform_7(%arg0: i32) -> (i32, i32) {
    %c0_i32 = arith.constant 0 : i32
    %c0_i32_0 = arith.constant 0 : i32
    %c0_i32_1 = arith.constant 0 : i32
    return %c0_i32, %c0_i32_0 : i32, i32
  }
}

</mosaic_0001>

<bundles_post_ra>
// kernel: tpu_custom_call.1
= control target key start
LH: loop header
LB: loop body
LE: loop exit
PB: predicated region body
PF: predicated region fallthrough
CT: control target
= control target key end

     0   :  { %13 = vsyncpa [#allocation5], 0  ;;  %s8233_s0 = inlined_call_operand.vmem [shape: f32[2,4,16,16], index: 0, kind: input, shape index: {}]   ;;  %s8234_s1 = inlined_call_operand.vmem [shape: f32[2,4,7,7], index: 1, kind: input, shape index: {}]   ;;  %s8235_s2 = inlined_call_operand.vmem [shape: f32[14,7], index: 2, kind: input, shape index: {}]   ;;  %s8236_s3 = inlined_call_operand.vmem [shape: f32[7,14], index: 3, kind: input, shape index: {}]   ;;  %s8237_s4 = inlined_call_operand.vmem [shape: bf16[4,72], index: 4, kind: input, shape index: {}]   ;;  %s8238_s5 = inlined_call_operand.hbm [shape: f32[2,4,256], index: 5, kind: output, shape index: {0}]   ;;  %s8239_s6 = inlined_call_operand.vmem [shape: f32[4,1], index: 6, kind: output, shape index: {1}]   ;;  %s8240_s7 = inlined_call_operand.vmem [shape: f32[4,1], index: 7, kind: output, shape index: {2}]  }
   0x1   :  { %15 = vsyncpa [#allocation5 + $0x1], 0  ;;  %s4971_s24 = smov 0   ;;  %s4973_s25 = smov 0  }
   0x2   :  { %s4975_s26 = smov 0   ;;  %s4977_s27 = smov 0  }
   0x3 LB: > { %s4992_s28 = sadd.s32 4294967295, %s4915_s27   ;;  %s4168_s29 = sadd.s32 4294967294, %s4915_s27   ;;  %s4915_s27 = sphi %s4977_s27, %s8906_s27   ;;  %s4911_s26 = sphi %s4975_s26, %s8905_s26   ;;  %s4907_s25 = sphi %s4973_s25, %s8904_s25   ;;  %s4903_s24 = sphi %s4971_s24, %s8903_s24  }
   0x4   : > { %s4996_s30 = sadd.s32 1, %s4915_s27   ;;  %s143_s8 = sadd.s32 1, %s4911_s26 }
   0x5   : > { %s140_s9 = ssub.s32 %s4915_s27, %s4996_s30  ;;  %p153_p0 = scmp.ne.s32.totalorder %s4911_s26, %s4907_s25 }
   0x6   : > { %p141_p1 = scmp.eq.s32.totalorder %s140_s9, 0  ;;  %p154_p2 = scmp.eq.s32.totalorder %s4992_s28, 1 }
   0x7   : > { %p159_p3 = scmp.ne.s32.totalorder %s4907_s25, %s4903_s24  ;;  %p160_p4 = scmp.eq.s32.totalorder %s4168_s29, 1 }
   0x8   : > { %s5007_s10 = scalar_select %p141_p1, %s4911_s26, %s143_s8  }
   0x9   : > { %p5009_p5 = por %p154_p2, %p153_p0  ;;  %p5013_p6 = por %p160_p4, %p159_p3 }
   0xa   : > { %p4171_p7 = scmp.ge.s32.totalorder %s4915_s27, 1  ;;  %p245_p8 = scmp.lt.s32.totalorder %s4915_s27, 3 }
   0xc   : > { %p246_p9 = pnand %p4171_p7, %p245_p8 }
   0xe   : > { %249 = sbr.rel (%p246_p9) target bundleno = 1200 (0x4b0), region = 40 }
  0x13   : > { %s275_s13 = sand.u32 1, %s4907_s25   ;;  %p282_p10 = scmp.lt.s32.totalorder %s4992_s28, 1 }
  0x14   : > { %s5023_s14 = sshll.u32 %s275_s13, 3  ;;  %p4177_p11 = scmp.ne.s32.totalorder %s4992_s28, 0 }
  0x15   : > { %s283_s15 = scalar_select %p282_p10, %s4992_s28, 1 }
  0x16   : > { %s277_s29 = scalar_lea.vmem [#allocation4], %s5023_s14  ;;  %296 = sbr.rel (%p4177_p11) target bundleno = 54 (0x36), region = 44 }
  0x17   : > { %s4234_s16 = sshll.u32 %s283_s15, 6  ;;  %s4235_s17 = sshll.u32 %s283_s15, 5 }
  0x18   : > { %s5029_s20 = scalar_lea.vmem %s8233_s0, %s4234_s16  ;;  %s5034_s23 = scalar_lea.vmem %s8234_s1, %s4235_s17 }
  0x1b   : > { %vm297_vm0 = vcmask 146432   ;;  %v4917_v0 = vmov 0.0   ;;  %vm300_vm1 = vcmask 140288   ;;  %vm323_vm2 = vcmask 3072  }
  0x1c   : > { %298 = vst.msk [vmem:[#allocation2] sm:$0xff] %vm297_vm0, %v4917_v0 }
  0x1d   : > { %299 = vst.msk [vmem:[#allocation2 + $0x8] sm:$0xff] %vm297_vm0, %v4917_v0 }
  0x1e   : > { %302 = vst.msk [vmem:[#allocation2 + $0x18] sm:$0xff] %vm297_vm0, %v4917_v0 }
  0x1f   : > { %303 = vst.msk [vmem:[#allocation2 + $0x20] sm:$0xff] %vm297_vm0, %v4917_v0 }
  0x20   : > { %305 = vst.msk [vmem:[#allocation2 + $0x30] sm:$0xff] %vm297_vm0, %v4917_v0 }
  0x21   : > { %306 = vst.msk [vmem:[#allocation2 + $0x38] sm:$0xff] %vm297_vm0, %v4917_v0 }
  0x22   : > { %308 = vst.msk [vmem:[#allocation2 + $0x48] sm:$0xff] %vm297_vm0, %v4917_v0 }
  0x23   : > { %309 = vst.msk [vmem:[#allocation2 + $0x50] sm:$0xff] %vm297_vm0, %v4917_v0 }
  0x24   : > { %311 = vst.msk [vmem:[#allocation2 + $0x60] sm:$0xff] %vm297_vm0, %v4917_v0 }
  0x25   : > { %312 = vst.msk [vmem:[#allocation2 + $0x68] sm:$0xff] %vm297_vm0, %v4917_v0 }
  0x26   : > { %314 = vst.msk [vmem:[#allocation2 + $0x78] sm:$0xff] %vm297_vm0, %v4917_v0 }
  0x27   : > { %315 = vst.msk [vmem:[#allocation2 + $0x80] sm:$0xff] %vm297_vm0, %v4917_v0 }
  0x28   : > { %317 = vst.msk [vmem:[#allocation2 + $0x90] sm:$0xff] %vm297_vm0, %v4917_v0 }
  0x29   : > { %318 = vst.msk [vmem:[#allocation2 + $0x98] sm:$0xff] %vm297_vm0, %v4917_v0 }
  0x2a   : > { %320 = vst.msk [vmem:[#allocation2 + $0xa8] sm:$0xff] %vm297_vm0, %v4917_v0 }
  0x2b   : > { %321 = vst.msk [vmem:[#allocation2 + $0xb0] sm:$0xff] %vm297_vm0, %v4917_v0 }
  0x2c   : > { %301 = vst.msk [vmem:[#allocation2 + $0x10] sm:$0x3] %vm300_vm1, %v4917_v0 }
  0x2d   : > { %304 = vst.msk [vmem:[#allocation2 + $0x28] sm:$0x3] %vm300_vm1, %v4917_v0 }
  0x2e   : > { %307 = vst.msk [vmem:[#allocation2 + $0x40] sm:$0x3] %vm300_vm1, %v4917_v0 }
  0x2f   : > { %310 = vst.msk [vmem:[#allocation2 + $0x58] sm:$0x3] %vm300_vm1, %v4917_v0 }
  0x30   : > { %313 = vst.msk [vmem:[#allocation2 + $0x70] sm:$0x3] %vm300_vm1, %v4917_v0 }
  0x31   : > { %316 = vst.msk [vmem:[#allocation2 + $0x88] sm:$0x3] %vm300_vm1, %v4917_v0 }
  0x32   : > { %319 = vst.msk [vmem:[#allocation2 + $0xa0] sm:$0x3] %vm300_vm1, %v4917_v0 }
  0x33   : > { %322 = vst.msk [vmem:[#allocation2 + $0xb8] sm:$0x3] %vm300_vm1, %v4917_v0 }
  0x34   : > { %324 = vst.msk [vmem:[%s8239_s6] sm:$0xf] %vm323_vm2, %v4917_v0 }
  0x35   : > { %325 = vst.msk [vmem:[%s8240_s7] sm:$0xf] %vm323_vm2, %v4917_v0 }
  0x36 PF: > { %v704_v1 = vld [vmem:[%s5029_s20 + $0x10] sm:$0xff]  ;;  %v358_v2 = vld [vmem:[%s8236_s3] sm:$0x7f]  ;;  %vm407_vm3 = vcmask 1046528   ;;  %s4918_s19 = smov 1   ;;  %v703_v5 = vld [vmem:[%s5029_s20 + $0x8] sm:$0xff] }
  0x37   : > { %722 = vrot.lane.b32.xlu1 %v704_v1, %s4918_s19  ;;  %4178 = vmatpush.msk.msra.mxu0 %vm407_vm3, %v358_v2  ;;  %v326_v3 = vld [vmem:[%s5034_s23] sm:$0x7f]  ;;  %v327_v4 = vld [vmem:[%s5034_s23 + $0x8] sm:$0x7f]  ;;  %vm398_vm4 = vcmask 56320   ;;  %v709_v18 = vld [vmem:[%s5029_s20 + $0x38] sm:$0xff] }
  0x38   : > { %v334_v6 = vrot.slane %v326_v3, 1  ;;  %v335_v7 = vrot.slane %v326_v3, 2  ;;  %v336_v8 = vrot.slane %v326_v3, 3  ;;  %359 = vst [vmem:[#allocation1] ss:$9 sm:$0xff] %v326_v3  ;;  %720 = vrot.lane.b32.xlu0 %v703_v5, %s4918_s19  ;;  %v337_v9 = vrot.slane %v326_v3, 4 }
  0x39   : > { %373 = vst [vmem:[#allocation1 + $0x7] ss:$9 sm:$0xff] %v327_v4  ;;  %v338_v10 = vrot.slane %v326_v3, 5  ;;  %v339_v11 = vrot.slane %v326_v3, 6  ;;  %v702_v12 = vld [vmem:[%s5029_s20] sm:$0xff]  ;;  %v707_v13 = vld [vmem:[%s5029_s20 + $0x28] sm:$0xff] }
  0x3a   : > { %361 = vst [vmem:[#allocation1 + $0x1] ss:$9 sm:$0xff] %v334_v6  ;;  %v706_v14 = vld [vmem:[%s5029_s20 + $0x20] sm:$0xff]  ;;  %718 = vrot.lane.b32.xlu2 %v702_v12, %s4918_s19  ;;  %v340_v15 = vrot.slane %v327_v4, 1  ;;  %v341_v16 = vrot.slane %v327_v4, 2  ;;  %v342_v17 = vrot.slane %v327_v4, 3 }
  0x3b   : > { %363 = vst [vmem:[#allocation1 + $0x2] ss:$9 sm:$0xff] %v335_v7  ;;  %v705_v19 = vld [vmem:[%s5029_s20 + $0x18] sm:$0xff]  ;;  %v343_v21 = vrot.slane %v327_v4, 4  ;;  %v328_v22 = vld [vmem:[%s5034_s23 + $0x10] sm:$0x7f] }
  0x3c   : > { %365 = vst [vmem:[#allocation1 + $0x3] ss:$9 sm:$0xff] %v336_v8  ;;  %v344_v23 = vrot.slane %v327_v4, 5  ;;  %v345_v24 = vrot.slane %v327_v4, 6  ;;  %v346_v25 = vrot.slane %v328_v22, 1  ;;  %v708_v26 = vld [vmem:[%s5029_s20 + $0x30] sm:$0xff] }
  0x3d   : > { %367 = vst [vmem:[#allocation1 + $0x4] ss:$9 sm:$0xff] %v337_v9  ;;  %v347_v27 = vrot.slane %v328_v22, 2  ;;  %v348_v28 = vrot.slane %v328_v22, 3  ;;  %v349_v29 = vrot.slane %v328_v22, 4  ;;  %v350_v32 = vrot.slane %v328_v22, 5 }
  0x3e   : > { %369 = vst [vmem:[#allocation1 + $0x5] ss:$9 sm:$0xff] %v338_v10  ;;  %v329_v31 = vld [vmem:[%s5034_s23 + $0x18] sm:$0x7f]  ;;  %v351_v33 = vrot.slane %v328_v22, 6  ;;  %vm742_vm5 = vcmask 138248  }
  0x3f   : > { %371 = vst [vmem:[#allocation1 + $0x6] ss:$9 sm:$0xff] %v339_v11  ;;  %728 = vrot.lane.b32.xlu1 %v707_v13, %s4918_s19  ;;  %v352_v34 = vrot.slane %v329_v31, 1  ;;  %v353_v35 = vrot.slane %v329_v31, 2  ;;  %v354_v36 = vrot.slane %v329_v31, 3  ;;  %v355_v37 = vrot.slane %v329_v31, 4 }
  0x40   : > { %726 = vrot.lane.b32.xlu0 %v706_v14, %s4918_s19  ;;  %v356_v38 = vrot.slane %v329_v31, 5  ;;  %v357_v40 = vrot.slane %v329_v31, 6  ;;  %s4919_s20 = smov 127   ;;  %s4920_s21 = smov 126   ;;  %v5109_v9 = vld [vmem:[%s8235_s2] sm:$0xff]  ;;  %vm768_vm6 = vcmask 1047556  }
  0x41   : > { %s4922_s23 = smov 2   ;;  %vm524_vm7 = vcmask 130064   ;;  %vm526_vm8 = vcmask 128016   ;;  %s4926_s8 = smov 48   ;;  %vm1048_vm9 = vcmask 130048   ;;  %vm1050_vm10 = vcmask 261120  }
  0x42   : > { %724 = vrot.lane.b32.xlu2 %v705_v19, %s4918_s19  ;;  %s4927_s9 = smov 96   ;;  %s4928_s15 = smov 32   ;;  %vm1052_vm11 = vcmask 392192   ;;  %vm1054_vm12 = vcmask 523264   ;;  %vm1056_vm13 = vcmask 654336   ;;  %vm1058_vm14 = vcmask 785408  }
  0x43   : > { %s4929_s16 = smov 16   ;;  %s4930_s17 = smov 64   ;;  %vm1060_vm15 = vcmask 916480   ;;  %vm4010_vm0 = vcmask 1043456   ;;  %vm4006_vm1 = vcmask 588800  }
  0x44   : > { %s4244_s22 = sshll.u32 %s4992_s28, 3 }
  0x46   : > { %v374_v20 = vld [vmem:[#allocation1] sm:$0xff] }
  0x47   : > { %4179 = vmatmul.msk.f32.vlgmr.msra.gmra.mxu0 %vm398_vm4, %v374_v20  ;;  %375 = vst [vmem:[#allocation1] ss:$9 sm:$0xff] %v340_v15 }
  0x48   : > { %376 = vst [vmem:[#allocation1 + $0x1] ss:$9 sm:$0xff] %v341_v16  ;;  %732 = vrot.lane.b32.xlu0 %v709_v18, %s4918_s19 }
  0x49   : > { %377 = vst [vmem:[#allocation1 + $0x2] ss:$9 sm:$0xff] %v342_v17 }
  0x4a   : > { %378 = vst [vmem:[#allocation1 + $0x3] ss:$9 sm:$0xff] %v343_v21  ;;  %730 = vrot.lane.b32.xlu2 %v708_v26, %s4918_s19  ;;  %s4873_s19 = scalar_lea.hbm %s8238_s5, 16 }
  0x4b   : > { %379 = vst [vmem:[#allocation1 + $0x4] ss:$9 sm:$0xff] %v344_v23  ;;  %v469_v23 = vld [vmem:[%s8235_s2 + $0x8] sm:$0x3f] }
  0x4c   : > { %380 = vst [vmem:[#allocation1 + $0x5] ss:$9 sm:$0xff] %v345_v24 }
  0x4d   : > { %381 = vst [vmem:[#allocation1 + $0x6] ss:$9 sm:$0xff] %v328_v22 }
  0x4e   : > { %382 = vst [vmem:[#allocation1 + $0x7] ss:$9 sm:$0xff] %v346_v25 }
  0x55   : > { %v383_v30 = vld [vmem:[#allocation1] sm:$0xff] }
  0x56   : > { %4180 = vmatmul.msk.f32.gmra.mxu0 %vm398_vm4, %v383_v30  ;;  %384 = vst [vmem:[#allocation1] ss:$9 sm:$0xff] %v347_v27 }
  0x57   : > { %385 = vst [vmem:[#allocation1 + $0x1] ss:$9 sm:$0xff] %v348_v28 }
  0x58   : > { %386 = vst [vmem:[#allocation1 + $0x2] ss:$9 sm:$0xff] %v349_v29 }
  0x59   : > { %387 = vst [vmem:[#allocation1 + $0x3] ss:$9 sm:$0xff] %v350_v32 }
  0x5a   : > { %388 = vst [vmem:[#allocation1 + $0x4] ss:$9 sm:$0xff] %v351_v33 }
  0x5b   : > { %389 = vst [vmem:[#allocation1 + $0x5] ss:$9 sm:$0xff] %v329_v31 }
  0x5c   : > { %390 = vst [vmem:[#allocation1 + $0x6] ss:$9 sm:$0xff] %v352_v34 }
  0x5d   : > { %391 = vst [vmem:[#allocation1 + $0x7] ss:$9 sm:$0xff] %v353_v35 }
  0x64   : > { %v392_v39 = vld [vmem:[#allocation1] sm:$0xff] }
  0x65   : > { %4181 = vmatmul.msk.f32.gmra.mxu0 %vm398_vm4, %v392_v39  ;;  %393 = vst [vmem:[#allocation1] ss:$9 sm:$0xff] %v354_v36 }
  0x66   : > { %394 = vst [vmem:[#allocation1 + $0x1] ss:$9 sm:$0xff] %v355_v37 }
  0x67   : > { %395 = vst [vmem:[#allocation1 + $0x2] ss:$9 sm:$0xff] %v356_v38 }
  0x68   : > { %396 = vst [vmem:[#allocation1 + $0x3] ss:$9 sm:$0xff] %v357_v40  ;;  %v529_v40 = vld [vmem:[%s8235_s2 + $0x8] sm:$0x3f] }
  0x6f   : > { %v397_v41 = vld [vmem:[#allocation1] sm:$0xff] }
  0x70   : > { %4182 = vmatmul.msk.f32.gmra.mxu0 %vm398_vm4, %v397_v41 }
  0x94   : > { %v719_v42 = vpop.permute.xlu2 %718 }
  0x95   : > { %743 = vst.msk [vmem:[#allocation2 + $0x1] sm:$0xff] %vm742_vm5, %v719_v42 }
  0x9c   : > { %v725_v43 = vpop.permute.xlu2 %724  ;;  %v2135_v53 = vld [vmem:[#allocation2 + $0x1] sm:$0xff] }
  0x9d   : > { %746 = vst.msk [vmem:[#allocation2 + $0x21] sm:$0xff] %vm742_vm5, %v725_v43  ;;  %v1071_v3 = vld [vmem:[#allocation2] sm:$0xff] }
  0xa4   : > { %v731_v52 = vpop.permute.xlu2 %730  ;;  %v5117_v18 = vld [vmem:[#allocation2 + $0x21] sm:$0xff] }
  0xa5   : > { %749 = vst.msk [vmem:[#allocation2 + $0x49] sm:$0xff] %vm742_vm5, %v731_v52  ;;  %v3202_v43 = vld [vmem:[#allocation2 + $0x22] sm:$0xff] }
  0xa9   : > { %v723_v44 = vpop.permute.xlu1 %722 }
  0xaa   : > { %745 = vst.msk [vmem:[#allocation2 + $0x19] sm:$0xff] %vm742_vm5, %v723_v44  ;;  %v721_v45 = vpop.permute.xlu0 %720 }
  0xab   : > { %744 = vst.msk [vmem:[#allocation2 + $0x9] sm:$0xff] %vm742_vm5, %v721_v45 }
  0xac   : > { %v2141_v4 = vld [vmem:[#allocation2 + $0x49] sm:$0xff] }
  0xad   : > { %v1077_v20 = vld [vmem:[#allocation2 + $0x48] sm:$0xff] }
  0xb1   : > { %v1073_v46 = vld [vmem:[#allocation2 + $0x18] sm:$0xff]  ;;  %v1074_v47 = vld [vmem:[#allocation2 + $0x20] sm:$0xff]  ;;  %v729_v50 = vpop.permute.xlu1 %728 }
  0xb2   : > { %v4303_v48 = vpack.i.bf16 %v1074_v47, %v1073_v46  ;;  %v727_v49 = vpop.permute.xlu0 %726  ;;  %748 = vst.msk [vmem:[#allocation2 + $0x39] sm:$0xff] %vm742_vm5, %v729_v50  ;;  %v2136_v54 = vld [vmem:[#allocation2 + $0x9] sm:$0xff]  ;;  %v5115_v17 = vld [vmem:[#allocation2 + $0x19] sm:$0xff] }
  0xb3   : > { %747 = vst.msk [vmem:[#allocation2 + $0x31] sm:$0xff] %vm742_vm5, %v727_v49  ;;  %v4338_v55 = vpack.i.bf16 %v2136_v54, %v2135_v53  ;;  %v1072_v5 = vld [vmem:[#allocation2 + $0x8] sm:$0xff]  ;;  %v4343_v19 = vpack.i.bf16 %v5117_v18, %v5115_v17  ;;  %v3201_v42 = vld [vmem:[#allocation2 + $0x1a] sm:$0xff] }
  0xb4   : > { %4304 = vrot.lane.b32.xlu0 %v4303_v48, %s4919_s20  ;;  %v4298_v7 = vpack.i.bf16 %v1072_v5, %v1071_v3  ;;  %v3575_v38 = vld [vmem:[#allocation2 + $0x2] sm:$0xff]  ;;  %v3576_v39 = vld [vmem:[#allocation2 + $0xa] sm:$0xff]  ;;  %v4398_v50 = vpack.i.bf16 %v3202_v43, %v3201_v42 }
  0xb5   : > { %v4388_v41 = vpack.i.bf16 %v3576_v39, %v3575_v38 }
  0xb6   : > { %4299 = vrot.lane.b32.xlu2 %v4298_v7, %s4919_s20 }
  0xb9   : > { %v3580_v36 = vld [vmem:[#allocation2 + $0x3a] sm:$0xff] }
  0xba   : > { %v733_v51 = vpop.permute.xlu0 %732  ;;  %v1075_v56 = vld [vmem:[#allocation2 + $0x30] sm:$0xff]  ;;  %v1076_v57 = vld [vmem:[#allocation2 + $0x38] sm:$0xff] }
  0xbb   : > { %750 = vst.msk [vmem:[#allocation2 + $0x51] sm:$0xff] %vm742_vm5, %v733_v51  ;;  %v4308_v58 = vpack.i.bf16 %v1076_v57, %v1075_v56  ;;  %v3579_v35 = vld [vmem:[#allocation2 + $0x32] sm:$0xff]  ;;  %v587_v56 = vld [vmem:[%s8235_s2 + $0x8] sm:$0x3f]  ;;  %v4921_v57 = vmov 1983009808  }
  0xbc   : > { %4324 = vrot.lane.b32.xlu0 %v4303_v48, %s4920_s21  ;;  %v5136_v37 = vpack.i.bf16 %v3580_v36, %v3579_v35  ;;  %v5146_v44 = vld [vmem:[#allocation2 + $0x31] sm:$0xff]  ;;  %v5148_v45 = vld [vmem:[#allocation2 + $0x39] sm:$0xff] }
  0xbd   : > { %4309 = vrot.lane.b32.xlu1 %v4308_v58, %s4919_s20  ;;  %v4348_v51 = vpack.i.bf16 %v5148_v45, %v5146_v44 }
  0xc2   : > { %v2142_v2 = vld [vmem:[#allocation2 + $0x51] sm:$0xff] }
  0xc3   : > { %v5100_v6 = vpack.i.bf16 %v2142_v2, %v2141_v4  ;;  %v1078_v21 = vld [vmem:[#allocation2 + $0x50] sm:$0xff] }
  0xc4   : > { %v428_v59 = vpop.f32.mrf.mxu0  ;;  %4339 = vrot.lane.b32.xlu0 %v4338_v55, %s4919_s20  ;;  %v4313_v22 = vpack.i.bf16 %v1078_v21, %v1077_v20  ;;  %v3581_v25 = vld [vmem:[#allocation2 + $0x4a] sm:$0xff]  ;;  %v3582_v26 = vld [vmem:[#allocation2 + $0x52] sm:$0xff]  ;;  %v1839_v20 = vrot.slane %v5146_v44, 4 }
  0xc5   : > { %v444_v60 = vrot.slane %v428_v59, 1  ;;  %v445_v61 = vrot.slane %v428_v59, 2  ;;  %v446_v62 = vrot.slane %v428_v59, 3  ;;  %470 = vst [vmem:[#allocation1] ss:$9 sm:$0xff] %v428_v59  ;;  %v447_v63 = vrot.slane %v428_v59, 4  ;;  %4329 = vrot.lane.b32.xlu1 %v4308_v58, %s4920_s21 }
  0xc6   : > { %v448_v0 = vrot.slane %v428_v59, 5  ;;  %v449_v1 = vrot.slane %v428_v59, 6  ;;  %v450_v8 = vrot.slane %v428_v59, 7  ;;  %4314 = vrot.lane.b32.xlu2 %v4313_v22, %s4919_s20  ;;  %v5127_v28 = vpack.i.bf16 %v3582_v26, %v3581_v25  ;;  %v1824_v4 = vld [vmem:[#allocation2 + $0x9] sm:$0xff] }
  0xc7   : > { %472 = vst [vmem:[#allocation1 + $0x1] ss:$9 sm:$0xff] %v444_v60  ;;  %v773_v58 = vunpack.c.l.s4 %v4921_v57  ;;  %v1853_v59 = vrot.slane %v5115_v17, 4  ;;  %v1823_v60 = vld [vmem:[#allocation2 + $0x1] sm:$0xff] }
  0xc8   : > { %474 = vst [vmem:[#allocation1 + $0x2] ss:$9 sm:$0xff] %v445_v61  ;;  %v1841_v61 = vrot.slane %v1823_v60, 4 }
  0xc9   : > { %476 = vst [vmem:[#allocation1 + $0x3] ss:$9 sm:$0xff] %v446_v62  ;;  %v5166_v62 = vunpack.c.0.s8 %v773_v58 }
  0xca   : > { %478 = vst [vmem:[#allocation1 + $0x4] ss:$9 sm:$0xff] %v447_v63  ;;  %v1829_v63 = vld [vmem:[#allocation2 + $0x49] sm:$0xff] }
  0xcb   : > { %480 = vst [vmem:[#allocation1 + $0x5] ss:$9 sm:$0xff] %v448_v0  ;;  %v1854_v2 = vsel %vm768_vm6, %v1829_v63, %v1853_v59  ;;  %v1851_v21 = vrot.slane %v1829_v63, 4 }
  0xcc   : > { %482 = vst [vmem:[#allocation1 + $0x6] ss:$9 sm:$0xff] %v449_v1  ;;  %4354 = vrot.lane.b32.xlu0 %v5100_v6, %s4919_s20  ;;  %v1842_v1 = vsel %vm768_vm6, %v5146_v44, %v1841_v61  ;;  %v1862_v5 = vperm.slane %v1854_v2, %v5166_v62 }
  0xcd   : > { %4344 = vrot.lane.b32.xlu1 %v4343_v19, %s4919_s20  ;;  %8409 = vst [vmem:[#allocation7_spill] sm:$0xff] %v5166_v62  ;;  %v1850_v3 = vperm.slane %v1842_v1, %v5166_v62  ;;  %v1852_v26 = vsel %vm768_vm6, %v1851_v21, %v5115_v17 }
  0xce   : > { %4319 = vrot.lane.b32.xlu2 %v4298_v7, %s4920_s21  ;;  %v1953_v7 = vrot.slane %v1824_v4, 4 }
  0xd3   : > { %v483_v10 = vld [vmem:[#allocation1] sm:$0xff]  ;;  %v431_v11 = vpop.f32.mrf.mxu0 }
  0xd4   : > { %530 = vst [vmem:[#allocation1] ss:$9 sm:$0xff] %v450_v8  ;;  %v451_v12 = vrot.slane %v431_v11, 1  ;;  %v452_v13 = vrot.slane %v431_v11, 2  ;;  %v453_v14 = vrot.slane %v431_v11, 3  ;;  %4183 = vmatpush.msk.msra.mxu1 %vm407_vm3, %v483_v10  ;;  %4359 = vrot.lane.b32.xlu0 %v4338_v55, %s4920_s21  ;;  %v454_v15 = vrot.slane %v431_v11, 4 }
  0xd5   : > { %532 = vst [vmem:[#allocation1 + $0x1] ss:$9 sm:$0xff] %v431_v11  ;;  %4184 = vmatmul.msk.f32.vlgmr.msra.gmra.mxu1 %vm398_vm4, %v5109_v9  ;;  %v455_v16 = vrot.slane %v431_v11, 5  ;;  %v457_v24 = vrot.slane %v431_v11, 7  ;;  %v456_v27 = vrot.slane %v431_v11, 6  ;;  %4364 = vrot.lane.b32.xlu1 %v4343_v19, %s4920_s21  ;;  %v1954_v10 = vsel %vm768_vm6, %v5148_v45, %v1953_v7 }
  0xd6   : > { %534 = vst [vmem:[#allocation1 + $0x2] ss:$9 sm:$0xff] %v451_v12  ;;  %4334 = vrot.lane.b32.xlu2 %v4313_v22, %s4920_s21  ;;  %v1965_v11 = vrot.slane %v5117_v18, 4  ;;  %v645_v12 = vld [vmem:[%s8235_s2 + $0x8] sm:$0x3f]  ;;  %v1951_v22 = vrot.slane %v5148_v45, 4 }
  0xd7   : > { %536 = vst [vmem:[#allocation1 + $0x3] ss:$9 sm:$0xff] %v452_v13  ;;  %v1962_v13 = vperm.slane %v1954_v10, %v5166_v62 }
  0xd8   : > { %538 = vst [vmem:[#allocation1 + $0x4] ss:$9 sm:$0xff] %v453_v14 }
  0xd9   : > { %540 = vst [vmem:[#allocation1 + $0x5] ss:$9 sm:$0xff] %v454_v15 }
  0xda   : > { %542 = vst [vmem:[#allocation1 + $0x6] ss:$9 sm:$0xff] %v455_v16  ;;  %v2013_v16 = vrot.slane %v1962_v13, 4 }
  0xdc   : > { %4374 = vrot.lane.b32.xlu0 %v5127_v28, %s4920_s21 }
  0xdd   : > { %4185 = vmatmul.msk.f32.gmra.mxu1 %vm398_vm4, %v469_v23  ;;  %4389 = vrot.lane.b32.xlu1 %v4388_v41, %s4920_s21 }
  0xde   : > { %4349 = vrot.lane.b32.xlu2 %v4348_v51, %s4919_s20 }
  0xe1   : > { %v543_v29 = vld [vmem:[#allocation1] sm:$0xff] }
  0xe2   : > { %590 = vst [vmem:[#allocation1 + $0x1] ss:$9 sm:$0xff] %v457_v24  ;;  %v434_v30 = vpop.f32.mrf.mxu0  ;;  %4186 = vmatpush.msk.msra.mxu2 %vm407_vm3, %v543_v29  ;;  %v1840_v24 = vsel %vm768_vm6, %v1839_v20, %v1823_v60  ;;  %v1858_v29 = vperm.slane %v1852_v26, %v5166_v62 }
  0xe3   : > { %588 = vst [vmem:[#allocation1] ss:$9 sm:$0xff] %v456_v27  ;;  %v458_v31 = vrot.slane %v434_v30, 1  ;;  %v459_v32 = vrot.slane %v434_v30, 2  ;;  %v460_v33 = vrot.slane %v434_v30, 3  ;;  %4187 = vmatmul.msk.f32.vlgmr.msra.gmra.mxu2 %vm398_vm4, %v5109_v9  ;;  %v461_v34 = vrot.slane %v434_v30, 4 }
  0xe4   : > { %592 = vst [vmem:[#allocation1 + $0x2] ss:$9 sm:$0xff] %v434_v30  ;;  %4384 = vrot.lane.b32.xlu0 %v5136_v37, %s4920_s21  ;;  %v462_v46 = vrot.slane %v434_v30, 5  ;;  %v463_v47 = vrot.slane %v434_v30, 6  ;;  %v464_v49 = vrot.slane %v434_v30, 7  ;;  %v1846_v25 = vperm.slane %v1840_v24, %v5166_v62 }
  0xe5   : > { %594 = vst [vmem:[#allocation1 + $0x3] ss:$9 sm:$0xff] %v458_v31  ;;  %4399 = vrot.lane.b32.xlu1 %v4398_v50, %s4919_s20  ;;  %v1952_v27 = vsel %vm768_vm6, %v1951_v22, %v1824_v4 }
  0xe6   : > { %596 = vst [vmem:[#allocation1 + $0x4] ss:$9 sm:$0xff] %v459_v32  ;;  %4369 = vrot.lane.b32.xlu2 %v4348_v51, %s4920_s21  ;;  %v1889_v30 = vrot.slane %v1846_v25, 4  ;;  %v1958_v31 = vperm.slane %v1952_v27, %v5166_v62 }
  0xe7   : > { %598 = vst [vmem:[#allocation1 + $0x5] ss:$9 sm:$0xff] %v460_v33  ;;  %v1899_v33 = vrot.slane %v1862_v5, 4 }
  0xe8   : > { %600 = vst [vmem:[#allocation1 + $0x6] ss:$9 sm:$0xff] %v461_v34  ;;  %v1887_v34 = vrot.slane %v1858_v29, 4  ;;  %v5210_v35 = vsel %vm768_vm6, %v1858_v29, %v1889_v30  ;;  %v2001_v36 = vrot.slane %v1958_v31, 4 }
  0xe9   : > { %v5213_v17 = vsel %vm768_vm6, %v1899_v33, %v1850_v3 }
  0xeb   : > { %4188 = vmatmul.msk.f32.gmra.mxu2 %vm398_vm4, %v529_v40 }
  0xec   : > { %4409 = vrot.lane.b32.xlu0 %v5100_v6, %s4920_s21  ;;  %v1901_v6 = vrot.slane %v1850_v3, 4 }
  0xed   : > { %v437_v48 = vpop.f32.mrf.mxu0  ;;  %4414 = vrot.lane.b32.xlu1 %v4388_v41, %s4919_s20 }
  0xee   : > { %v465_v53 = vrot.slane %v437_v48, 1  ;;  %v466_v54 = vrot.slane %v437_v48, 2  ;;  %v467_v55 = vrot.slane %v437_v48, 3  ;;  %4379 = vrot.lane.b32.xlu2 %v4398_v50, %s4920_s21  ;;  %v5178_v8 = vsel %vm768_vm6, %v1862_v5, %v1901_v6 }
  0xef   : > { %v601_v52 = vld [vmem:[#allocation1] sm:$0xff] }
  0xf0   : > { %4189 = vmatpush.msk.msra.mxu3 %vm407_vm3, %v601_v52  ;;  %646 = vst [vmem:[#allocation1] ss:$9 sm:$0xff] %v462_v46 }
  0xf1   : > { %648 = vst [vmem:[#allocation1 + $0x1] ss:$9 sm:$0xff] %v463_v47  ;;  %4190 = vmatmul.msk.f32.vlgmr.msra.gmra.mxu3 %vm398_vm4, %v5109_v9 }
  0xf2   : > { %650 = vst [vmem:[#allocation1 + $0x2] ss:$9 sm:$0xff] %v464_v49 }
  0xf3   : > { %652 = vst [vmem:[#allocation1 + $0x3] ss:$9 sm:$0xff] %v437_v48 }
  0xf4   : > { %654 = vst [vmem:[#allocation1 + $0x4] ss:$9 sm:$0xff] %v465_v53 }
  0xf5   : > { %656 = vst [vmem:[#allocation1 + $0x5] ss:$9 sm:$0xff] %v466_v54 }
  0xf6   : > { %658 = vst [vmem:[#allocation1 + $0x6] ss:$9 sm:$0xff] %v467_v55  ;;  %4394 = vrot.lane.b32.xlu2 %v5127_v28, %s4919_s20 }
  0xf9   : > { %4191 = vmatmul.msk.f32.gmra.mxu3 %vm398_vm4, %v587_v56 }
  0xfd   : > { %v659_v0 = vld [vmem:[#allocation1] sm:$0xff] }
  0xfe   : > { %4192 = vmatpush.msk.msrb.mxu1 %vm407_vm3, %v659_v0  ;;  %4404 = vrot.lane.b32.xlu2 %v5136_v37, %s4919_s20  ;;  %v5216_v37 = vsel %vm768_vm6, %v1887_v34, %v1846_v25 }
  0xff   : > { %4193 = vmatmul.msk.f32.vlgmr.msrb.gmra.mxu1 %vm398_vm4, %v5109_v9  ;;  %v1830_v9 = vld [vmem:[#allocation2 + $0x51] sm:$0xff] }
 0x100   : > { %v1966_v14 = vsel %vm768_vm6, %v1830_v9, %v1965_v11  ;;  %v1963_v23 = vrot.slane %v1830_v9, 4 }
 0x101   : > { %v1974_v15 = vperm.slane %v1966_v14, %v5166_v62 }
 0x102   : > { %v1964_v28 = vsel %vm768_vm6, %v1963_v23, %v5117_v18 }
 0x103   : > { %v5191_v19 = vsel %vm768_vm6, %v1974_v15, %v2013_v16  ;;  %v1970_v32 = vperm.slane %v1964_v28, %v5166_v62  ;;  %v2011_v39 = vrot.slane %v1974_v15, 4 }
 0x105   : > { %v5219_v18 = vsel %vm768_vm6, %v1970_v32, %v2001_v36  ;;  %v1999_v38 = vrot.slane %v1970_v32, 4  ;;  %v5225_v41 = vsel %vm768_vm6, %v2011_v39, %v1962_v13 }
 0x107   : > { %4194 = vmatmul.msk.f32.gmra.mxu1 %vm398_vm4, %v645_v12  ;;  %v5222_v40 = vsel %vm768_vm6, %v1999_v38, %v1958_v31 }
 0x110   : > { %v4300_v43 = vpop.permute.xlu2 %4299 }
 0x111   : > { %v4302_v49 = vunpack.i.h.bf16 %v4300_v43  ;;  %v4301_v50 = vunpack.i.l.bf16 %v4300_v43 }
 0x113   : > { %v1265_v60 = vrot.slane %v4302_v49, 4  ;;  %v1153_v61 = vrot.slane %v4301_v50, 4 }
 0x120   : > { %v4315_v51 = vpop.permute.xlu2 %4314 }
 0x121   : > { %v4317_v52 = vunpack.i.h.bf16 %v4315_v51  ;;  %v4316_v53 = vunpack.i.l.bf16 %v4315_v51 }
 0x123   : > { %v1275_v55 = vrot.slane %v4317_v52, 4  ;;  %v1163_v57 = vrot.slane %v4316_v53, 4 }
 0x126   : > { %v4305_v42 = vpop.permute.xlu0 %4304 }
 0x127   : > { %v4307_v45 = vunpack.i.h.bf16 %v4305_v42  ;;  %v4306_v46 = vunpack.i.l.bf16 %v4305_v42 }
 0x128   : > { %v4320_v9 = vpop.permute.xlu2 %4319 }
 0x129   : > { %v1277_v47 = vrot.slane %v4307_v45, 4  ;;  %v1165_v48 = vrot.slane %v4306_v46, 4  ;;  %v5240_v1 = vsel %vm768_vm6, %v1275_v55, %v4307_v45  ;;  %v5243_v2 = vsel %vm768_vm6, %v1163_v57, %v4306_v46 }
 0x12a   : > { %v4322_v20 = vunpack.i.h.bf16 %v4320_v9  ;;  %v4321_v21 = vunpack.i.l.bf16 %v4320_v9 }
 0x12b   : > { %v1278_v56 = vsel %vm768_vm6, %v4317_v52, %v1277_v47  ;;  %v1166_v58 = vsel %vm768_vm6, %v4316_v53, %v1165_v48 }
 0x12c   : > { %v5234_v63 = vperm.slane %v1278_v56, %v5166_v62  ;;  %v5237_v0 = vperm.slane %v1166_v58, %v5166_v62  ;;  %v1641_v27 = vrot.slane %v4322_v20, 4  ;;  %v1529_v28 = vrot.slane %v4321_v21, 4 }
 0x12e   : > { %v5227_v44 = vpop.permute.xlu0 %4324  ;;  %v1323_v5 = vrot.slane %v5234_v63, 4  ;;  %v1211_v6 = vrot.slane %v5237_v0, 4 }
 0x12f   : > { %v4310_v59 = vpop.permute.xlu1 %4309  ;;  %v4327_v25 = vunpack.i.h.bf16 %v5227_v44  ;;  %v4326_v26 = vunpack.i.l.bf16 %v5227_v44 }
 0x130   : > { %v4312_v3 = vunpack.i.h.bf16 %v4310_v59  ;;  %v4311_v4 = vunpack.i.l.bf16 %v4310_v59  ;;  %v4335_v42 = vpop.permute.xlu2 %4334 }
 0x131   : > { %v1653_v34 = vrot.slane %v4327_v25, 4  ;;  %v1541_v36 = vrot.slane %v4326_v26, 4  ;;  %v4337_v48 = vunpack.i.h.bf16 %v4335_v42 }
 0x132   : > { %v1263_v7 = vrot.slane %v4312_v3, 4  ;;  %v1151_v10 = vrot.slane %v4311_v4, 4  ;;  %v1154_v11 = vsel %vm768_vm6, %v4311_v4, %v1153_v61  ;;  %v1266_v12 = vsel %vm768_vm6, %v4312_v3, %v1265_v60 }
 0x133   : > { %v5253_v14 = vperm.slane %v1154_v11, %v5166_v62  ;;  %v5259_v16 = vperm.slane %v1266_v12, %v5166_v62  ;;  %v1651_v55 = vrot.slane %v4337_v48, 4  ;;  %v1654_v56 = vsel %vm768_vm6, %v4337_v48, %v1653_v34 }
 0x134   : > { %v5250_v13 = vsel %vm768_vm6, %v1151_v10, %v4301_v50  ;;  %v5256_v15 = vsel %vm768_vm6, %v1263_v7, %v4302_v49  ;;  %v4336_v49 = vunpack.i.l.bf16 %v4335_v42  ;;  %v5290_v57 = vperm.slane %v1654_v56, %v5166_v62 }
 0x135   : > { %v5263_v22 = vsel %vm768_vm6, %v1211_v6, %v5253_v14  ;;  %v5267_v23 = vsel %vm768_vm6, %v1323_v5, %v5259_v16  ;;  %v5296_v3 = vsel %vm768_vm6, %v1651_v55, %v4327_v25 }
 0x136   : > { %v5229_v54 = vpop.permute.xlu0 %4339  ;;  %8410 = vst [vmem:[#allocation8_spill] sm:$0xff] %v5263_v22  ;;  %v1539_v58 = vrot.slane %v4336_v49, 4  ;;  %v1542_v59 = vsel %vm768_vm6, %v4336_v49, %v1541_v36 }
 0x137   : > { %8411 = vst [vmem:[#allocation9_spill] sm:$0xff] %v5267_v23  ;;  %v4330_v29 = vpop.permute.xlu1 %4329  ;;  %v4342_v52 = vunpack.i.h.bf16 %v5229_v54  ;;  %v5299_v4 = vperm.slane %v1542_v59, %v5166_v62  ;;  %v4341_v5 = vunpack.i.l.bf16 %v5229_v54 }
 0x138   : > { %v4332_v30 = vunpack.i.h.bf16 %v4330_v29  ;;  %v4331_v31 = vunpack.i.l.bf16 %v4330_v29  ;;  %v5303_v7 = vsel %vm768_vm6, %v1539_v58, %v4326_v26 }
 0x139   : > { %v2329_v12 = vrot.slane %v4342_v52, 4  ;;  %v2217_v26 = vrot.slane %v4341_v5, 4 }
 0x13a   : > { %v1639_v32 = vrot.slane %v4332_v30, 4  ;;  %v1527_v33 = vrot.slane %v4331_v31, 4  ;;  %v1530_v38 = vsel %vm768_vm6, %v4331_v31, %v1529_v28  ;;  %v1642_v39 = vsel %vm768_vm6, %v4332_v30, %v1641_v27 }
 0x13b   : > { %v5277_v45 = vperm.slane %v1530_v38, %v5166_v62  ;;  %v5283_v46 = vperm.slane %v1642_v39, %v5166_v62 }
 0x13c   : > { %v5274_v43 = vsel %vm768_vm6, %v1527_v33, %v4321_v21  ;;  %v5280_v44 = vsel %vm768_vm6, %v1639_v32, %v4322_v20  ;;  %v4350_v21 = vpop.permute.xlu2 %4349 }
 0x13d   : > { %v1701_v51 = vrot.slane %v5283_v46, 4  ;;  %v1589_v53 = vrot.slane %v5277_v45, 4  ;;  %v4352_v25 = vunpack.i.h.bf16 %v4350_v21  ;;  %v4351_v27 = vunpack.i.l.bf16 %v4350_v21 }
 0x13e   : > { %v4355_v24 = vpop.permute.xlu0 %4354 }
 0x13f   : > { %v4357_v47 = vunpack.i.h.bf16 %v4355_v24  ;;  %v4356_v50 = vunpack.i.l.bf16 %v4355_v24  ;;  %v5307_v10 = vsel %vm768_vm6, %v5290_v57, %v1701_v51  ;;  %v4345_v11 = vpop.permute.xlu1 %4344  ;;  %v5311_v9 = vsel %vm768_vm6, %v5299_v4, %v1589_v53 }
 0x140   : > { %8412 = vst [vmem:[#allocation10_spill] sm:$0xff] %v5307_v10  ;;  %v4347_v20 = vunpack.i.h.bf16 %v4345_v11  ;;  %v4346_v24 = vunpack.i.l.bf16 %v4345_v11  ;;  %v2327_v31 = vrot.slane %v4352_v25, 4  ;;  %v2330_v34 = vsel %vm768_vm6, %v4352_v25, %v2329_v12 }
 0x141   : > { %v2339_v61 = vrot.slane %v4357_v47, 4  ;;  %v2227_v6 = vrot.slane %v4356_v50, 4  ;;  %8413 = vst [vmem:[#allocation11_spill] sm:$0xff] %v5311_v9  ;;  %v2215_v36 = vrot.slane %v4351_v27, 4  ;;  %v5333_v51 = vperm.slane %v2330_v34, %v5166_v62 }
 0x142   : > { %v2341_v54 = vrot.slane %v4347_v20, 4  ;;  %v2229_v30 = vrot.slane %v4346_v24, 4  ;;  %v5327_v42 = vsel %vm768_vm6, %v2327_v31, %v4342_v52  ;;  %v2218_v52 = vsel %vm768_vm6, %v4351_v27, %v2217_v26 }
 0x143   : > { %v5314_v28 = vsel %vm768_vm6, %v2339_v61, %v4347_v20  ;;  %v5317_v29 = vsel %vm768_vm6, %v2227_v6, %v4346_v24  ;;  %8416 = vst [vmem:[#allocation14_spill] sm:$0xff] %v5327_v42  ;;  %v5339_v53 = vsel %vm768_vm6, %v2215_v36, %v4341_v5 }
 0x144   : > { %8414 = vst [vmem:[#allocation12_spill] sm:$0xff] %v5314_v28  ;;  %v2342_v33 = vsel %vm768_vm6, %v4357_v47, %v2341_v54  ;;  %v2230_v38 = vsel %vm768_vm6, %v4356_v50, %v2229_v30  ;;  %v4370_v61 = vpop.permute.xlu2 %4369 }
 0x145   : > { %8415 = vst [vmem:[#allocation13_spill] sm:$0xff] %v5317_v29  ;;  %v5324_v39 = vperm.slane %v2342_v33, %v5166_v62  ;;  %v5330_v49 = vperm.slane %v2230_v38, %v5166_v62  ;;  %v4372_v11 = vunpack.i.h.bf16 %v4370_v61  ;;  %v4371_v24 = vunpack.i.l.bf16 %v4370_v61 }
 0x146   : > { %v5293_v60 = vpop.permute.xlu0 %4359  ;;  %8417 = vst [vmem:[#allocation15_spill] sm:$0xff] %v5339_v53 }
 0x147   : > { %v4362_v32 = vunpack.i.h.bf16 %v5293_v60  ;;  %v4361_v47 = vunpack.i.l.bf16 %v5293_v60  ;;  %v2387_v50 = vrot.slane %v5324_v39, 4  ;;  %v5342_v56 = vpop.permute.xlu1 %4364  ;;  %v2275_v59 = vrot.slane %v5330_v49, 4 }
 0x148   : > { %v5350_v60 = vperm.slane %v2218_v52, %v5166_v62  ;;  %v2703_v20 = vrot.slane %v4372_v11, 4  ;;  %v2591_v30 = vrot.slane %v4371_v24, 4 }
 0x149   : > { %v2705_v58 = vrot.slane %v4362_v32, 4  ;;  %v5347_v6 = vsel %vm768_vm6, %v2387_v50, %v5333_v51  ;;  %v2593_v12 = vrot.slane %v4361_v47, 4 }
 0x14a   : > { %8418 = vst [vmem:[#allocation16_spill] sm:$0xff] %v5347_v6  ;;  %v5354_v5 = vsel %vm768_vm6, %v2275_v59, %v5350_v60  ;;  %v5360_v26 = vsel %vm768_vm6, %v2703_v20, %v4362_v32  ;;  %v5367_v50 = vsel %vm768_vm6, %v2591_v30, %v4361_v47 }
 0x14b   : > { %8419 = vst [vmem:[#allocation17_spill] sm:$0xff] %v5354_v5  ;;  %v5357_v21 = vsel %vm768_vm6, %v4372_v11, %v2705_v58  ;;  %v5364_v31 = vsel %vm768_vm6, %v4371_v24, %v2593_v12 }
 0x14e   : > { %v4375_v55 = vpop.permute.xlu0 %4374 }
 0x14f   : > { %v4377_v27 = vunpack.i.h.bf16 %v4375_v55  ;;  %v4376_v54 = vunpack.i.l.bf16 %v4375_v55  ;;  %v4390_v38 = vpop.permute.xlu1 %4389 }
 0x150   : > { %v4392_v52 = vunpack.i.h.bf16 %v4390_v38  ;;  %v4391_v58 = vunpack.i.l.bf16 %v4390_v38 }
 0x151   : > { %v3779_v55 = vrot.slane %v4377_v27, 4  ;;  %v3667_v59 = vrot.slane %v4376_v54, 4 }
 0x152   : > { %v509_v48 = vpop.f32.mrf.mxu1  ;;  %v3769_v11 = vrot.slane %v4392_v52, 4  ;;  %v3657_v20 = vrot.slane %v4391_v58, 4 }
 0x153   : > { %517 = vrot.lane.b32.xlu0 %v509_v48, %s4922_s23  ;;  %v4380_v48 = vpop.permute.xlu2 %4379 }
 0x154   : > { %v4381_v6 = vunpack.i.l.bf16 %v4380_v48 }
 0x156   : > { %v4385_v33 = vpop.permute.xlu0 %4384 }
 0x157   : > { %v4387_v34 = vunpack.i.h.bf16 %v4385_v33  ;;  %v4386_v36 = vunpack.i.l.bf16 %v4385_v33 }
 0x159   : > { %v3767_v32 = vrot.slane %v4387_v34, 4  ;;  %v3655_v61 = vrot.slane %v4386_v36, 4  ;;  %v3658_v33 = vsel %vm768_vm6, %v4386_v36, %v3657_v20  ;;  %v3770_v47 = vsel %vm768_vm6, %v4387_v34, %v3769_v11 }
 0x15a   : > { %v512_v25 = vpop.f32.mrf.mxu1  ;;  %v3668_v36 = vsel %vm768_vm6, %v3667_v59, %v4381_v6 }
 0x15b   : > { %519 = vrot.lane.b32.xlu0 %v512_v25, %s4922_s23  ;;  %v4382_v25 = vunpack.i.h.bf16 %v4380_v48  ;;  %v3656_v12 = vsel %vm768_vm6, %v3655_v61, %v4391_v58  ;;  %v3768_v24 = vsel %vm768_vm6, %v3767_v32, %v4392_v52  ;;  %v3669_v32 = vrot.slane %v4381_v6, 4  ;;  %v4395_v11 = vpop.permute.xlu2 %4394 }
 0x15c   : > { %v5373_v5 = vperm.slane %v3656_v12, %v5166_v62  ;;  %v5377_v30 = vperm.slane %v3768_v24, %v5166_v62  ;;  %v5392_v61 = vperm.slane %v3668_v36, %v5166_v62 }
 0x15d   : > { %v3780_v38 = vsel %vm768_vm6, %v3779_v55, %v4382_v25  ;;  %v3781_v10 = vrot.slane %v4382_v25, 4  ;;  %v4400_v55 = vpop.permute.xlu1 %4399  ;;  %v3670_v25 = vsel %vm768_vm6, %v4376_v54, %v3669_v32 }
 0x15e   : > { %v3705_v9 = vrot.slane %v5373_v5, 4  ;;  %v3817_v48 = vrot.slane %v5377_v30, 4  ;;  %v5383_v58 = vperm.slane %v3780_v38, %v5166_v62  ;;  %v4402_v12 = vunpack.i.h.bf16 %v4400_v55 }
 0x15f   : > { %v3782_v52 = vsel %vm768_vm6, %v4377_v27, %v3781_v10  ;;  %v4401_v24 = vunpack.i.l.bf16 %v4400_v55  ;;  %v4397_v38 = vunpack.i.h.bf16 %v4395_v11 }
 0x160   : > { %v5389_v34 = vsel %vm768_vm6, %v5383_v58, %v3817_v48  ;;  %v5398_v10 = vsel %vm768_vm6, %v5392_v61, %v3705_v9  ;;  %v3405_v6 = vrot.slane %v4402_v12, 4  ;;  %v4396_v48 = vunpack.i.l.bf16 %v4395_v11 }
 0x161   : > { %8420 = vst [vmem:[#allocation18_spill] sm:$0xff] %v5389_v34  ;;  %v3293_v27 = vrot.slane %v4401_v24, 4  ;;  %v3403_v59 = vrot.slane %v4397_v38, 4  ;;  %v1170_v11 = vperm.slane %v5243_v2, %v5166_v62  ;;  %v1534_v2 = vperm.slane %v5274_v43, %v5166_v62 }
 0x162   : > { %8421 = vst [vmem:[#allocation19_spill] sm:$0xff] %v5398_v10  ;;  %v5404_v34 = vsel %vm768_vm6, %v4397_v38, %v3405_v6  ;;  %v3291_v54 = vrot.slane %v4396_v48, 4  ;;  %v1270_v38 = vperm.slane %v5256_v15, %v5166_v62  ;;  %v1282_v15 = vperm.slane %v5240_v1, %v5166_v62 }
 0x163   : > { %v5401_v36 = vsel %vm768_vm6, %v3403_v59, %v4402_v12  ;;  %8423 = vst [vmem:[#allocation21_spill] sm:$0xff] %v5404_v34  ;;  %v5407_v32 = vsel %vm768_vm6, %v4396_v48, %v3293_v27  ;;  %v1158_v12 = vperm.slane %v5250_v13, %v5166_v62  ;;  %v1199_v6 = vrot.slane %v1170_v11, 4 }
 0x164   : > { %8422 = vst [vmem:[#allocation20_spill] sm:$0xff] %v5401_v36  ;;  %v5410_v55 = vsel %vm768_vm6, %v3291_v54, %v4401_v24  ;;  %v1313_v48 = vrot.slane %v1270_v38, 4  ;;  %v1699_v54 = vrot.slane %v5290_v57, 4  ;;  %v1646_v13 = vperm.slane %v5280_v44, %v5166_v62 }
 0x165   : > { %8424 = vst [vmem:[#allocation22_spill] sm:$0xff] %v5407_v32  ;;  %v1201_v24 = vrot.slane %v1158_v12, 4  ;;  %v1325_v10 = vrot.slane %v5259_v16, 4  ;;  %v5433_v57 = vsel %vm768_vm6, %v1199_v6, %v1158_v12  ;;  %v1577_v16 = vrot.slane %v1534_v2, 4 }
 0x166   : > { %v569_v20 = vpop.f32.mrf.mxu2  ;;  %8425 = vst [vmem:[#allocation23_spill] sm:$0xff] %v5410_v55  ;;  %v5441_v43 = vsel %vm768_vm6, %v1282_v15, %v1313_v48  ;;  %v1689_v44 = vrot.slane %v1646_v13, 4 }
 0x167   : > { %577 = vrot.lane.b32.xlu1 %v569_v20, %s4922_s23  ;;  %8426 = vst [vmem:[#allocation24_spill] sm:$0xff] %v5433_v57  ;;  %v5459_v12 = vsel %vm768_vm6, %v5234_v63, %v1325_v10 }
 0x168   : > { %8428 = vst [vmem:[#allocation26_spill] sm:$0xff] %v5441_v43 }
 0x169   : > { %8432 = vst [vmem:[#allocation30_spill] sm:$0xff] %v5459_v12 }
 0x16e   : > { %v572_v20 = vpop.f32.mrf.mxu2 }
 0x16f   : > { %579 = vrot.lane.b32.xlu1 %v572_v20, %s4922_s23  ;;  %v1587_v20 = vrot.slane %v5299_v4, 4  ;;  %v3666_v4 = vperm.slane %v3658_v33, %v5166_v62  ;;  %v3790_v33 = vperm.slane %v3782_v52, %v5166_v62 }
 0x171   : > { %v5445_v1 = vsel %vm768_vm6, %v1587_v20, %v5277_v45  ;;  %v1658_v45 = vperm.slane %v5296_v3, %v5166_v62  ;;  %v3717_v48 = vrot.slane %v3666_v4, 4 }
 0x172   : > { %8429 = vst [vmem:[#allocation27_spill] sm:$0xff] %v5445_v1 }
 0x173   : > { %v5470_v63 = vsel %vm768_vm6, %v1658_v45, %v1689_v44  ;;  %v1687_v10 = vrot.slane %v1658_v45, 4 }
 0x174   : > { %v627_v9 = vpop.f32.mrf.mxu3  ;;  %8434 = vst [vmem:[#allocation32_spill] sm:$0xff] %v5470_v63 }
 0x175   : > { %635 = vrot.lane.b32.xlu2 %v627_v9, %s4922_s23  ;;  %v1213_v9 = vrot.slane %v5253_v14, 4  ;;  %v5449_v14 = vsel %vm768_vm6, %v1699_v54, %v5283_v46  ;;  %v1311_v46 = vrot.slane %v1282_v15, 4  ;;  %v5491_v45 = vsel %vm768_vm6, %v1687_v10, %v1646_v13 }
 0x176   : > { %8430 = vst [vmem:[#allocation28_spill] sm:$0xff] %v5449_v14  ;;  %v3703_v13 = vrot.slane %v5392_v61, 4  ;;  %v2710_v61 = vperm.slane %v5360_v26, %v5166_v62 }
 0x177   : > { %8441 = vst [vmem:[#allocation39_spill] sm:$0xff] %v5491_v45 }
 0x17c   : > { %v685_v27 = vpop.f32.mrf.mxu1  ;;  %v630_v59 = vpop.f32.mrf.mxu3 }
 0x17d   : > { %693 = vrot.lane.b32.xlu0 %v685_v27, %s4922_s23  ;;  %637 = vrot.lane.b32.xlu2 %v630_v59, %s4922_s23  ;;  %v3778_v27 = vperm.slane %v3770_v47, %v5166_v62  ;;  %v5438_v59 = vsel %vm768_vm6, %v1170_v11, %v1201_v24  ;;  %v3678_v47 = vperm.slane %v3670_v25, %v5166_v62  ;;  %v3827_v25 = vrot.slane %v3790_v33, 4 }
 0x17e   : > { %8427 = vst [vmem:[#allocation25_spill] sm:$0xff] %v5438_v59  ;;  %v5455_v11 = vsel %vm768_vm6, %v5237_v0, %v1213_v9  ;;  %v1546_v24 = vperm.slane %v5303_v7, %v5166_v62  ;;  %v5479_v7 = vsel %vm768_vm6, %v1311_v46, %v1270_v38  ;;  %v4410_v46 = vpop.permute.xlu0 %4409 }
 0x17f   : > { %8431 = vst [vmem:[#allocation29_spill] sm:$0xff] %v5455_v11  ;;  %v3829_v52 = vrot.slane %v3778_v27, 4  ;;  %v3715_v54 = vrot.slane %v3678_v47, 4  ;;  %v5473_v3 = vsel %vm768_vm6, %v3678_v47, %v3717_v48  ;;  %v2389_v47 = vrot.slane %v5333_v51, 4  ;;  %v2893_v11 = vld [vmem:[#allocation2 + $0x4a] sm:$0xff] }
 0x180   : > { %v5467_v0 = vsel %vm768_vm6, %v1546_v24, %v1577_v16  ;;  %v1575_v20 = vrot.slane %v1546_v24, 4  ;;  %8435 = vst [vmem:[#allocation33_spill] sm:$0xff] %v5473_v3  ;;  %v5485_v16 = vsel %vm768_vm6, %v3827_v25, %v3778_v27  ;;  %v4367_v27 = vunpack.i.h.bf16 %v5342_v56 }
 0x181   : > { %8433 = vst [vmem:[#allocation31_spill] sm:$0xff] %v5467_v0  ;;  %v5476_v15 = vsel %vm768_vm6, %v3790_v33, %v3829_v52  ;;  %v5482_v9 = vsel %vm768_vm6, %v3715_v54, %v3666_v4  ;;  %v2277_v33 = vrot.slane %v5350_v60, 4  ;;  %v5501_v4 = vsel %vm768_vm6, %v5324_v39, %v2389_v47 }
 0x182   : > { %8436 = vst [vmem:[#allocation34_spill] sm:$0xff] %v5476_v15  ;;  %v5488_v44 = vsel %vm768_vm6, %v1575_v20, %v1534_v2  ;;  %v4366_v2 = vunpack.i.l.bf16 %v5342_v56  ;;  %v2717_v51 = vrot.slane %v4367_v27, 4  ;;  %v5509_v60 = vsel %vm768_vm6, %v3703_v13, %v5373_v5 }
 0x183   : > { %8437 = vst [vmem:[#allocation35_spill] sm:$0xff] %v5479_v7  ;;  %v5497_v38 = vsel %vm768_vm6, %v5330_v49, %v2277_v33  ;;  %v4412_v39 = vunpack.i.h.bf16 %v4410_v46  ;;  %v4411_v48 = vunpack.i.l.bf16 %v4410_v46  ;;  %v2598_v54 = vperm.slane %v5367_v50, %v5166_v62 }
 0x184   : > { %v688_v6 = vpop.f32.mrf.mxu1  ;;  %8438 = vst [vmem:[#allocation36_spill] sm:$0xff] %v5482_v9  ;;  %v2605_v24 = vrot.slane %v4366_v2, 4  ;;  %v2602_v20 = vperm.slane %v5364_v31, %v5166_v62 }
 0x185   : > { %695 = vrot.lane.b32.xlu1 %v688_v6, %s4922_s23  ;;  %8439 = vst [vmem:[#allocation37_spill] sm:$0xff] %v5485_v16  ;;  %v3815_v6 = vrot.slane %v5383_v58, 4  ;;  %v2718_v52 = vsel %vm768_vm6, %v4412_v39, %v2717_v51  ;;  %v2715_v58 = vrot.slane %v4412_v39, 4  ;;  %v2603_v25 = vrot.slane %v4411_v48, 4 }
 0x186   : > { %8440 = vst [vmem:[#allocation38_spill] sm:$0xff] %v5488_v44  ;;  %v2606_v56 = vsel %vm768_vm6, %v4411_v48, %v2605_v24  ;;  %v2726_v5 = vperm.slane %v2718_v52, %v5166_v62  ;;  %v2641_v13 = vrot.slane %v2598_v54, 4  ;;  %v2653_v52 = vrot.slane %v2602_v20, 4  ;;  %v2890_v44 = vld [vmem:[#allocation2 + $0x22] sm:$0xff] }
 0x187   : > { %8442 = vst [vmem:[#allocation40_spill] sm:$0xff] %v5497_v38  ;;  %v5513_v49 = vsel %vm768_vm6, %v3815_v6, %v5377_v30  ;;  %v2614_v10 = vperm.slane %v2606_v56, %v5166_v62  ;;  %v2714_v30 = vperm.slane %v5357_v21, %v5166_v62  ;;  %v2716_v47 = vsel %vm768_vm6, %v2715_v58, %v4367_v27 }
 0x188   : > { %8443 = vst [vmem:[#allocation41_spill] sm:$0xff] %v5501_v4  ;;  %v2604_v33 = vsel %vm768_vm6, %v2603_v25, %v4366_v2  ;;  %v2753_v6 = vrot.slane %v2710_v61, 4  ;;  %v2763_v26 = vrot.slane %v2726_v5, 4  ;;  %v2722_v50 = vperm.slane %v2716_v47, %v5166_v62 }
 0x189   : > { %8444 = vst [vmem:[#allocation42_spill] sm:$0xff] %v5509_v60  ;;  %v2651_v46 = vrot.slane %v2614_v10, 4  ;;  %v2610_v51 = vperm.slane %v2604_v33, %v5166_v62  ;;  %v2765_v48 = vrot.slane %v2714_v30, 4  ;;  %v5550_v25 = vsel %vm768_vm6, %v2614_v10, %v2653_v52  ;;  %v756_v52 = vld [vmem:[#allocation2 + $0x38] sm:$0xff] }
 0x18a   : > { %8445 = vst [vmem:[#allocation43_spill] sm:$0xff] %v5513_v49  ;;  %v5535_v21 = vsel %vm768_vm6, %v2722_v50, %v2753_v6  ;;  %v5541_v27 = vsel %vm768_vm6, %v2763_v26, %v2714_v30  ;;  %v2751_v2 = vrot.slane %v2722_v50, 4  ;;  %v5556_v6 = vpop.permute.xlu2 %4404  ;;  %v5558_v30 = vld [vmem:[#allocation2 + $0x18] sm:$0xff]  ;;  %v4923_v49 = vmov 1934713408  }
 0x18b   : > { %v5532_v24 = vsel %vm768_vm6, %v2610_v51, %v2641_v13  ;;  %8447 = vst [vmem:[#allocation45_spill] sm:$0xff] %v5535_v21  ;;  %v5538_v31 = vsel %vm768_vm6, %v2651_v46, %v2602_v20  ;;  %v2639_v39 = vrot.slane %v2610_v51, 4  ;;  %v5553_v47 = vsel %vm768_vm6, %v2726_v5, %v2765_v48  ;;  %v751_v20 = vld [vmem:[#allocation2] sm:$0xff]  ;;  %v2888_v51 = vld [vmem:[#allocation2 + $0xa] sm:$0xff] }
 0x18c   : > { %8446 = vst [vmem:[#allocation44_spill] sm:$0xff] %v5532_v24  ;;  %v5547_v58 = vsel %vm768_vm6, %v2751_v2, %v2710_v61  ;;  %v5562_v13 = vld [vmem:[#allocation2 + $0x20] sm:$0xff]  ;;  %v782_v61 = vrot.slane %v5558_v30, 4  ;;  %v770_v26 = vrot.slane %v751_v20, 4  ;;  %v755_v48 = vld [vmem:[#allocation2 + $0x30] sm:$0xff]  ;;  %v821_v60 = vunpack.c.l.s4 %v4923_v49 }
 0x18d   : > { %8448 = vst [vmem:[#allocation46_spill] sm:$0xff] %v5538_v31  ;;  %v5544_v56 = vsel %vm768_vm6, %v2639_v39, %v2598_v54  ;;  %v5560_v54 = vld [vmem:[#allocation2 + $0x8] sm:$0xff]  ;;  %v894_v50 = vrot.slane %v5562_v13, 4  ;;  %v3017_v31 = vrot.slane %v2888_v51, 4  ;;  %v5585_v24 = vld [vmem:[#allocation2 + $0x1a] sm:$0xff]  ;;  %v767_v4 = vrot.slane %v755_v48, 4 }
 0x18e   : > { %8449 = vst [vmem:[#allocation47_spill] sm:$0xff] %v5541_v27  ;;  %v882_v5 = vrot.slane %v5560_v54, 4  ;;  %v5566_v46 = vld [vmem:[#allocation2 + $0x2] sm:$0xff]  ;;  %v2891_v27 = vld [vmem:[#allocation2 + $0x32] sm:$0xff]  ;;  %v880_v45 = vrot.slane %v756_v52, 4  ;;  %v2917_v3 = vrot.slane %v5585_v24, 4 }
 0x18f   : > { %8450 = vst [vmem:[#allocation48_spill] sm:$0xff] %v5544_v56  ;;  %v5570_v39 = vld [vmem:[#allocation2 + $0x48] sm:$0xff]  ;;  %v2903_v9 = vrot.slane %v2891_v27, 4 }
 0x190   : > { %8451 = vst [vmem:[#allocation49_spill] sm:$0xff] %v5547_v58  ;;  %v5578_v58 = vld [vmem:[#allocation2 + $0x50] sm:$0xff]  ;;  %v883_v56 = vsel %vm768_vm6, %v756_v52, %v882_v5  ;;  %v780_v21 = vrot.slane %v5570_v39, 4 }
 0x191   : > { %8452 = vst [vmem:[#allocation50_spill] sm:$0xff] %v5550_v25  ;;  %v5576_v25 = vpop.permute.xlu1 %4414  ;;  %v892_v1 = vrot.slane %v5578_v58, 4 }
 0x192   : > { %8453 = vst [vmem:[#allocation51_spill] sm:$0xff] %v5553_v47  ;;  %v2905_v47 = vrot.slane %v5566_v46, 4 }
 0x193   : > { %8454 = vst [vmem:[#allocation52_spill] sm:$0xff] %v5556_v6 }
 0x194   : > { %8455 = vst [vmem:[#allocation53_spill] sm:$0xff] %v5576_v25  ;;  %v2906_v15 = vsel %vm768_vm6, %v2891_v27, %v2905_v47  ;;  %v3029_v47 = vrot.slane %v2890_v44, 4 }
 0x195   : > { %v5616_v57 = vperm.slane %v2906_v15, %v5166_v62 }
 0x197   : > { %8456 = vst [vmem:[#allocation54_spill] sm:$0xff] %v5616_v57 }
 0x1c5   : > { %v518_v33 = vpop.permute.xlu0 %517 }
 0x1c6   : > { %525 = vst.msk [vmem:[#allocation2 + $0x62] sm:$0xff] %vm524_vm7, %v518_v33  ;;  %v783_v33 = vsel %vm768_vm6, %v5570_v39, %v782_v61  ;;  %v2892_v61 = vld [vmem:[#allocation2 + $0x3a] sm:$0xff] }
 0x1c7   : > { %v791_v38 = vperm.slane %v783_v33, %v5166_v62  ;;  %v3015_v63 = vrot.slane %v2892_v61, 4  ;;  %v3018_v0 = vsel %vm768_vm6, %v2892_v61, %v3017_v31  ;;  %v769_v31 = vsel %vm768_vm6, %v767_v4, %v751_v20 }
 0x1c8   : > { %v5622_v61 = vunpack.c.0.s8 %v821_v60  ;;  %v5627_v15 = vperm.slane %v3018_v0, %v5166_v62  ;;  %v2904_v4 = vsel %vm768_vm6, %v2903_v9, %v5566_v46  ;;  %v2918_v20 = vsel %vm768_vm6, %v2893_v11, %v2917_v3 }
 0x1c9   : > { %v3016_v60 = vsel %vm768_vm6, %v3015_v63, %v2888_v51  ;;  %v5638_v55 = vperm.slane %v769_v31, %v5166_v62  ;;  %v2965_v9 = vrot.slane %v5616_v57, 4  ;;  %v5652_v3 = vperm.slane %v2904_v4, %v5166_v62 }
 0x1ca   : > { %8457 = vst [vmem:[#allocation55_spill] sm:$0xff] %v5627_v15  ;;  %v5642_v0 = vperm.slane %v5178_v8, %v5622_v61  ;;  %v5655_v46 = vperm.slane %v3016_v60, %v5166_v62  ;;  %v5658_v8 = vperm.slane %v2918_v20, %v5166_v62  ;;  %v5704_v60 = vperm.slane %v5191_v19, %v5622_v61 }
 0x1cc   : > { %8458 = vst [vmem:[#allocation56_spill] sm:$0xff] %v5658_v8 }
 0x1cd   : > { %v520_v10 = vpop.permute.xlu0 %519  ;;  %v5588_v7 = vld [vmem:[#allocation2 + $0x62] sm:$0xff] }
 0x1ce   : > { %527 = vst.msk [vmem:[#allocation2 + $0x6a] sm:$0x3f] %vm526_vm8, %v520_v10  ;;  %v771_v10 = vsel %vm768_vm6, %v755_v48, %v770_v26  ;;  %v2894_v26 = vld [vmem:[#allocation2 + $0x52] sm:$0xff]  ;;  %v5590_v5 = vld [vmem:[#allocation2 + $0x60] sm:$0xff]  ;;  %v2929_v36 = vrot.slane %v5588_v7, 4 }
 0x1cf   : > { %v636_v2 = vpop.permute.xlu2 %635  ;;  %v5592_v16 = vld [vmem:[#allocation2 + $0x61] sm:$0xff]  ;;  %v779_v39 = vperm.slane %v771_v10, %v5166_v62  ;;  %v3027_v22 = vrot.slane %v2894_v26, 4  ;;  %v3030_v59 = vsel %vm768_vm6, %v2894_v26, %v3029_v47  ;;  %v818_v47 = vrot.slane %v5638_v55, 4 }
 0x1d0   : > { %642 = vst.msk [vmem:[#allocation2 + $0x92] sm:$0xff] %vm524_vm7, %v636_v2  ;;  %v895_v2 = vsel %vm768_vm6, %v5578_v58, %v894_v50  ;;  %v891_v50 = vperm.slane %v883_v56, %v5166_v62  ;;  %v5661_v51 = vperm.slane %v3030_v59, %v5166_v62  ;;  %v893_v59 = vsel %vm768_vm6, %v892_v1, %v5562_v13 }
 0x1d1   : > { %v903_v33 = vperm.slane %v895_v2, %v5166_v62  ;;  %v828_v2 = vrot.slane %v791_v38, 4  ;;  %v830_v23 = vrot.slane %v779_v39, 4  ;;  %v3028_v26 = vsel %vm768_vm6, %v3027_v22, %v2890_v44 }
 0x1d2   : > { %v942_v12 = vrot.slane %v891_v50, 4  ;;  %8459 = vst [vmem:[#allocation57_spill] sm:$0xff] %v5661_v51  ;;  %v3065_v44 = vrot.slane %v5655_v46, 4 }
 0x1d3   : > { %v940_v58 = vrot.slane %v903_v33, 4 }
 0x1d5   : > { %v5597_v49 = vld [vmem:[#allocation2 + $0x6a] sm:$0xff] }
 0x1d6   : > { %v5599_v48 = vld [vmem:[#allocation2 + $0x68] sm:$0xff]  ;;  %v4433_v10 = vpack.i.bf16 %v5597_v49, %v5588_v7 }
 0x1d7   : > { %v5601_v52 = vld [vmem:[#allocation2 + $0x69] sm:$0xff]  ;;  %v4418_v56 = vpack.i.bf16 %v5599_v48, %v5590_v5  ;;  %v638_v14 = vpop.permute.xlu2 %637 }
 0x1d8   : > { %v5612_v27 = vpack.i.bf16 %v5601_v52, %v5592_v16  ;;  %643 = vst.msk [vmem:[#allocation2 + $0x9a] sm:$0x3f] %vm526_vm8, %v638_v14  ;;  %4434 = vrot.lane.b32.xlu2 %v4433_v10, %s4920_s21  ;;  %v881_v14 = vsel %vm768_vm6, %v880_v45, %v5560_v54  ;;  %v829_v45 = vsel %vm768_vm6, %v828_v2, %v779_v39  ;;  %v2915_v54 = vrot.slane %v2893_v11, 4 }
 0x1d9   : > { %4419 = vrot.lane.b32.xlu0 %v4418_v56, %s4919_s20  ;;  %v578_v43 = vpop.permute.xlu1 %577  ;;  %v5649_v63 = vperm.slane %v881_v14, %v5166_v62  ;;  %v3077_v11 = vrot.slane %v5627_v15, 4  ;;  %v941_v39 = vsel %vm768_vm6, %v940_v58, %v891_v50  ;;  %v2966_v2 = vsel %vm768_vm6, %v5658_v8, %v2965_v9 }
 0x1da   : > { %4429 = vrot.lane.b32.xlu1 %v5612_v27, %s4919_s20  ;;  %584 = vst.msk [vmem:[#allocation2 + $0x7a] sm:$0xff] %vm524_vm7, %v578_v43  ;;  %v781_v43 = vsel %vm768_vm6, %v780_v21, %v5558_v30  ;;  %v831_v21 = vsel %vm768_vm6, %v791_v38, %v830_v23  ;;  %v943_v30 = vsel %vm768_vm6, %v903_v33, %v942_v12  ;;  %v2953_v23 = vrot.slane %v5652_v3, 4 }
 0x1db   : > { %v787_v31 = vperm.slane %v781_v43, %v5166_v62  ;;  %v2916_v14 = vsel %vm768_vm6, %v2915_v54, %v5585_v24  ;;  %v930_v22 = vrot.slane %v5649_v63, 4  ;;  %v5680_v12 = vperm.slane %v3028_v26, %v5166_v62  ;;  %v3211_v26 = vld [vmem:[#allocation2 + $0x92] sm:$0xff] }
 0x1dc   : > { %v5685_v50 = vperm.slane %v831_v21, %v5622_v61  ;;  %v5688_v1 = vperm.slane %v943_v30, %v5622_v61  ;;  %v5691_v24 = vperm.slane %v829_v45, %v5622_v61  ;;  %v3078_v13 = vsel %vm768_vm6, %v5661_v51, %v3077_v11 }
 0x1dd   : > { %v5697_v33 = vperm.slane %v941_v39, %v5622_v61  ;;  %v2922_v4 = vperm.slane %v2916_v14, %v5166_v62  ;;  %v5707_v58 = vperm.slane %v2966_v2, %v5622_v61  ;;  %v5710_v20 = vperm.slane %v3078_v13, %v5622_v61 }
 0x1de   : > { %8460 = vst [vmem:[#allocation58_spill] sm:$0xff] %v5691_v24  ;;  %v3066_v9 = vsel %vm768_vm6, %v5680_v12, %v3065_v44  ;;  %v816_v39 = vrot.slane %v787_v31, 4  ;;  %v2927_v32 = vrot.slane %v3211_v26, 4  ;;  %v3063_v34 = vrot.slane %v5680_v12, 4 }
 0x1df   : > { %8461 = vst [vmem:[#allocation59_spill] sm:$0xff] %v5697_v33  ;;  %v2954_v54 = vsel %vm768_vm6, %v2922_v4, %v2953_v23  ;;  %v5733_v14 = vperm.slane %v3066_v9, %v5622_v61  ;;  %v5761_v9 = vperm.slane %v5216_v37, %v5622_v61  ;;  %v2951_v44 = vrot.slane %v2922_v4, 4  ;;  %v2148_v42 = vld [vmem:[#allocation2 + $0x99] sm:$0xff] }
 0x1e0   : > { %8462 = vst [vmem:[#allocation60_spill] sm:$0xff] %v5707_v58  ;;  %v794_v4 = vrot.slane %v5590_v5, 4  ;;  %v5787_v37 = vperm.slane %v5225_v41, %v5622_v61  ;;  %v1977_v25 = vrot.slane %v5601_v52, 4  ;;  %v2928_v6 = vsel %vm768_vm6, %v2927_v32, %v5588_v7 }
 0x1e1   : > { %4424 = vrot.lane.b32.xlu0 %v4418_v56, %s4920_s21  ;;  %v580_v38 = vpop.permute.xlu1 %579  ;;  %v819_v56 = vsel %vm768_vm6, %v787_v31, %v818_v47  ;;  %8463 = vst [vmem:[#allocation61_spill] sm:$0xff] %v5710_v20  ;;  %v5724_v47 = vld [vmem:[#allocation2 + $0x79] sm:$0xff]  ;;  %v5792_v31 = vperm.slane %v5222_v40, %v5622_v61  ;;  %v2952_v41 = vsel %vm768_vm6, %v2951_v44, %v5652_v3  ;;  %v3041_v7 = vrot.slane %v5597_v49, 4 }
 0x1e2   : > { %4439 = vrot.lane.b32.xlu1 %v4433_v10, %s4919_s20  ;;  %585 = vst.msk [vmem:[#allocation2 + $0x82] sm:$0x3f] %vm526_vm8, %v580_v38  ;;  %v899_v10 = vperm.slane %v893_v59, %v5166_v62  ;;  %v5719_v19 = vperm.slane %v819_v56, %v5622_v61  ;;  %v5730_v59 = vperm.slane %v2954_v54, %v5622_v61  ;;  %v5748_v56 = vld [vmem:[#allocation2 + $0x7a] sm:$0xff] }
 0x1e3   : > { %v5744_v38 = vperm.slane %v5213_v17, %v5622_v61  ;;  %v5757_v54 = vperm.slane %v5219_v18, %v5622_v61  ;;  %v2147_v18 = vld [vmem:[#allocation2 + $0x91] sm:$0xff] }
 0x1e4   : > { %v931_v45 = vsel %vm768_vm6, %v899_v10, %v930_v22  ;;  %v5737_v22 = vperm.slane %v5210_v35, %v5622_v61  ;;  %v928_v17 = vrot.slane %v899_v10, 4  ;;  %v5780_v35 = vld [vmem:[#allocation2 + $0x90] sm:$0xff]  ;;  %v5797_v43 = vld [vmem:[#allocation2 + $0x78] sm:$0xff]  ;;  %v5810_v28 = vpack.i.bf16 %v2148_v42, %v2147_v18 }
 0x1e5   : > { %v5727_v2 = vperm.slane %v931_v45, %v5622_v61  ;;  %v795_v3 = vsel %vm768_vm6, %v5780_v35, %v794_v4  ;;  %v1084_v44 = vld [vmem:[#allocation2 + $0x98] sm:$0xff]  ;;  %v5826_v4 = vperm.slane %v2952_v41, %v5622_v61 }
 0x1e6   : > { %v929_v53 = vsel %vm768_vm6, %v928_v17, %v5649_v63  ;;  %v5832_v29 = vperm.slane %v795_v3, %v5166_v62  ;;  %v904_v41 = vrot.slane %v1084_v44, 4  ;;  %v5846_v3 = vsel %vm768_vm6, %v3063_v34, %v5655_v46 }
 0x1e7   : > { %v5820_v12 = vperm.slane %v929_v53, %v5622_v61  ;;  %8465 = vst [vmem:[#allocation63_spill] sm:$0xff] %v5826_v4  ;;  %v1975_v17 = vrot.slane %v2148_v42, 4 }
 0x1e9   : > { %v5746_v13 = vld [vmem:[#allocation2 + $0x81] sm:$0xff] }
 0x1ea   : > { %v5750_v45 = vld [vmem:[#allocation2 + $0x82] sm:$0xff]  ;;  %4444 = vrot.lane.b32.xlu1 %v5612_v27, %s4920_s21  ;;  %v5765_v21 = vpack.i.bf16 %v5746_v13, %v5724_v47  ;;  %v817_v27 = vsel %vm768_vm6, %v816_v39, %v5638_v55  ;;  %v1865_v55 = vrot.slane %v5592_v16, 4  ;;  %v1863_v39 = vrot.slane %v2147_v18, 4 }
 0x1eb   : > { %v4463_v30 = vpack.i.bf16 %v5750_v45, %v5748_v56  ;;  %v5778_v10 = vld [vmem:[#allocation2 + $0x80] sm:$0xff]  ;;  %v5795_v23 = vperm.slane %v817_v27, %v5622_v61  ;;  %v792_v27 = vrot.slane %v5780_v35, 4 }
 0x1ec   : > { %4459 = vrot.lane.b32.xlu2 %v5765_v21, %s4919_s20  ;;  %v4448_v40 = vpack.i.bf16 %v5778_v10, %v5797_v43  ;;  %v1866_v63 = vsel %vm768_vm6, %v2147_v18, %v1865_v55  ;;  %v906_v18 = vrot.slane %v5599_v48, 4  ;;  %v2930_v55 = vsel %vm768_vm6, %v3211_v26, %v2929_v36 }
 0x1ed   : > { %4464 = vrot.lane.b32.xlu0 %v4463_v30, %s4920_s21  ;;  %8464 = vst [vmem:[#allocation62_spill] sm:$0xff] %v5795_v23  ;;  %v5829_v57 = vperm.slane %v1866_v63, %v5166_v62  ;;  %v793_v53 = vsel %vm768_vm6, %v792_v27, %v5590_v5  ;;  %v1877_v36 = vrot.slane %v5724_v47, 4  ;;  %v1864_v63 = vsel %vm768_vm6, %v1863_v39, %v5592_v16 }
 0x1ee   : > { %v5849_v5 = vperm.slane %v2930_v55, %v5166_v62  ;;  %v907_v27 = vsel %vm768_vm6, %v1084_v44, %v906_v18  ;;  %v5855_v15 = vperm.slane %v793_v53, %v5166_v62  ;;  %v5858_v16 = vperm.slane %v2928_v6, %v5166_v62 }
 0x1ef   : > { %v694_v11 = vpop.permute.xlu0 %693  ;;  %v1925_v51 = vrot.slane %v5829_v57, 4  ;;  %v854_v23 = vrot.slane %v5832_v29, 4  ;;  %v905_v18 = vsel %vm768_vm6, %v904_v41, %v5599_v48  ;;  %v5880_v24 = vperm.slane %v907_v27, %v5166_v62 }
 0x1f0   : > { %700 = vst.msk [vmem:[#allocation2 + $0xaa] sm:$0xff] %vm524_vm7, %v694_v11  ;;  %v3212_v11 = vld [vmem:[#allocation2 + $0x9a] sm:$0xff]  ;;  %v842_v48 = vrot.slane %v5855_v15, 4 }
 0x1f1   : > { %v3039_v32 = vrot.slane %v3212_v11, 4  ;;  %8466 = vst [vmem:[#allocation64_spill] sm:$0xff] %v5855_v15  ;;  %v4498_v34 = vpack.i.bf16 %v3212_v11, %v3211_v26  ;;  %v806_v26 = vrot.slane %v5797_v43, 4 }
 0x1f2   : > { %4449 = vrot.lane.b32.xlu1 %v4448_v40, %s4919_s20  ;;  %8467 = vst [vmem:[#allocation65_spill] sm:$0xff] %v5858_v16 }
 0x1f4   : > { %4469 = vrot.lane.b32.xlu2 %v4463_v30, %s4919_s20  ;;  %v1978_v30 = vsel %vm768_vm6, %v2148_v42, %v1977_v25  ;;  %v5867_v42 = vperm.slane %v1864_v63, %v5166_v62  ;;  %v3040_v63 = vsel %vm768_vm6, %v3039_v32, %v5597_v49  ;;  %v5897_v49 = vperm.slane %v905_v18, %v5166_v62 }
 0x1f5   : > { %4489 = vrot.lane.b32.xlu0 %v5810_v28, %s4919_s20  ;;  %v5877_v53 = vperm.slane %v1978_v30, %v5166_v62  ;;  %v3042_v30 = vsel %vm768_vm6, %v3212_v11, %v3041_v7 }
 0x1f6   : > { %8468 = vst [vmem:[#allocation66_spill] sm:$0xff] %v5897_v49  ;;  %v1913_v32 = vrot.slane %v5867_v42, 4  ;;  %v5929_v33 = vperm.slane %v3042_v30, %v5166_v62  ;;  %v954_v15 = vrot.slane %v5897_v49, 4 }
 0x1f7   : > { %v696_v39 = vpop.permute.xlu1 %695  ;;  %v1085_v46 = vld [vmem:[#allocation2 + $0xa8] sm:$0xff]  ;;  %v2037_v7 = vrot.slane %v5877_v53, 4 }
 0x1f8   : > { %v5860_v8 = vld [vmem:[#allocation2 + $0xa9] sm:$0xff]  ;;  %701 = vst.msk [vmem:[#allocation2 + $0xb2] sm:$0x3f] %vm526_vm8, %v696_v39  ;;  %v804_v6 = vrot.slane %v1085_v46, 4 }
 0x1f9   : > { %v5862_v55 = vld [vmem:[#allocation2 + $0xaa] sm:$0xff]  ;;  %v1878_v25 = vsel %vm768_vm6, %v5860_v8, %v1877_v36  ;;  %v1976_v36 = vsel %vm768_vm6, %v1975_v17, %v5601_v52  ;;  %v807_v52 = vsel %vm768_vm6, %v1085_v46, %v806_v26  ;;  %v5904_v17 = vperm.slane %v3040_v63, %v5166_v62 }
 0x1fa   : > { %4454 = vrot.lane.b32.xlu1 %v4448_v40, %s4920_s21  ;;  %v2939_v39 = vrot.slane %v5862_v55, 4  ;;  %v2977_v40 = vrot.slane %v5858_v16, 4  ;;  %v5891_v41 = vperm.slane %v1878_v25, %v5166_v62  ;;  %v805_v27 = vsel %vm768_vm6, %v804_v6, %v5797_v43 }
 0x1fb   : > { %8469 = vst [vmem:[#allocation67_spill] sm:$0xff] %v5904_v17  ;;  %v5908_v11 = vperm.slane %v1976_v36, %v5166_v62  ;;  %v5911_v43 = vpack.i.bf16 %v1084_v44, %v5780_v35  ;;  %v966_v25 = vrot.slane %v5880_v24, 4  ;;  %v1875_v6 = vrot.slane %v5860_v8, 4 }
 0x1fc   : > { %4474 = vrot.lane.b32.xlu2 %v5765_v21, %s4920_s21  ;;  %v2941_v21 = vrot.slane %v5748_v56, 4  ;;  %v1989_v26 = vrot.slane %v5746_v13, 4  ;;  %v5919_v18 = vperm.slane %v805_v27, %v5166_v62  ;;  %v2940_v63 = vsel %vm768_vm6, %v2939_v39, %v5748_v56 }
 0x1fd   : > { %4499 = vrot.lane.b32.xlu0 %v4498_v34, %s4919_s20  ;;  %v1926_v44 = vsel %vm768_vm6, %v5891_v41, %v1925_v51  ;;  %v5926_v16 = vperm.slane %v807_v52, %v5166_v62  ;;  %v3089_v20 = vrot.slane %v5904_v17, 4  ;;  %v918_v51 = vrot.slane %v5778_v10, 4 }
 0x1fe   : > { %v5941_v30 = vperm.slane %v2940_v63, %v5166_v62  ;;  %v1934_v49 = vperm.slane %v1926_v44, %v5622_v61  ;;  %v1876_v56 = vsel %vm768_vm6, %v1875_v6, %v5724_v47  ;;  %v2942_v17 = vsel %vm768_vm6, %v5862_v55, %v2941_v21 }
 0x1ff   : > { %v1086_v36 = vld [vmem:[#allocation2 + $0xb0] sm:$0xff]  ;;  %v1882_v44 = vperm.slane %v1876_v56, %v5166_v62 }
 0x200   : > { %v2150_v4 = vld [vmem:[#allocation2 + $0xb1] sm:$0xff]  ;;  %v4508_v58 = vpack.i.bf16 %v1086_v36, %v1085_v46  ;;  %v916_v52 = vrot.slane %v1086_v36, 4  ;;  %8470 = vst [vmem:[#allocation68_spill] sm:$0xff] %v5941_v30  ;;  %v919_v47 = vsel %vm768_vm6, %v1086_v36, %v918_v51  ;;  %v2978_v21 = vsel %vm768_vm6, %v5941_v30, %v2977_v40 }
 0x201   : > { %v3590_v35 = vld [vmem:[#allocation2 + $0xb2] sm:$0xff]  ;;  %v1990_v27 = vsel %vm768_vm6, %v2150_v4, %v1989_v26  ;;  %v843_v26 = vsel %vm768_vm6, %v5919_v18, %v842_v48  ;;  %v8472_v36 = vrot.slane %v5642_v0, 4  ;;  %v1987_v56 = vrot.slane %v2150_v4, 4 }
 0x202   : > { %4494 = vrot.lane.b32.xlu1 %v4498_v34, %s4920_s21  ;;  %v5937_v39 = vperm.slane %v1990_v27, %v5166_v62  ;;  %v3051_v46 = vrot.slane %v3590_v35, 4  ;;  %v855_v27 = vsel %vm768_vm6, %v5926_v16, %v854_v23  ;;  %v917_v63 = vsel %vm768_vm6, %v916_v52, %v5778_v10 }
 0x203   : > { %v5963_v6 = vperm.slane %v917_v63, %v5166_v62  ;;  %v851_v23 = vperm.slane %v843_v26, %v5622_v61  ;;  %v5972_v52 = vpack.i.bf16 %v2150_v4, %v5860_v8  ;;  %v5977_v51 = vsel %vm768_vm6, %v1934_v49, %v8472_v36 }
 0x204   : > { %v2038_v34 = vsel %vm768_vm6, %v5937_v39, %v2037_v7  ;;  %4479 = vrot.lane.b32.xlu2 %v5911_v43, %s4919_s20  ;;  %v3053_v7 = vrot.slane %v5750_v45, 4  ;;  %v3052_v10 = vsel %vm768_vm6, %v3051_v46, %v5750_v45  ;;  %v5989_v8 = vperm.slane %v919_v47, %v5166_v62 }
 0x205   : > { %4509 = vrot.lane.b32.xlu0 %v4508_v58, %s4919_s20  ;;  %v2046_v48 = vperm.slane %v2038_v34, %v5622_v61  ;;  %8471 = vst [vmem:[#allocation69_spill] sm:$0xff] %v5963_v6  ;;  %v8473_v34 = vrot.slane %v5704_v60, 4  ;;  %v955_v40 = vsel %vm768_vm6, %v5963_v6, %v954_v15  ;;  %v5993_v63 = vperm.slane %v855_v27, %v5622_v61 }
 0x206   : > { %v963_v46 = vperm.slane %v955_v40, %v5622_v61  ;;  %v5996_v36 = vperm.slane %v2942_v17, %v5166_v62  ;;  %v6002_v15 = vperm.slane %v3052_v10, %v5166_v62  ;;  %v8474_v4 = vrot.slane %v5719_v19, 4 }
 0x207   : > { %v5982_v26 = vsel %vm768_vm6, %v2046_v48, %v8473_v34  ;;  %v5999_v34 = vperm.slane %v2978_v21, %v5622_v61  ;;  %v8475_v27 = vrot.slane %v5727_v2, 4  ;;  %v1914_v17 = vsel %vm768_vm6, %v1882_v44, %v1913_v32 }
 0x208   : > { %v6009_v47 = vsel %vm768_vm6, %v851_v23, %v8474_v4  ;;  %v1923_v21 = vrot.slane %v5891_v41, 4  ;;  %v4523_v10 = vpack.i.bf16 %v3590_v35, %v5862_v55  ;;  %v3054_v45 = vsel %vm768_vm6, %v3590_v35, %v3053_v7 }
 0x209   : > { %v6014_v40 = vsel %vm768_vm6, %v963_v46, %v8475_v27  ;;  %v3090_v4 = vsel %vm768_vm6, %v6002_v15, %v3089_v20  ;;  %v967_v6 = vsel %vm768_vm6, %v5989_v8, %v966_v25  ;;  %v1922_v32 = vperm.slane %v1914_v17, %v5622_v61 }
 0x20a   : > { %4519 = vrot.lane.b32.xlu1 %v5972_v52, %s4919_s20  ;;  %v6027_v27 = vperm.slane %v3090_v4, %v5622_v61  ;;  %v1988_v41 = vsel %vm768_vm6, %v1987_v56, %v5746_v13  ;;  %v8476_v55 = vrot.slane %v5730_v59, 4  ;;  %v868_v35 = vrot.slane %v851_v23, 4 }
 0x20b   : > { %v1994_v25 = vperm.slane %v1988_v41, %v5166_v62  ;;  %v980_v7 = vrot.slane %v963_v46, 4  ;;  %v8477_v17 = vrot.slane %v5733_v14, 4  ;;  %v1947_v56 = vrot.slane %v1934_v49, 4 }
 0x20c   : > { %4484 = vrot.lane.b32.xlu2 %v5911_v43, %s4920_s21  ;;  %v6039_v20 = vsel %vm768_vm6, %v5999_v34, %v8476_v55  ;;  %v8478_v43 = vrot.slane %v5737_v22, 4  ;;  %v2059_v4 = vrot.slane %v2046_v48, 4  ;;  %v6054_v55 = vperm.slane %v967_v6, %v5622_v61 }
 0x20d   : > { %4514 = vrot.lane.b32.xlu0 %v4508_v58, %s4920_s21  ;;  %v6046_v13 = vsel %vm768_vm6, %v6027_v27, %v8477_v17  ;;  %v6057_v41 = vperm.slane %v3054_v45, %v5166_v62  ;;  %v8479_v46 = vrot.slane %v5908_v11, 4  ;;  %v6071_v49 = vsel %vm768_vm6, %v980_v7, %v5727_v2 }
 0x20e   : > { %v6051_v58 = vsel %vm768_vm6, %v1922_v32, %v8478_v43  ;;  %v6067_v43 = vsel %vm768_vm6, %v868_v35, %v5719_v19  ;;  %v6075_v48 = vsel %vm768_vm6, %v1947_v56, %v5642_v0  ;;  %v6081_v45 = vsel %vm768_vm6, %v2059_v4, %v5704_v60  ;;  %v8502_v0 = vld [vmem:[#allocation67_spill] sm:$0xff] }
 0x20f   : > { %v2026_v17 = vsel %vm768_vm6, %v1994_v25, %v8479_v46  ;;  %v1924_v46 = vsel %vm768_vm6, %v1923_v21, %v5829_v57  ;;  %v2035_v19 = vrot.slane %v5937_v39, 4  ;;  %v8480_v2 = vrot.slane %v5757_v54, 4  ;;  %v8503_v57 = vld [vmem:[#allocation58_spill] sm:$0xff] }
 0x210   : > { %v2034_v30 = vperm.slane %v2026_v17, %v5622_v61  ;;  %v1930_v7 = vperm.slane %v1924_v46, %v5622_v61  ;;  %v1911_v56 = vrot.slane %v1882_v44, 4  ;;  %v964_v60 = vrot.slane %v5989_v8, 4 }
 0x211   : > { %v2036_v39 = vsel %vm768_vm6, %v2035_v19, %v5877_v53  ;;  %v2023_v21 = vrot.slane %v1994_v25, 4  ;;  %v852_v4 = vrot.slane %v5926_v16, 4  ;;  %v3101_v17 = vrot.slane %v5929_v33, 4 }
 0x212   : > { %4524 = vrot.lane.b32.xlu1 %v4523_v10, %s4920_s21  ;;  %v6090_v35 = vsel %vm768_vm6, %v2034_v30, %v8480_v2  ;;  %v2042_v2 = vperm.slane %v2036_v39, %v5622_v61  ;;  %v1912_v6 = vsel %vm768_vm6, %v1911_v56, %v5867_v42  ;;  %v8481_v44 = vrot.slane %v5688_v1, 4 }
 0x213   : > { %v6113_v8 = vperm.slane %v1912_v6, %v5622_v61  ;;  %v2024_v16 = vsel %vm768_vm6, %v2023_v21, %v5908_v11  ;;  %v1939_v25 = vrot.slane %v1922_v32, 4  ;;  %v3102_v42 = vsel %vm768_vm6, %v6057_v41, %v3101_v17 }
 0x214   : > { %4504 = vrot.lane.b32.xlu2 %v5810_v28, %s4920_s21  ;;  %v991_v53 = vsel %vm768_vm6, %v6054_v55, %v8481_v44  ;;  %v8482_v46 = vrot.slane %v5744_v38, 4  ;;  %v6130_v6 = vperm.slane %v2024_v16, %v5622_v61  ;;  %v8484_v56 = vrot.slane %v5685_v50, 4 }
 0x215   : > { %4529 = vrot.lane.b32.xlu0 %v4523_v10, %s4919_s20  ;;  %v8483_v10 = vrot.slane %v5787_v37, 4  ;;  %v965_v32 = vsel %vm768_vm6, %v964_v60, %v5880_v24  ;;  %v8485_v39 = vrot.slane %v5849_v5, 4  ;;  %v8486_v16 = vrot.slane %v5761_v9, 4  ;;  %s4924_s20 = smov 112  }
 0x216   : > { %v6122_v28 = vsel %vm768_vm6, %v1930_v7, %v8482_v46  ;;  %v879_v11 = vsel %vm768_vm6, %v5993_v63, %v8484_v56  ;;  %v6158_v60 = vsel %vm768_vm6, %v1939_v25, %v5737_v22  ;;  %v6161_v56 = vperm.slane %v3102_v42, %v5622_v61 }
 0x217   : > { %v6127_v19 = vsel %vm768_vm6, %v2042_v2, %v8483_v10  ;;  %v2990_v21 = vsel %vm768_vm6, %v5996_v36, %v8485_v39  ;;  %v4538_v44 = vpack.i.bf16 %v991_v53, %v879_v11  ;;  %v6148_v46 = vsel %vm768_vm6, %v6113_v8, %v8486_v16 }
 0x218   : > { %v8487_v10 = vrot.slane %v5792_v31, 4  ;;  %v2051_v11 = vrot.slane %v2034_v30, 4  ;;  %v1943_v39 = vrot.slane %v1930_v7, 4  ;;  %v853_v16 = vsel %vm768_vm6, %v852_v4, %v5832_v29  ;;  %v8497_v4 = vld [vmem:[#allocation59_spill] sm:$0xff] }
 0x219   : > { %v2055_v17 = vrot.slane %v2042_v2, 4  ;;  %v978_v22 = vrot.slane %v5820_v12, 4  ;;  %v3003_v42 = vrot.slane %v5999_v34, 4  ;;  %v3115_v30 = vrot.slane %v6027_v27, 4  ;;  %v8490_v27 = vld [vmem:[#allocation61_spill] sm:$0xff] }
 0x21a   : > { %v6154_v24 = vsel %vm768_vm6, %v6130_v6, %v8487_v10  ;;  %4539 = vrot.lane.b32.xlu1 %v4538_v44, %s4924_s20  ;;  %v6169_v10 = vperm.slane %v2990_v21, %v5622_v61  ;;  %v6174_v25 = vsel %vm768_vm6, %v2051_v11, %v5757_v54  ;;  %v6180_v7 = vperm.slane %v5846_v3, %v5622_v61  ;;  %v8494_v11 = vld [vmem:[#allocation69_spill] sm:$0xff] }
 0x21b   : > { %v6183_v29 = vperm.slane %v965_v32, %v5622_v61  ;;  %v6189_v2 = vsel %vm768_vm6, %v1943_v39, %v5744_v38  ;;  %v6193_v54 = vsel %vm768_vm6, %v2055_v17, %v5787_v37  ;;  %v8489_v34 = vpack.i.bf16 %v5982_v26, %v5977_v51  ;;  %v8492_v17 = vld [vmem:[#allocation60_spill] sm:$0xff] }
 0x21c   : > { %8488 = vst [vmem:[#allocation70_spill] sm:$0xff] %v6180_v7  ;;  %v6202_v3 = vperm.slane %v853_v16, %v5622_v61  ;;  %v8491_v32 = vrot.slane %v8490_v27, 4  ;;  %v840_v21 = vrot.slane %v5919_v18, 4  ;;  %v8493_v44 = vrot.slane %v8492_v17, 4 }
 0x21d   : > { %4544 = vrot.lane.b32.xlu2 %v8489_v34, %s4924_s20  ;;  %4534 = vrot.lane.b32.xlu0 %v5972_v52, %s4920_s21  ;;  %v6217_v52 = vsel %vm768_vm6, %v3003_v42, %v5730_v59  ;;  %v6221_v26 = vsel %vm768_vm6, %v3115_v30, %v5733_v14  ;;  %v952_v39 = vrot.slane %v8494_v11, 4  ;;  %v8495_v34 = vld [vmem:[#allocation64_spill] sm:$0xff]  ;;  %v8498_v53 = vrot.slane %v8497_v4, 4  ;;  %v8499_v30 = vld [vmem:[#allocation66_spill] sm:$0xff]  ;;  %s4925_s21 = smov 80  }
 0x21e   : > { %v3126_v38 = vsel %vm768_vm6, %v6161_v56, %v8491_v32  ;;  %v3014_v51 = vsel %vm768_vm6, %v6169_v10, %v8493_v44  ;;  %v841_v18 = vsel %vm768_vm6, %v840_v21, %v8495_v34  ;;  %v8496_v32 = vld [vmem:[#allocation68_spill] sm:$0xff]  ;;  %v3087_v44 = vrot.slane %v6002_v15, 4  ;;  %v8500_v21 = vld [vmem:[#allocation65_spill] sm:$0xff] }
 0x21f   : > { %v2975_v37 = vrot.slane %v8496_v32, 4  ;;  %v987_v59 = vsel %vm768_vm6, %v6183_v29, %v8498_v53  ;;  %v4548_v42 = vpack.i.bf16 %v3126_v38, %v3014_v51  ;;  %v6235_v14 = vperm.slane %v841_v18, %v5622_v61  ;;  %v8501_v32 = vld [vmem:[#allocation63_spill] sm:$0xff] }
 0x220   : > { %v953_v11 = vsel %vm768_vm6, %v952_v39, %v8499_v30  ;;  %v3001_v15 = vrot.slane %v8501_v32, 4  ;;  %v3088_v23 = vsel %vm768_vm6, %v3087_v44, %v8502_v0  ;;  %v8504_v53 = vrot.slane %v8503_v57, 4  ;;  %v8505_v30 = vld [vmem:[#allocation62_spill] sm:$0xff] }
 0x221   : > { %v6240_v16 = vperm.slane %v953_v11, %v5622_v61  ;;  %v2976_v34 = vsel %vm768_vm6, %v2975_v37, %v8500_v21  ;;  %v6256_v39 = vperm.slane %v3088_v23, %v5622_v61  ;;  %v3113_v37 = vrot.slane %v6180_v7, 4  ;;  %v8561_v21 = vld [vmem:[#allocation33_spill] sm:$0xff] }
 0x222   : > { %v875_v38 = vsel %vm768_vm6, %v6202_v3, %v8504_v53  ;;  %4549 = vrot.lane.b32.xlu1 %v4548_v42, %s4924_s20  ;;  %v6253_v51 = vperm.slane %v2976_v34, %v5622_v61  ;;  %v8506_v11 = vrot.slane %v8505_v30, 4  ;;  %v988_v42 = vrot.slane %v6054_v55, 4  ;;  %v8508_v53 = vld [vmem:[#allocation57_spill] sm:$0xff]  ;;  %v8511_v55 = vld [vmem:[#allocation55_spill] sm:$0xff] }
 0x223   : > { %v4558_v18 = vpack.i.bf16 %v987_v59, %v875_v38  ;;  %v6267_v44 = vsel %vm768_vm6, %v6240_v16, %v978_v22  ;;  %v6278_v59 = vsel %vm768_vm6, %v6256_v39, %v3113_v37  ;;  %v8507_v22 = vpack.i.bf16 %v6014_v40, %v6009_v47  ;;  %v8510_v47 = vld [vmem:[#allocation56_spill] sm:$0xff] }
 0x224   : > { %v6263_v0 = vsel %vm768_vm6, %v6235_v14, %v8506_v11  ;;  %v6274_v23 = vsel %vm768_vm6, %v6253_v51, %v3001_v15  ;;  %v876_v34 = vrot.slane %v5993_v63, 4  ;;  %v989_v15 = vsel %vm768_vm6, %v988_v42, %v5688_v1 }
 0x225   : > { %4559 = vrot.lane.b32.xlu2 %v4558_v18, %s4925_s21  ;;  %4554 = vrot.lane.b32.xlu0 %v8507_v22, %s4926_s8  ;;  %v3075_v38 = vrot.slane %v8508_v53, 4  ;;  %v8509_v37 = vpack.i.bf16 %v6090_v35, %v6051_v58  ;;  %v2963_v40 = vrot.slane %v8510_v47, 4  ;;  %v3099_v11 = vrot.slane %v6057_v41, 4  ;;  %v8513_v58 = vld [vmem:[#allocation54_spill] sm:$0xff]  ;;  %v8514_v35 = vld [vmem:[#allocation53_spill] sm:$0xff] }
 0x226   : > { %v877_v18 = vsel %vm768_vm6, %v876_v34, %v5685_v50  ;;  %v2987_v63 = vrot.slane %v5996_v36, 4  ;;  %v8512_v42 = vpack.i.bf16 %v6046_v13, %v6039_v20  ;;  %v4417_v34 = vunpack.i.h.bf16 %v8514_v35  ;;  %v8515_v36 = vld [vmem:[#allocation52_spill] sm:$0xff] }
 0x227   : > { %v4563_v22 = vpack.i.bf16 %v989_v15, %v877_v18  ;;  %v3076_v1 = vsel %vm768_vm6, %v3075_v38, %v8511_v55  ;;  %v2964_v50 = vsel %vm768_vm6, %v2963_v40, %v8513_v58  ;;  %v3100_v41 = vsel %vm768_vm6, %v3099_v11, %v5929_v33  ;;  %v8520_v58 = vld [vmem:[#allocation12_spill] sm:$0xff] }
 0x228   : > { %v4407_v15 = vunpack.i.h.bf16 %v8515_v36  ;;  %v6314_v55 = vperm.slane %v3076_v1, %v5622_v61  ;;  %v4416_v53 = vunpack.i.l.bf16 %v8514_v35  ;;  %v2988_v20 = vsel %vm768_vm6, %v2987_v63, %v5849_v5  ;;  %v8519_v1 = vld [vmem:[#allocation13_spill] sm:$0xff] }
 0x229   : > { %v6320_v13 = vperm.slane %v2964_v50, %v5622_v61  ;;  %v6323_v38 = vperm.slane %v3100_v41, %v5622_v61  ;;  %v4406_v33 = vunpack.i.l.bf16 %v8515_v36  ;;  %v3393_v18 = vrot.slane %v4417_v34, 4 }
 0x22a   : > { %4569 = vrot.lane.b32.xlu1 %v8509_v37, %s4926_s8  ;;  %v8516_v37 = vpack.i.bf16 %v6081_v45, %v6075_v48  ;;  %v3391_v47 = vrot.slane %v4407_v15, 4  ;;  %v6331_v40 = vperm.slane %v2988_v20, %v5622_v61  ;;  %v3121_v5 = vrot.slane %v6314_v55, 4 }
 0x22b   : > { %v3281_v11 = vrot.slane %v4416_v53, 4  ;;  %v8518_v63 = vpack.i.bf16 %v6127_v19, %v6122_v28  ;;  %v3009_v48 = vrot.slane %v6320_v13, 4  ;;  %v6351_v50 = vperm.slane %v8520_v58, %v5166_v62  ;;  %v8522_v28 = vld [vmem:[#allocation22_spill] sm:$0xff] }
 0x22c   : > { %v3122_v45 = vsel %vm768_vm6, %v6323_v38, %v3121_v5  ;;  %v3279_v41 = vrot.slane %v4406_v33, 4  ;;  %v6359_v19 = vperm.slane %v8522_v28, %v5166_v62  ;;  %v3392_v35 = vsel %vm768_vm6, %v3391_v47, %v4417_v34  ;;  %v8527_v34 = vld [vmem:[#allocation23_spill] sm:$0xff] }
 0x22d   : > { %4584 = vrot.lane.b32.xlu2 %v8512_v42, %s4926_s8  ;;  %4564 = vrot.lane.b32.xlu0 %v4563_v22, %s4927_s9  ;;  %v8517_v22 = vpack.i.bf16 %v6071_v49, %v6067_v43  ;;  %v6347_v42 = vperm.slane %v8519_v1, %v5166_v62  ;;  %v8521_v43 = vld [vmem:[#allocation21_spill] sm:$0xff]  ;;  %v3394_v36 = vsel %vm768_vm6, %v4407_v15, %v3393_v18  ;;  %v3123_v18 = vrot.slane %v6161_v56, 4 }
 0x22e   : > { %v6355_v49 = vperm.slane %v8521_v43, %v5166_v62  ;;  %v3010_v20 = vsel %vm768_vm6, %v6331_v40, %v3009_v48  ;;  %v3282_v1 = vsel %vm768_vm6, %v4406_v33, %v3281_v11  ;;  %v8525_v43 = vld [vmem:[#allocation20_spill] sm:$0xff]  ;;  %v6380_v15 = vperm.slane %v8527_v34, %v5166_v62  ;;  %v8542_v56 = vld [vmem:[#allocation9_spill] sm:$0xff] }
 0x22f   : > { %v4588_v58 = vpack.i.bf16 %v3122_v45, %v3010_v20  ;;  %v6376_v28 = vperm.slane %v8525_v43, %v5166_v62  ;;  %v6385_v48 = vperm.slane %v3392_v35, %v5166_v62  ;;  %v3280_v33 = vsel %vm768_vm6, %v3279_v41, %v4416_v53  ;;  %v8533_v53 = vld [vmem:[#allocation25_spill] sm:$0xff]  ;;  %v8549_v35 = vld [vmem:[#allocation27_spill] sm:$0xff] }
 0x230   : > { %8528 = vst [vmem:[#allocation60_spill] sm:$0xff] %v6380_v15  ;;  %v3451_v47 = vrot.slane %v6355_v49, 4  ;;  %v3339_v11 = vrot.slane %v6359_v19, 4  ;;  %v6394_v45 = vperm.slane %v3282_v1, %v5166_v62  ;;  %v3011_v20 = vrot.slane %v6169_v10, 4 }
 0x231   : > { %8526 = vst [vmem:[#allocation61_spill] sm:$0xff] %v6376_v28  ;;  %v6404_v41 = vperm.slane %v3280_v33, %v5166_v62  ;;  %v8531_v10 = vpack.i.bf16 %v6154_v24, %v6148_v46  ;;  %v8532_v1 = vpack.i.bf16 %v6174_v25, %v6158_v60  ;;  %v6424_v46 = vperm.slane %v8533_v53, %v5622_v61  ;;  %v8539_v53 = vld [vmem:[#allocation29_spill] sm:$0xff] }
 0x232   : > { %4579 = vrot.lane.b32.xlu1 %v8516_v37, %s4927_s9  ;;  %v8523_v37 = vld [vmem:[#allocation14_spill] sm:$0xff]  ;;  %8529 = vst [vmem:[#allocation69_spill] sm:$0xff] %v6385_v48  ;;  %v6428_v24 = vsel %vm768_vm6, %v3339_v11, %v6394_v45  ;;  %v6430_v60 = vpop.permute.xlu2 %4434  ;;  %v3012_v25 = vsel %vm768_vm6, %v3011_v20, %v8492_v17  ;;  %v6452_v17 = vperm.slane %v8542_v56, %v5622_v61 }
 0x233   : > { %v6367_v5 = vperm.slane %v8523_v37, %v5166_v62  ;;  %v6388_v37 = vperm.slane %v3394_v36, %v5166_v62  ;;  %8530 = vst [vmem:[#allocation64_spill] sm:$0xff] %v6404_v41  ;;  %v8540_v11 = vld [vmem:[#allocation30_spill] sm:$0xff]  ;;  %v3329_v20 = vrot.slane %v6404_v41, 4  ;;  %v6472_v36 = vperm.slane %v8549_v35, %v5622_v61 }
 0x234   : > { %8534 = vst [vmem:[#allocation68_spill] sm:$0xff] %v6424_v46  ;;  %v6506_v46 = vperm.slane %v8561_v21, %v5622_v61  ;;  %v8563_v56 = vld [vmem:[#allocation18_spill] sm:$0xff] }
 0x235   : > { %4604 = vrot.lane.b32.xlu2 %v8517_v22, %s4928_s15  ;;  %4574 = vrot.lane.b32.xlu0 %v8518_v63, %s4925_s21  ;;  %v8524_v22 = vld [vmem:[#allocation15_spill] sm:$0xff]  ;;  %v3453_v43 = vrot.slane %v6388_v37, 4  ;;  %v6420_v33 = vsel %vm768_vm6, %v3451_v47, %v6388_v37  ;;  %v8537_v47 = vld [vmem:[#allocation8_spill] sm:$0xff]  ;;  %8543 = vst [vmem:[#allocation63_spill] sm:$0xff] %v6452_v17  ;;  %v6514_v17 = vperm.slane %v8563_v56, %v5622_v61 }
 0x236   : > { %v6371_v63 = vperm.slane %v8524_v22, %v5166_v62  ;;  %v6440_v37 = vperm.slane %v8537_v47, %v5622_v61  ;;  %v6448_v22 = vperm.slane %v8540_v11, %v5622_v61  ;;  %v8544_v47 = vld [vmem:[#allocation11_spill] sm:$0xff]  ;;  %8550 = vst [vmem:[#allocation62_spill] sm:$0xff] %v6472_v36 }
 0x237   : > { %v6458_v34 = vperm.slane %v8544_v47, %v5622_v61  ;;  %8564 = vst [vmem:[#allocation53_spill] sm:$0xff] %v6514_v17  ;;  %v8569_v36 = vld [vmem:[#allocation35_spill] sm:$0xff]  ;;  %v3330_v17 = vsel %vm768_vm6, %v6380_v15, %v3329_v20 }
 0x238   : > { %8538 = vst [vmem:[#allocation66_spill] sm:$0xff] %v6440_v37  ;;  %v8571_v37 = vld [vmem:[#allocation38_spill] sm:$0xff]  ;;  %v6626_v15 = vperm.slane %v3330_v17, %v5622_v61  ;;  %v3119_v17 = vrot.slane %v6323_v38, 4 }
 0x239   : > { %8541 = vst [vmem:[#allocation65_spill] sm:$0xff] %v6448_v22 }
 0x23a   : > { %4589 = vrot.lane.b32.xlu1 %v4588_v58, %s4925_s21  ;;  %v3124_v58 = vsel %vm768_vm6, %v3123_v18, %v8490_v27  ;;  %v8535_v27 = vld [vmem:[#allocation26_spill] sm:$0xff]  ;;  %8591 = vst [vmem:[#allocation30_spill] sm:$0xff] %v6626_v15 }
 0x23b   : > { %v6436_v18 = vperm.slane %v8535_v27, %v5622_v61  ;;  %v3341_v27 = vrot.slane %v6394_v45, 4  ;;  %v8551_v45 = vld [vmem:[#allocation28_spill] sm:$0xff] }
 0x23c   : > { %v6476_v47 = vperm.slane %v8551_v45, %v5622_v61  ;;  %v8557_v45 = vld [vmem:[#allocation19_spill] sm:$0xff] }
 0x23d   : > { %4614 = vrot.lane.b32.xlu2 %v8531_v10, %s4929_s16  ;;  %4619 = vrot.lane.b32.xlu0 %v8532_v1, %s4928_s15  ;;  %8536 = vst [vmem:[#allocation59_spill] sm:$0xff] %v6436_v18  ;;  %v4593_v10 = vpack.i.bf16 %v3124_v58, %v3012_v25  ;;  %v6444_v1 = vperm.slane %v8539_v53, %v5622_v61  ;;  %v8545_v58 = vld [vmem:[#allocation24_spill] sm:$0xff]  ;;  %v8547_v53 = vld [vmem:[#allocation10_spill] sm:$0xff]  ;;  %v8573_v18 = vld [vmem:[#allocation39_spill] sm:$0xff] }
 0x23e   : > { %v6462_v25 = vperm.slane %v8545_v58, %v5622_v61  ;;  %v6467_v11 = vperm.slane %v8547_v53, %v5622_v61  ;;  %8552 = vst [vmem:[#allocation57_spill] sm:$0xff] %v6476_v47  ;;  %v8555_v53 = vld [vmem:[#allocation32_spill] sm:$0xff]  ;;  %v6493_v7 = vperm.slane %v8557_v45, %v5622_v61  ;;  %v8562_v45 = vld [vmem:[#allocation34_spill] sm:$0xff]  ;;  %v984_v58 = vrot.slane %v6183_v29, 4 }
 0x23f   : > { %v6486_v62 = vperm.slane %v8555_v53, %v5622_v61  ;;  %v8560_v53 = vpack.i.bf16 %v6221_v26, %v6217_v52  ;;  %v6510_v35 = vperm.slane %v8562_v45, %v5622_v61  ;;  %v8565_v52 = vld [vmem:[#allocation36_spill] sm:$0xff]  ;;  %v6601_v29 = vperm.slane %v6428_v24, %v5622_v61 }
 0x240   : > { %8546 = vst [vmem:[#allocation67_spill] sm:$0xff] %v6462_v25  ;;  %v6520_v26 = vperm.slane %v8565_v52, %v5622_v61  ;;  %v6535_v52 = vperm.slane %v8569_v36, %v5622_v61  ;;  %v8575_v36 = vpack.i.bf16 %v6267_v44, %v6263_v0  ;;  %v8577_v0 = vrot.slane %v6371_v63, 4 }
 0x241   : > { %8548 = vst [vmem:[#allocation58_spill] sm:$0xff] %v6467_v11  ;;  %v6543_v11 = vperm.slane %v8573_v18, %v5622_v61  ;;  %v3454_v18 = vsel %vm768_vm6, %v6355_v49, %v3453_v43 }
 0x242   : > { %4594 = vrot.lane.b32.xlu1 %v4593_v10, %s4927_s9  ;;  %v8553_v10 = vld [vmem:[#allocation31_spill] sm:$0xff]  ;;  %8556 = vst [vmem:[#allocation55_spill] sm:$0xff] %v6486_v62  ;;  %v2266_v44 = vsel %vm768_vm6, %v6347_v42, %v8577_v0  ;;  %v985_v0 = vsel %vm768_vm6, %v984_v58, %v8497_v4  ;;  %v8585_v4 = vrot.slane %v6385_v48, 4  ;;  %v8600_v48 = vrot.slane %v6351_v50, 4 }
 0x243   : > { %v6482_v41 = vperm.slane %v8553_v10, %v5622_v61  ;;  %8558 = vst [vmem:[#allocation54_spill] sm:$0xff] %v6493_v7  ;;  %v8559_v10 = vpack.i.bf16 %v6193_v54, %v6189_v2  ;;  %v872_v2 = vrot.slane %v6202_v3, 4  ;;  %v8576_v54 = vld [vmem:[#allocation40_spill] sm:$0xff] }
 0x244   : > { %8566 = vst [vmem:[#allocation52_spill] sm:$0xff] %v6520_v26  ;;  %v6564_v25 = vperm.slane %v8576_v54, %v5622_v61  ;;  %v3442_v58 = vsel %vm768_vm6, %v6376_v28, %v8585_v4  ;;  %v8589_v4 = vld [vmem:[#allocation16_spill] sm:$0xff] }
 0x245   : > { %8554 = vst [vmem:[#allocation56_spill] sm:$0xff] %v6482_v41  ;;  %4624 = vrot.lane.b32.xlu2 %v8559_v10, %s4930_s17  ;;  %4634 = vrot.lane.b32.xlu0 %v8560_v53, %s4928_s15  ;;  %v8567_v10 = vld [vmem:[#allocation37_spill] sm:$0xff]  ;;  %v873_v20 = vsel %vm768_vm6, %v872_v2, %v8503_v57  ;;  %v6623_v28 = vperm.slane %v8589_v4, %v5622_v61  ;;  %v3007_v4 = vrot.slane %v6331_v40, 4  ;;  %v8603_v57 = vld [vmem:[#allocation46_spill] sm:$0xff]  ;;  %v8609_v40 = vld [vmem:[#allocation48_spill] sm:$0xff] }
 0x246   : > { %v6524_v21 = vperm.slane %v8567_v10, %v5622_v61  ;;  %v6526_v53 = vpop.permute.xlu2 %4459  ;;  %8570 = vst [vmem:[#allocation12_spill] sm:$0xff] %v6535_v52  ;;  %v6539_v10 = vperm.slane %v8571_v37, %v5622_v61  ;;  %v3342_v37 = vsel %vm768_vm6, %v6359_v19, %v3341_v27  ;;  %v8578_v19 = vrot.slane %v6367_v5, 4  ;;  %v8579_v27 = vld [vmem:[#allocation41_spill] sm:$0xff] }
 0x247   : > { %8574 = vst [vmem:[#allocation22_spill] sm:$0xff] %v6543_v11  ;;  %v6586_v45 = vperm.slane %v3342_v37, %v5622_v61  ;;  %v4608_v54 = vpack.i.bf16 %v985_v0, %v873_v20  ;;  %v6630_v2 = vperm.slane %v3442_v58, %v5622_v61  ;;  %v8595_v0 = vld [vmem:[#allocation43_spill] sm:$0xff]  ;;  %v2376_v58 = vsel %vm768_vm6, %v8600_v48, %v6367_v5 }
 0x248   : > { %8568 = vst [vmem:[#allocation13_spill] sm:$0xff] %v6524_v21  ;;  %v2378_v49 = vsel %vm768_vm6, %v6351_v50, %v8578_v19  ;;  %v6589_v19 = vperm.slane %v3454_v18, %v5622_v61  ;;  %v6638_v20 = vperm.slane %v8595_v0, %v5622_v61  ;;  %v8599_v0 = vrot.slane %v6347_v42, 4  ;;  %v8601_v42 = vld [vmem:[#allocation45_spill] sm:$0xff]  ;;  %v8605_v50 = vld [vmem:[#allocation47_spill] sm:$0xff] }
 0x249   : > { %8572 = vst [vmem:[#allocation21_spill] sm:$0xff] %v6539_v10  ;;  %v6597_v3 = vperm.slane %v2378_v49, %v5622_v61  ;;  %v8587_v49 = vld [vmem:[#allocation17_spill] sm:$0xff]  ;;  %v6676_v15 = vperm.slane %v8603_v57, %v5622_v61  ;;  %v6680_v5 = vperm.slane %v8605_v50, %v5622_v61  ;;  %v6690_v38 = vperm.slane %v2376_v58, %v5622_v61 }
 0x24a   : > { %4599 = vrot.lane.b32.xlu1 %v8575_v36, %s4929_s16  ;;  %v6578_v36 = vperm.slane %v8579_v27, %v5622_v61  ;;  %8580 = vst [vmem:[#allocation14_spill] sm:$0xff] %v6586_v45  ;;  %v6594_v27 = vperm.slane %v2266_v44, %v5622_v61  ;;  %v6614_v44 = vperm.slane %v6420_v33, %v5622_v61  ;;  %v8593_v33 = vld [vmem:[#allocation42_spill] sm:$0xff]  ;;  %v864_v50 = vrot.slane %v6235_v14, 4 }
 0x24b   : > { %v6559_v56 = vpop.permute.xlu0 %4419  ;;  %8581 = vst [vmem:[#allocation15_spill] sm:$0xff] %v6589_v19  ;;  %v6618_v24 = vperm.slane %v8587_v49, %v5622_v61  ;;  %v6634_v18 = vperm.slane %v8593_v33, %v5622_v61  ;;  %v8597_v33 = vld [vmem:[#allocation44_spill] sm:$0xff]  ;;  %v6694_v57 = vperm.slane %v8609_v40, %v5622_v61  ;;  %v3111_v58 = vrot.slane %v6256_v39, 4 }
 0x24c   : > { %v6574_v43 = vpop.permute.xlu1 %4429  ;;  %8582 = vst [vmem:[#allocation20_spill] sm:$0xff] %v6594_v27  ;;  %v6649_v11 = vperm.slane %v8597_v33, %v5622_v61  ;;  %v8611_v40 = vpack.i.bf16 %v6278_v59, %v6274_v23  ;;  %v8658_v27 = vunpack.i.l.bf16 %v6430_v60 }
 0x24d   : > { %8583 = vst [vmem:[#allocation23_spill] sm:$0xff] %v6597_v3 }
 0x24e   : > { %8584 = vst [vmem:[#allocation25_spill] sm:$0xff] %v6601_v29  ;;  %v6607_v37 = vpop.permute.xlu2 %4469 }
 0x24f   : > { %8586 = vst [vmem:[#allocation26_spill] sm:$0xff] %v6614_v44 }
 0x250   : > { %8588 = vst [vmem:[#allocation8_spill] sm:$0xff] %v6618_v24 }
 0x251   : > { %8590 = vst [vmem:[#allocation29_spill] sm:$0xff] %v6623_v28 }
 0x252   : > { %8592 = vst [vmem:[#allocation9_spill] sm:$0xff] %v6630_v2  ;;  %4609 = vrot.lane.b32.xlu1 %v4608_v54, %s4930_s17  ;;  %v2264_v54 = vsel %vm768_vm6, %v8599_v0, %v6371_v63  ;;  %v6669_v63 = vperm.slane %v8601_v42, %v5622_v61  ;;  %v1935_v42 = vrot.slane %v6113_v8, 4  ;;  %v3120_v8 = vsel %vm768_vm6, %v3119_v17, %v6314_v55 }
 0x253   : > { %8594 = vst [vmem:[#allocation11_spill] sm:$0xff] %v6634_v18  ;;  %v6664_v33 = vpop.permute.xlu0 %4424  ;;  %v6683_v48 = vperm.slane %v2264_v54, %v5622_v61  ;;  %v976_v54 = vrot.slane %v6240_v16, 4  ;;  %v2999_v0 = vrot.slane %v6253_v51, 4 }
 0x254   : > { %8596 = vst [vmem:[#allocation24_spill] sm:$0xff] %v6638_v20  ;;  %v6655_v49 = vpop.permute.xlu1 %4439  ;;  %v2047_v20 = vrot.slane %v6130_v6, 4  ;;  %v3008_v6 = vsel %vm768_vm6, %v3007_v4, %v6320_v13  ;;  %v6724_v59 = vsel %vm768_vm6, %v1935_v42, %v5761_v9  ;;  %v6732_v4 = vsel %vm768_vm6, %v864_v50, %v8505_v30 }
 0x255   : > { %8598 = vst [vmem:[#allocation10_spill] sm:$0xff] %v6649_v11  ;;  %v4638_v17 = vpack.i.bf16 %v3120_v8, %v3008_v6  ;;  %v8612_v11 = vld [vmem:[#allocation49_spill] sm:$0xff]  ;;  %v6736_v8 = vsel %vm768_vm6, %v976_v54, %v5820_v12  ;;  %v8299_v6 = vunpack.i.l.bf16 %v6430_v60  ;;  %v6745_v9 = vsel %vm768_vm6, %v2999_v0, %v8501_v32 }
 0x256   : > { %8602 = vst [vmem:[#allocation27_spill] sm:$0xff] %v6669_v63  ;;  %v6686_v10 = vpop.permute.xlu2 %4474  ;;  %v6718_v18 = vperm.slane %v8612_v11, %v5622_v61  ;;  %v6728_v13 = vsel %vm768_vm6, %v2047_v20, %v5792_v31  ;;  %v8618_v11 = vunpack.i.h.bf16 %v6430_v60  ;;  %v8620_v31 = vld [vmem:[#allocation70_spill] sm:$0xff]  ;;  %v8306_v30 = vunpack.i.h.bf16 %v6526_v53 }
 0x257   : > { %8604 = vst [vmem:[#allocation28_spill] sm:$0xff] %v6676_v15  ;;  %v6749_v20 = vsel %vm768_vm6, %v3111_v58, %v8620_v31  ;;  %v8308_v42 = vunpack.i.l.bf16 %v6526_v53  ;;  %v4422_v12 = vunpack.i.h.bf16 %v6559_v56  ;;  %v4421_v50 = vunpack.i.l.bf16 %v6559_v56 }
 0x258   : > { %8606 = vst [vmem:[#allocation31_spill] sm:$0xff] %v6680_v5  ;;  %v4426_v31 = vunpack.i.l.bf16 %v6664_v33  ;;  %v6765_v56 = vrot.slane %v8299_v6, 4  ;;  %v6772_v32 = vrot.slane %v8306_v30, 4  ;;  %v8626_v5 = vunpack.i.h.bf16 %v6664_v33 }
 0x259   : > { %8607 = vst [vmem:[#allocation32_spill] sm:$0xff] %v6683_v48  ;;  %v6776_v58 = vrot.slane %v8308_v42, 4  ;;  %v1289_v39 = vrot.slane %v4422_v12, 4  ;;  %v1177_v6 = vrot.slane %v4421_v50, 4  ;;  %v8624_v48 = vunpack.i.h.bf16 %v6607_v37 }
 0x25a   : > { %8608 = vst [vmem:[#allocation19_spill] sm:$0xff] %v6690_v38  ;;  %4629 = vrot.lane.b32.xlu1 %v8611_v40, %s4929_s16  ;;  %v6740_v40 = vrot.slane %v8618_v11, 4  ;;  %v8623_v11 = vunpack.i.l.bf16 %v6574_v43  ;;  %v1665_v15 = vrot.slane %v8626_v5, 4  ;;  %v8628_v63 = vunpack.i.h.bf16 %v6655_v49 }
 0x25b   : > { %8610 = vst [vmem:[#allocation33_spill] sm:$0xff] %v6694_v57  ;;  %v8622_v57 = vunpack.i.h.bf16 %v6574_v43  ;;  %v6785_v30 = vrot.slane %v8624_v48, 4  ;;  %v8629_v2 = vunpack.i.l.bf16 %v6655_v49 }
 0x25c   : > { %8613 = vst [vmem:[#allocation34_spill] sm:$0xff] %v6718_v18  ;;  %v6720_v23 = vpop.permute.xlu1 %4444  ;;  %v2241_v38 = vrot.slane %v8623_v11, 4  ;;  %v8625_v18 = vunpack.i.l.bf16 %v6607_v37  ;;  %v6802_v48 = vrot.slane %v8628_v63, 4 }
 0x25d   : > { %8614 = vst [vmem:[#allocation18_spill] sm:$0xff] %v6724_v59  ;;  %v2353_v16 = vrot.slane %v8622_v57, 4  ;;  %v8627_v57 = vunpack.i.h.bf16 %v6686_v10  ;;  %v4447_v28 = vunpack.i.h.bf16 %v6720_v23  ;;  %v4446_v63 = vunpack.i.l.bf16 %v6720_v23 }
 0x25e   : > { %8615 = vst [vmem:[#allocation36_spill] sm:$0xff] %v6728_v13  ;;  %v4480_v0 = vpop.permute.xlu2 %4479  ;;  %v6789_v42 = vrot.slane %v8625_v18, 4  ;;  %v6806_v18 = vrot.slane %v8629_v2, 4 }
 0x25f   : > { %8616 = vst [vmem:[#allocation37_spill] sm:$0xff] %v6732_v4  ;;  %v6759_v51 = vpop.permute.xlu0 %4464  ;;  %v4482_v55 = vunpack.i.h.bf16 %v4480_v0  ;;  %v4481_v14 = vunpack.i.l.bf16 %v4480_v0  ;;  %v2617_v62 = vrot.slane %v4446_v63, 4 }
 0x260   : > { %8617 = vst [vmem:[#allocation35_spill] sm:$0xff] %v6736_v8  ;;  %v8339_v11 = vunpack.i.h.bf16 %v6759_v51  ;;  %v8340_v24 = vunpack.i.l.bf16 %v6759_v51 }
 0x261   : > { %8619 = vst [vmem:[#allocation38_spill] sm:$0xff] %v6745_v9  ;;  %v1175_v0 = vrot.slane %v4481_v14, 4  ;;  %v1287_v54 = vrot.slane %v4482_v55, 4  ;;  %v1178_v5 = vsel %vm768_vm6, %v4481_v14, %v1177_v6  ;;  %v1290_v8 = vsel %vm768_vm6, %v4482_v55, %v1289_v39  ;;  %v8631_v55 = vld [vmem:[#allocation7_spill] sm:$0xff] }
 0x262   : > { %8621 = vst [vmem:[#allocation39_spill] sm:$0xff] %v6749_v20  ;;  %4639 = vrot.lane.b32.xlu1 %v4638_v17, %s4930_s17  ;;  %v1553_v17 = vrot.slane %v4426_v31, 4  ;;  %v6797_v20 = vrot.slane %v8627_v57, 4  ;;  %v8630_v14 = vunpack.i.l.bf16 %v6686_v10 }
 0x263   : > { %v1176_v4 = vsel %vm768_vm6, %v1175_v0, %v4421_v50  ;;  %v1288_v57 = vsel %vm768_vm6, %v1287_v54, %v4422_v12  ;;  %v6824_v12 = vperm.slane %v1178_v5, %v8631_v55  ;;  %v6827_v54 = vperm.slane %v1290_v8, %v8631_v55 }
 0x264   : > { %v6793_v9 = vpop.permute.xlu1 %4449  ;;  %v6818_v6 = vrot.slane %v8630_v14, 4  ;;  %v6821_v39 = vperm.slane %v1176_v4, %v8631_v55  ;;  %v6830_v23 = vperm.slane %v1288_v57, %v8631_v55  ;;  %v6835_v14 = vrot.slane %v8339_v11, 4 }
 0x265   : > { %v6839_v4 = vrot.slane %v8340_v24, 4  ;;  %v2729_v5 = vrot.slane %v4447_v28, 4 }
 0x266   : > { %v4485_v44 = vpop.permute.xlu2 %4484  ;;  %8632 = vst [vmem:[#allocation40_spill] sm:$0xff] %v6821_v39 }
 0x267   : > { %v4490_v29 = vpop.permute.xlu0 %4489  ;;  %v4487_v2 = vunpack.i.h.bf16 %v4485_v44  ;;  %v4486_v52 = vunpack.i.l.bf16 %v4485_v44  ;;  %8633 = vst [vmem:[#allocation41_spill] sm:$0xff] %v6830_v23 }
 0x268   : > { %v4492_v7 = vunpack.i.h.bf16 %v4490_v29  ;;  %v4491_v50 = vunpack.i.l.bf16 %v4490_v29 }
 0x269   : > { %v1663_v0 = vrot.slane %v4487_v2, 4  ;;  %v1551_v44 = vrot.slane %v4486_v52, 4  ;;  %v1554_v8 = vsel %vm768_vm6, %v4486_v52, %v1553_v17  ;;  %v1666_v41 = vsel %vm768_vm6, %v4487_v2, %v1665_v15 }
 0x26a   : > { %v2351_v57 = vrot.slane %v4492_v7, 4  ;;  %v2239_v21 = vrot.slane %v4491_v50, 4  ;;  %v8634_v52 = vunpack.i.h.bf16 %v6664_v33  ;;  %v8635_v17 = vunpack.i.h.bf16 %v6793_v9 }
 0x26b   : > { %v1552_v13 = vsel %vm768_vm6, %v1551_v44, %v4426_v31  ;;  %v6859_v29 = vperm.slane %v1554_v8, %v8631_v55  ;;  %v6862_v47 = vperm.slane %v1666_v41, %v8631_v55  ;;  %v2242_v11 = vsel %vm768_vm6, %v4491_v50, %v2241_v38 }
 0x26c   : > { %v6843_v26 = vpop.permute.xlu1 %4454  ;;  %v1664_v15 = vsel %vm768_vm6, %v1663_v0, %v8634_v52  ;;  %v6856_v2 = vrot.slane %v8635_v17, 4  ;;  %v2354_v24 = vsel %vm768_vm6, %v4492_v7, %v2353_v16  ;;  %v8636_v33 = vunpack.i.l.bf16 %v6574_v43 }
 0x26d   : > { %v8637_v44 = vunpack.i.h.bf16 %v6574_v43  ;;  %v6873_v23 = vperm.slane %v1552_v13, %v8631_v55  ;;  %v6876_v41 = vperm.slane %v1664_v15, %v8631_v55  ;;  %v6890_v13 = vperm.slane %v2354_v24, %v8631_v55 }
 0x26e   : > { %v4505_v59 = vpop.permute.xlu2 %4504  ;;  %v2240_v0 = vsel %vm768_vm6, %v2239_v21, %v8636_v33 }
 0x26f   : > { %v4500_v31 = vpop.permute.xlu0 %4499  ;;  %v2352_v52 = vsel %vm768_vm6, %v2351_v57, %v8637_v44  ;;  %v4507_v17 = vunpack.i.h.bf16 %v4505_v59  ;;  %v4506_v8 = vunpack.i.l.bf16 %v4505_v59  ;;  %8638 = vst [vmem:[#allocation17_spill] sm:$0xff] %v6873_v23  ;;  %v6881_v43 = vperm.slane %v2240_v0, %v8631_v55 }
 0x270   : > { %8639 = vst [vmem:[#allocation16_spill] sm:$0xff] %v6876_v41  ;;  %v4502_v38 = vunpack.i.h.bf16 %v4500_v31  ;;  %v4501_v7 = vunpack.i.l.bf16 %v4500_v31  ;;  %v6884_v57 = vperm.slane %v2242_v11, %v8631_v55  ;;  %v6887_v59 = vperm.slane %v2352_v52, %v8631_v55 }
 0x271   : > { %v2727_v16 = vrot.slane %v4507_v17, 4  ;;  %v2615_v50 = vrot.slane %v4506_v8, 4  ;;  %v2618_v39 = vsel %vm768_vm6, %v4506_v8, %v2617_v62  ;;  %v2730_v21 = vsel %vm768_vm6, %v4507_v17, %v2729_v5  ;;  %8640 = vst [vmem:[#allocation42_spill] sm:$0xff] %v6881_v43 }
 0x272   : > { %8641 = vst [vmem:[#allocation43_spill] sm:$0xff] %v6884_v57  ;;  %v3415_v33 = vrot.slane %v4502_v38, 4  ;;  %v3303_v62 = vrot.slane %v4501_v7, 4  ;;  %v8644_v0 = vunpack.i.l.bf16 %v6793_v9  ;;  %v6898_v11 = vperm.slane %v2618_v39, %v8631_v55 }
 0x273   : > { %8642 = vst [vmem:[#allocation44_spill] sm:$0xff] %v6887_v59  ;;  %v2616_v15 = vsel %vm768_vm6, %v2615_v50, %v4446_v63  ;;  %v2728_v31 = vsel %vm768_vm6, %v2727_v16, %v4447_v28  ;;  %v6901_v52 = vperm.slane %v2730_v21, %v8631_v55  ;;  %v3306_v8 = vsel %vm768_vm6, %v4501_v7, %v6806_v18 }
 0x274   : > { %8643 = vst [vmem:[#allocation45_spill] sm:$0xff] %v6890_v13  ;;  %v4495_v44 = vpop.permute.xlu1 %4494  ;;  %v1189_v17 = vrot.slane %v8644_v0, 4  ;;  %v6906_v28 = vperm.slane %v2616_v15, %v8631_v55  ;;  %v3418_v21 = vsel %vm768_vm6, %v4502_v38, %v6802_v48  ;;  %v8648_v15 = vunpack.i.l.bf16 %v6655_v49 }
 0x275   : > { %8645 = vst [vmem:[#allocation46_spill] sm:$0xff] %v6898_v11  ;;  %v8649_v18 = vunpack.i.h.bf16 %v6655_v49  ;;  %v6925_v39 = vperm.slane %v2728_v31, %v8631_v55  ;;  %v6929_v38 = vperm.slane %v3306_v8, %v8631_v55  ;;  %v4496_v16 = vunpack.i.l.bf16 %v4495_v44 }
 0x276   : > { %8646 = vst [vmem:[#allocation47_spill] sm:$0xff] %v6901_v52  ;;  %v3304_v5 = vsel %vm768_vm6, %v3303_v62, %v8648_v15  ;;  %v6935_v62 = vperm.slane %v3418_v21, %v8631_v55  ;;  %v4457_v8 = vunpack.i.h.bf16 %v6843_v26  ;;  %v8655_v21 = vunpack.i.l.bf16 %v6793_v9 }
 0x277   : > { %8647 = vst [vmem:[#allocation48_spill] sm:$0xff] %v6906_v28  ;;  %v4510_v0 = vpop.permute.xlu0 %4509  ;;  %v3416_v7 = vsel %vm768_vm6, %v3415_v33, %v8649_v18  ;;  %v6931_v24 = vpop.permute.xlu2 %4544  ;;  %v6938_v33 = vperm.slane %v3304_v5, %v8631_v55  ;;  %v4497_v18 = vunpack.i.h.bf16 %v4495_v44  ;;  %v4456_v5 = vunpack.i.l.bf16 %v6843_v26 }
 0x278   : > { %8650 = vst [vmem:[#allocation49_spill] sm:$0xff] %v6925_v39  ;;  %v4512_v49 = vunpack.i.h.bf16 %v4510_v0  ;;  %v4511_v15 = vunpack.i.l.bf16 %v4510_v0  ;;  %v6941_v31 = vperm.slane %v3416_v7, %v8631_v55  ;;  %v3679_v3 = vrot.slane %v4496_v16, 4 }
 0x279   : > { %8651 = vst [vmem:[#allocation70_spill] sm:$0xff] %v6931_v24  ;;  %v3791_v28 = vrot.slane %v4497_v18, 4  ;;  %v3794_v23 = vsel %vm768_vm6, %v4497_v18, %v6740_v40  ;;  %v1677_v7 = vrot.slane %v4457_v8, 4  ;;  %v8656_v40 = vunpack.i.h.bf16 %v6793_v9 }
 0x27a   : > { %8652 = vst [vmem:[#allocation7_spill] sm:$0xff] %v6935_v62  ;;  %v1299_v48 = vrot.slane %v4512_v49, 4  ;;  %v1187_v50 = vrot.slane %v4511_v15, 4  ;;  %v1190_v41 = vsel %vm768_vm6, %v4511_v15, %v1189_v17  ;;  %v1302_v44 = vsel %vm768_vm6, %v4512_v49, %v6856_v2 }
 0x27b   : > { %8653 = vst [vmem:[#allocation71_spill] sm:$0xff] %v6938_v33  ;;  %v6961_v26 = vperm.slane %v1190_v41, %v8631_v55  ;;  %v1565_v18 = vrot.slane %v4456_v5, 4  ;;  %v6969_v15 = vperm.slane %v1302_v44, %v8631_v55  ;;  %v8657_v17 = vunpack.i.h.bf16 %v6430_v60 }
 0x27c   : > { %8654 = vst [vmem:[#allocation72_spill] sm:$0xff] %v6941_v31  ;;  %v6945_v63 = vpop.permute.xlu1 %4519  ;;  %v1188_v0 = vsel %vm768_vm6, %v1187_v50, %v8655_v21  ;;  %v1300_v49 = vsel %vm768_vm6, %v1299_v48, %v8656_v40  ;;  %v6975_v41 = vperm.slane %v3794_v23, %v8631_v55  ;;  %v3680_v9 = vsel %vm768_vm6, %v3679_v3, %v8658_v27 }
 0x27d   : > { %v3792_v50 = vsel %vm768_vm6, %v3791_v28, %v8657_v17  ;;  %v6978_v21 = vperm.slane %v1188_v0, %v8631_v55  ;;  %v3682_v48 = vsel %vm768_vm6, %v4496_v16, %v6765_v56  ;;  %v6987_v2 = vperm.slane %v1300_v49, %v8631_v55 }
 0x27e   : > { %v4522_v17 = vunpack.i.h.bf16 %v6945_v63  ;;  %v6993_v0 = vperm.slane %v3792_v50, %v8631_v55  ;;  %v4521_v27 = vunpack.i.l.bf16 %v6945_v63  ;;  %v7000_v16 = vperm.slane %v3680_v9, %v8631_v55 }
 0x27f   : > { %v4515_v39 = vpop.permute.xlu0 %4514  ;;  %v6989_v28 = vpop.permute.xlu2 %4559  ;;  %v7003_v49 = vperm.slane %v3682_v48, %v8631_v55  ;;  %v8662_v63 = vunpack.i.h.bf16 %v6526_v53 }
 0x280   : > { %v4517_v40 = vunpack.i.h.bf16 %v4515_v39  ;;  %8659 = vst [vmem:[#allocation73_spill] sm:$0xff] %v6989_v28  ;;  %v4516_v23 = vunpack.i.l.bf16 %v4515_v39  ;;  %v2363_v39 = vrot.slane %v4522_v17, 4  ;;  %v2251_v24 = vrot.slane %v4521_v27, 4 }
 0x281   : > { %8660 = vst [vmem:[#allocation74_spill] sm:$0xff] %v6993_v0 }
 0x282   : > { %v1675_v60 = vrot.slane %v4517_v40, 4  ;;  %v1678_v3 = vsel %vm768_vm6, %v4517_v40, %v1677_v7  ;;  %8661 = vst [vmem:[#allocation75_spill] sm:$0xff] %v7000_v16  ;;  %v1563_v44 = vrot.slane %v4516_v23, 4  ;;  %v1566_v40 = vsel %vm768_vm6, %v4516_v23, %v1565_v18 }
 0x283   : > { %v7009_v7 = vperm.slane %v1678_v3, %v8631_v55  ;;  %v2364_v18 = vsel %vm768_vm6, %v2363_v39, %v8662_v63  ;;  %v8664_v39 = vunpack.i.l.bf16 %v6526_v53  ;;  %v8678_v3 = vrot.slane %v6859_v29, 4 }
 0x284   : > { %v6997_v56 = vpop.permute.xlu1 %4524  ;;  %v1676_v9 = vsel %vm768_vm6, %v1675_v60, %v4457_v8  ;;  %v1564_v50 = vsel %vm768_vm6, %v1563_v44, %v4456_v5  ;;  %v8663_v8 = vrot.slane %v6824_v12, 4  ;;  %v7028_v60 = vperm.slane %v1566_v40, %v8631_v55 }
 0x285   : > { %v7031_v45 = vperm.slane %v1676_v9, %v8631_v55  ;;  %v2366_v44 = vsel %vm768_vm6, %v4522_v17, %v6772_v32  ;;  %v7037_v31 = vperm.slane %v1564_v50, %v8631_v55  ;;  %v2252_v63 = vsel %vm768_vm6, %v2251_v24, %v8664_v39 }
 0x286   : > { %v1238_v23 = vsel %vm768_vm6, %v6961_v26, %v8663_v8  ;;  %v8665_v40 = vrot.slane %v6827_v54, 4  ;;  %v7050_v19 = vperm.slane %v2364_v18, %v8631_v55  ;;  %v2254_v32 = vsel %vm768_vm6, %v4521_v27, %v6776_v58 }
 0x287   : > { %v4530_v48 = vpop.permute.xlu0 %4529  ;;  %v7043_v8 = vperm.slane %v1238_v23, %v5622_v61  ;;  %v7060_v24 = vperm.slane %v2366_v44, %v8631_v55  ;;  %v8669_v23 = vrot.slane %v6444_v1, 4  ;;  %v4527_v33 = vunpack.i.h.bf16 %v6997_v56 }
 0x288   : > { %v1350_v9 = vsel %vm768_vm6, %v6969_v15, %v8665_v40  ;;  %8666 = vst [vmem:[#allocation76_spill] sm:$0xff] %v7050_v19  ;;  %v4532_v53 = vunpack.i.h.bf16 %v4530_v48  ;;  %v7066_v40 = vpop.permute.xlu2 %4584  ;;  %v4531_v18 = vunpack.i.l.bf16 %v4530_v48  ;;  %v7070_v58 = vperm.slane %v2252_v63, %v8631_v55 }
 0x289   : > { %v7055_v17 = vperm.slane %v1350_v9, %v5622_v61  ;;  %8668 = vst [vmem:[#allocation78_spill] sm:$0xff] %v7060_v24  ;;  %v1262_v39 = vsel %vm768_vm6, %v7043_v8, %v8669_v23  ;;  %v8672_v27 = vrot.slane %v6448_v22, 4  ;;  %v7080_v23 = vperm.slane %v2254_v32, %v8631_v55 }
 0x28a   : > { %8670 = vst [vmem:[#allocation79_spill] sm:$0xff] %v7066_v40  ;;  %v3427_v44 = vrot.slane %v4532_v53, 4  ;;  %v3430_v5 = vsel %vm768_vm6, %v4532_v53, %v6785_v30  ;;  %v4526_v28 = vunpack.i.l.bf16 %v6997_v56  ;;  %v3315_v22 = vrot.slane %v4531_v18, 4 }
 0x28b   : > { %8671 = vst [vmem:[#allocation80_spill] sm:$0xff] %v7070_v58  ;;  %v1374_v9 = vsel %vm768_vm6, %v7055_v17, %v8672_v27  ;;  %v7085_v16 = vperm.slane %v3430_v5, %v8631_v55  ;;  %v3318_v27 = vsel %vm768_vm6, %v4531_v18, %v6789_v42  ;;  %v8675_v32 = vunpack.i.h.bf16 %v6607_v37 }
 0x28c   : > { %v7057_v50 = vpop.permute.xlu1 %4539  ;;  %8673 = vst [vmem:[#allocation81_spill] sm:$0xff] %v7080_v23  ;;  %v4643_v48 = vpack.i.bf16 %v1374_v9, %v1262_v39  ;;  %v3803_v39 = vrot.slane %v4527_v33, 4  ;;  %v7101_v18 = vperm.slane %v3318_v27, %v8631_v55  ;;  %v3691_v53 = vrot.slane %v4526_v28, 4 }
 0x28d   : > { %8667 = vst [vmem:[#allocation77_spill] sm:$0xff] %v7057_v50  ;;  %v3428_v56 = vsel %vm768_vm6, %v3427_v44, %v8675_v32  ;;  %v8677_v5 = vunpack.i.l.bf16 %v6607_v37  ;;  %v1614_v30 = vsel %vm768_vm6, %v7028_v60, %v8678_v3  ;;  %v8680_v9 = vunpack.i.h.bf16 %v6759_v51 }
 0x28e   : > { %8674 = vst [vmem:[#allocation82_spill] sm:$0xff] %v7085_v16  ;;  %4644 = vrot.lane.b32.xlu1 %v4643_v48, %s4924_s20  ;;  %v3806_v48 = vsel %vm768_vm6, %v4527_v33, %v6835_v14  ;;  %v7106_v44 = vperm.slane %v3428_v56, %v8631_v55  ;;  %v3694_v33 = vsel %vm768_vm6, %v4526_v28, %v6839_v4  ;;  %v8681_v37 = vrot.slane %v6862_v47, 4 }
 0x28f   : > { %v4535_v0 = vpop.permute.xlu0 %4534  ;;  %v3316_v63 = vsel %vm768_vm6, %v3315_v22, %v8677_v5  ;;  %v3804_v14 = vsel %vm768_vm6, %v3803_v39, %v8680_v9  ;;  %v7124_v56 = vperm.slane %v1614_v30, %v5622_v61  ;;  %v7131_v5 = vperm.slane %v3806_v48, %v8631_v55 }
 0x290   : > { %8676 = vst [vmem:[#allocation83_spill] sm:$0xff] %v7106_v44  ;;  %v1726_v22 = vsel %vm768_vm6, %v7009_v7, %v8681_v37  ;;  %v8682_v42 = vrot.slane %v6884_v57, 4  ;;  %v8683_v4 = vrot.slane %v6890_v13, 4  ;;  %v8684_v30 = vunpack.i.l.bf16 %v6759_v51 }
 0x291   : > { %v7134_v3 = vperm.slane %v1726_v22, %v5622_v61  ;;  %v8685_v48 = vrot.slane %v6458_v34, 4  ;;  %v7160_v40 = vperm.slane %v3804_v14, %v8631_v55  ;;  %v7163_v51 = vperm.slane %v3694_v33, %v8631_v55 }
 0x292   : > { %v2302_v39 = vsel %vm768_vm6, %v7080_v23, %v8682_v42  ;;  %v2414_v28 = vsel %vm768_vm6, %v7060_v24, %v8683_v4  ;;  %v3692_v9 = vsel %vm768_vm6, %v3691_v53, %v8684_v30  ;;  %v7157_v42 = vpop.permute.xlu2 %4604  ;;  %v8688_v53 = vld [vmem:[#allocation58_spill] sm:$0xff]  ;;  %v8691_v14 = vrot.slane %v6578_v36, 4 }
 0x293   : > { %v1638_v37 = vsel %vm768_vm6, %v7124_v56, %v8685_v48  ;;  %v7152_v22 = vperm.slane %v2302_v39, %v5622_v61  ;;  %v7155_v32 = vperm.slane %v2414_v28, %v5622_v61  ;;  %8686 = vst [vmem:[#allocation85_spill] sm:$0xff] %v7157_v42  ;;  %v8689_v4 = vrot.slane %v8688_v53, 4 }
 0x294   : > { %v7116_v27 = vpop.permute.xlu1 %4549  ;;  %8687 = vst [vmem:[#allocation86_spill] sm:$0xff] %v7160_v40  ;;  %v4537_v48 = vunpack.i.h.bf16 %v4535_v0  ;;  %v8690_v28 = vrot.slane %v6564_v25, 4  ;;  %v4536_v13 = vunpack.i.l.bf16 %v4535_v0  ;;  %v7180_v23 = vperm.slane %v3316_v63, %v8631_v55 }
 0x295   : > { %8679 = vst [vmem:[#allocation84_spill] sm:$0xff] %v7116_v27  ;;  %v1750_v30 = vsel %vm768_vm6, %v7134_v3, %v8689_v4  ;;  %v2438_v33 = vsel %vm768_vm6, %v7155_v32, %v8691_v14  ;;  %v7183_v4 = vperm.slane %v3692_v9, %v8631_v55  ;;  %v8697_v14 = vrot.slane %v6975_v41, 4 }
 0x296   : > { %v4648_v39 = vpack.i.bf16 %v1750_v30, %v1638_v37  ;;  %v2326_v24 = vsel %vm768_vm6, %v7152_v22, %v8690_v28  ;;  %8692 = vst [vmem:[#allocation87_spill] sm:$0xff] %v7180_v23  ;;  %v2742_v37 = vsel %vm768_vm6, %v4537_v48, %v6797_v20  ;;  %v2630_v0 = vsel %vm768_vm6, %v4536_v13, %v6818_v6 }
 0x297   : > { %v7169_v44 = vpop.permute.xlu0 %4554  ;;  %8693 = vst [vmem:[#allocation88_spill] sm:$0xff] %v7183_v4  ;;  %v4653_v57 = vpack.i.bf16 %v2438_v33, %v2326_v24  ;;  %v7191_v53 = vperm.slane %v2742_v37, %v8631_v55  ;;  %v2739_v63 = vrot.slane %v4537_v48, 4  ;;  %v7197_v24 = vperm.slane %v2630_v0, %v8631_v55 }
 0x298   : > { %4649 = vrot.lane.b32.xlu1 %v4648_v39, %s4924_s20  ;;  %v8696_v20 = vrot.slane %v7003_v49, 4  ;;  %v3854_v39 = vsel %vm768_vm6, %v7131_v5, %v8697_v14  ;;  %v2627_v48 = vrot.slane %v4536_v13, 4  ;;  %v8698_v37 = vrot.slane %v6901_v52, 4 }
 0x299   : > { %8694 = vst [vmem:[#allocation89_spill] sm:$0xff] %v7191_v53  ;;  %4654 = vrot.lane.b32.xlu2 %v4653_v57, %s4924_s20  ;;  %v8700_v28 = vrot.slane %v6898_v11, 4  ;;  %v7230_v57 = vperm.slane %v3854_v39, %v5622_v61  ;;  %v8703_v30 = vrot.slane %v6935_v62, 4 }
 0x29a   : > { %8695 = vst [vmem:[#allocation90_spill] sm:$0xff] %v7197_v24  ;;  %v3742_v9 = vsel %vm768_vm6, %v7163_v51, %v8696_v20  ;;  %v7215_v0 = vsel %vm768_vm6, %v7191_v53, %v8698_v37  ;;  %v8702_v37 = vrot.slane %v6929_v38, 4  ;;  %v4615_v23 = vpop.permute.xlu2 %4614 }
 0x29b   : > { %8699 = vst [vmem:[#allocation91_spill] sm:$0xff] %v7215_v0  ;;  %v7223_v14 = vsel %vm768_vm6, %v7197_v24, %v8700_v28  ;;  %v7226_v6 = vperm.slane %v3742_v9, %v5622_v61  ;;  %v3478_v0 = vsel %vm768_vm6, %v7085_v16, %v8703_v30  ;;  %v8704_v28 = vunpack.i.h.bf16 %v6686_v10 }
 0x29c   : > { %v7207_v33 = vpop.permute.xlu1 %4569  ;;  %8701 = vst [vmem:[#allocation92_spill] sm:$0xff] %v7223_v14  ;;  %v3366_v20 = vsel %vm768_vm6, %v7101_v18, %v8702_v37  ;;  %v8705_v14 = vrot.slane %v6506_v46, 4  ;;  %v7251_v52 = vperm.slane %v3478_v0, %v5622_v61  ;;  %v8706_v37 = vunpack.i.l.bf16 %v6686_v10  ;;  %v8710_v10 = vld [vmem:[#allocation14_spill] sm:$0xff] }
 0x29d   : > { %v2740_v9 = vsel %vm768_vm6, %v2739_v63, %v8704_v28  ;;  %v7248_v13 = vperm.slane %v3366_v20, %v5622_v61  ;;  %v8707_v30 = vrot.slane %v6510_v35, 4  ;;  %v8708_v28 = vrot.slane %v6881_v43, 4 }
 0x29e   : > { %v3766_v39 = vsel %vm768_vm6, %v7226_v6, %v8705_v14  ;;  %v2628_v11 = vsel %vm768_vm6, %v2627_v48, %v8706_v37  ;;  %v8709_v20 = vrot.slane %v6887_v59, 4  ;;  %v8711_v16 = vrot.slane %v8710_v10, 4  ;;  %v8712_v37 = vld [vmem:[#allocation15_spill] sm:$0xff] }
 0x29f   : > { %v3878_v63 = vsel %vm768_vm6, %v7230_v57, %v8707_v30  ;;  %v2290_v14 = vsel %vm768_vm6, %v7070_v58, %v8708_v28  ;;  %v8713_v62 = vrot.slane %v8712_v37, 4  ;;  %v7279_v28 = vpop.permute.xlu0 %4564 }
 0x2a0   : > { %v2402_v0 = vsel %vm768_vm6, %v7050_v19, %v8709_v20  ;;  %v4658_v42 = vpack.i.bf16 %v3878_v63, %v3766_v39  ;;  %v3390_v48 = vsel %vm768_vm6, %v7248_v13, %v8711_v16  ;;  %v7277_v43 = vperm.slane %v2290_v14, %v5622_v61  ;;  %v8718_v14 = vld [vmem:[#allocation20_spill] sm:$0xff] }
 0x2a1   : > { %v3502_v30 = vsel %vm768_vm6, %v7251_v52, %v8713_v62  ;;  %v7284_v63 = vperm.slane %v2402_v0, %v5622_v61  ;;  %v7287_v16 = vperm.slane %v2740_v9, %v8631_v55  ;;  %v7291_v62 = vperm.slane %v2628_v11, %v8631_v55  ;;  %v8720_v9 = vld [vmem:[#allocation23_spill] sm:$0xff] }
 0x2a2   : > { %8714 = vst [vmem:[#allocation14_spill] sm:$0xff] %v7277_v43  ;;  %v4663_v39 = vpack.i.bf16 %v3502_v30, %v3390_v48  ;;  %4659 = vrot.lane.b32.xlu0 %v4658_v42, %s4924_s20  ;;  %v8719_v58 = vrot.slane %v8718_v14, 4  ;;  %v8721_v48 = vrot.slane %v8720_v9, 4  ;;  %v4617_v55 = vunpack.i.h.bf16 %v4615_v23  ;;  %v8722_v42 = vld [vmem:[#allocation40_spill] sm:$0xff] }
 0x2a3   : > { %8715 = vst [vmem:[#allocation15_spill] sm:$0xff] %v7284_v63  ;;  %v8723_v19 = vrot.slane %v8722_v42, 4 }
 0x2a4   : > { %8716 = vst [vmem:[#allocation93_spill] sm:$0xff] %v7287_v16  ;;  %v2318_v59 = vsel %vm768_vm6, %v7277_v43, %v8719_v58  ;;  %v7298_v20 = vpop.permute.xlu1 %4579  ;;  %4664 = vrot.lane.b32.xlu2 %v4663_v39, %s4924_s20  ;;  %v2430_v30 = vsel %vm768_vm6, %v7284_v63, %v8721_v48  ;;  %v8724_v58 = vld [vmem:[#allocation41_spill] sm:$0xff]  ;;  %v8726_v39 = vrot.slane %v6961_v26, 4 }
 0x2a5   : > { %8717 = vst [vmem:[#allocation94_spill] sm:$0xff] %v7291_v62  ;;  %v4698_v11 = vpack.i.bf16 %v2430_v30, %v2318_v59  ;;  %v1226_v14 = vsel %vm768_vm6, %v6978_v21, %v8723_v19  ;;  %v8725_v53 = vrot.slane %v8724_v58, 4  ;;  %v8727_v19 = vrot.slane %v6969_v15, 4  ;;  %v8730_v15 = vld [vmem:[#allocation59_spill] sm:$0xff] }
 0x2a6   : > { %v1236_v9 = vsel %vm768_vm6, %v8726_v39, %v6824_v12  ;;  %v7319_v48 = vperm.slane %v1226_v14, %v5622_v61  ;;  %v2323_v12 = vrot.slane %v7152_v22, 4  ;;  %v2435_v14 = vrot.slane %v7155_v32, 4  ;;  %v8728_v39 = vld [vmem:[#allocation68_spill] sm:$0xff] }
 0x2a7   : > { %v1338_v0 = vsel %vm768_vm6, %v6987_v2, %v8725_v53  ;;  %v7325_v30 = vperm.slane %v1236_v9, %v5622_v61  ;;  %v1348_v24 = vsel %vm768_vm6, %v8727_v19, %v6827_v54  ;;  %4699 = vrot.lane.b32.xlu1 %v4698_v11, %s4926_s8  ;;  %v4616_v53 = vunpack.i.l.bf16 %v4615_v23  ;;  %v8732_v23 = vld [vmem:[#allocation66_spill] sm:$0xff]  ;;  %v8734_v19 = vld [vmem:[#allocation63_spill] sm:$0xff] }
 0x2a8   : > { %v7322_v59 = vperm.slane %v1338_v0, %v5622_v61  ;;  %v7333_v26 = vperm.slane %v1348_v24, %v5622_v61  ;;  %v8729_v9 = vrot.slane %v8728_v39, 4  ;;  %v8731_v43 = vrot.slane %v8730_v15, 4  ;;  %v7360_v39 = vpop.permute.xlu2 %4624 }
 0x2a9   : > { %v8733_v11 = vrot.slane %v8732_v23, 4  ;;  %v8735_v32 = vrot.slane %v8734_v19, 4  ;;  %v2324_v16 = vsel %vm768_vm6, %v2323_v12, %v6564_v25  ;;  %v1259_v25 = vrot.slane %v7043_v8, 4  ;;  %v7373_v12 = vpop.permute.xlu0 %4574 }
 0x2aa   : > { %v1254_v63 = vsel %vm768_vm6, %v7319_v48, %v8729_v9  ;;  %v1366_v54 = vsel %vm768_vm6, %v7322_v59, %v8731_v43  ;;  %v2436_v9 = vsel %vm768_vm6, %v2435_v14, %v6578_v36  ;;  %v1371_v36 = vrot.slane %v7055_v17, 4 }
 0x2ab   : > { %v1258_v24 = vsel %vm768_vm6, %v7325_v30, %v8733_v11  ;;  %v4668_v22 = vpack.i.bf16 %v1366_v54, %v1254_v63  ;;  %v1370_v0 = vsel %vm768_vm6, %v7333_v26, %v8735_v32  ;;  %v4708_v62 = vpack.i.bf16 %v2436_v9, %v2324_v16  ;;  %v8736_v63 = vld [vmem:[#allocation36_spill] sm:$0xff]  ;;  %v8737_v11 = vld [vmem:[#allocation18_spill] sm:$0xff] }
 0x2ac   : > { %v4673_v15 = vpack.i.bf16 %v1370_v0, %v1258_v24  ;;  %v7364_v54 = vsel %vm1048_vm9, %v8736_v63, %v4617_v55  ;;  %v7368_v32 = vsel %vm1048_vm9, %v8737_v11, %v4616_v53  ;;  %v7375_v14 = vpop.permute.xlu1 %4589  ;;  %v8738_v16 = vrot.slane %v7028_v60, 4  ;;  %v8745_v63 = vld [vmem:[#allocation62_spill] sm:$0xff] }
 0x2ad   : > { %4669 = vrot.lane.b32.xlu0 %v4668_v22, %s4926_s8  ;;  %v8739_v53 = vrot.slane %v7009_v7, 4  ;;  %v8740_v8 = vrot.slane %v7163_v51, 4  ;;  %v8741_v24 = vrot.slane %v7131_v5, 4  ;;  %v1260_v60 = vsel %vm768_vm6, %v1259_v25, %v6444_v1  ;;  %v8742_v22 = vld [vmem:[#allocation65_spill] sm:$0xff] }
 0x2ae   : > { %4674 = vrot.lane.b32.xlu2 %v4673_v15, %s4925_s21  ;;  %v1612_v55 = vsel %vm768_vm6, %v8738_v16, %v6859_v29  ;;  %v1372_v29 = vsel %vm768_vm6, %v1371_v36, %v8742_v22  ;;  %v4626_v1 = vunpack.i.l.bf16 %v7360_v39  ;;  %v4572_v5 = vunpack.i.h.bf16 %v7207_v33  ;;  %v8747_v36 = vld [vmem:[#allocation57_spill] sm:$0xff] }
 0x2af   : > { %v1724_v0 = vsel %vm768_vm6, %v8739_v53, %v6862_v47  ;;  %v3740_v17 = vsel %vm768_vm6, %v8740_v8, %v7003_v49  ;;  %v3852_v15 = vsel %vm768_vm6, %v8741_v24, %v6975_v41  ;;  %v7399_v7 = vperm.slane %v1612_v55, %v5622_v61  ;;  %4709 = vrot.lane.b32.xlu1 %v4708_v62, %s4927_s9  ;;  %v8749_v8 = vld [vmem:[#allocation52_spill] sm:$0xff]  ;;  %v8751_v24 = vld [vmem:[#allocation13_spill] sm:$0xff] }
 0x2b0   : > { %v7402_v47 = vperm.slane %v1724_v0, %v5622_v61  ;;  %v4678_v49 = vpack.i.bf16 %v1372_v29, %v1260_v60  ;;  %v7406_v9 = vperm.slane %v3740_v17, %v5622_v61  ;;  %v7409_v41 = vperm.slane %v3852_v15, %v5622_v61  ;;  %v8753_v29 = vld [vmem:[#allocation17_spill] sm:$0xff] }
 0x2b1   : > { %v8746_v11 = vrot.slane %v8745_v63, 4  ;;  %v8748_v16 = vrot.slane %v8747_v36, 4  ;;  %v4571_v53 = vunpack.i.l.bf16 %v7207_v33  ;;  %v8750_v17 = vrot.slane %v8749_v8, 4 }
 0x2b2   : > { %8743 = vst [vmem:[#allocation40_spill] sm:$0xff] %v7406_v9  ;;  %v8752_v15 = vrot.slane %v8751_v24, 4  ;;  %v4582_v27 = vunpack.i.h.bf16 %v7298_v20 }
 0x2b3   : > { %8744 = vst [vmem:[#allocation41_spill] sm:$0xff] %v7409_v41  ;;  %v1634_v25 = vsel %vm768_vm6, %v7399_v7, %v8746_v11  ;;  %v1746_v55 = vsel %vm768_vm6, %v7402_v47, %v8748_v16  ;;  %v3762_v62 = vsel %vm768_vm6, %v7406_v9, %v8750_v17  ;;  %v8754_v11 = vrot.slane %v8753_v29, 4  ;;  %v8755_v16 = vld [vmem:[#allocation16_spill] sm:$0xff]  ;;  %v8766_v9 = vld [vmem:[#allocation55_spill] sm:$0xff] }
 0x2b4   : > { %v4688_v0 = vpack.i.bf16 %v1746_v55, %v1634_v25  ;;  %v3874_v60 = vsel %vm768_vm6, %v7409_v41, %v8752_v15  ;;  %v8756_v50 = vrot.slane %v8755_v16, 4  ;;  %v8757_v25 = vld [vmem:[#allocation75_spill] sm:$0xff]  ;;  %v7469_v41 = vpop.permute.xlu1 %4594 }
 0x2b5   : > { %v4718_v22 = vpack.i.bf16 %v3874_v60, %v3762_v62  ;;  %v1602_v43 = vsel %vm768_vm6, %v7037_v31, %v8754_v11  ;;  %v8758_v55 = vrot.slane %v8757_v25, 4  ;;  %v8759_v60 = vld [vmem:[#allocation74_spill] sm:$0xff]  ;;  %4679 = vrot.lane.b32.xlu0 %v4678_v49, %s4927_s9  ;;  %8763 = vst [vmem:[#allocation66_spill] sm:$0xff] %v7469_v41  ;;  %v8764_v49 = vld [vmem:[#allocation56_spill] sm:$0xff]  ;;  %v8772_v41 = vld [vmem:[#allocation67_spill] sm:$0xff] }
 0x2b6   : > { %v1714_v33 = vsel %vm768_vm6, %v7031_v45, %v8756_v50  ;;  %v7444_v51 = vperm.slane %v1602_v43, %v5622_v61  ;;  %v8760_v11 = vrot.slane %v8759_v60, 4  ;;  %v4577_v50 = vunpack.i.h.bf16 %v7373_v12  ;;  %4689 = vrot.lane.b32.xlu2 %v4688_v0, %s4925_s21  ;;  %v8770_v60 = vld [vmem:[#allocation53_spill] sm:$0xff] }
 0x2b7   : > { %v3730_v17 = vsel %vm768_vm6, %v7183_v4, %v8758_v55  ;;  %v7447_v62 = vperm.slane %v1714_v33, %v5622_v61  ;;  %v8761_v43 = vrot.slane %v6978_v21, 4  ;;  %v4576_v0 = vunpack.i.l.bf16 %v7373_v12  ;;  %4719 = vrot.lane.b32.xlu1 %v4718_v22, %s4925_s21 }
 0x2b8   : > { %v7450_v15 = vperm.slane %v3730_v17, %v5622_v61  ;;  %v3842_v24 = vsel %vm768_vm6, %v7160_v40, %v8760_v11  ;;  %v8762_v17 = vrot.slane %v6987_v2, 4  ;;  %v8765_v11 = vrot.slane %v8764_v49, 4 }
 0x2b9   : > { %v7459_v55 = vperm.slane %v3842_v24, %v5622_v61  ;;  %v1224_v33 = vsel %vm768_vm6, %v8761_v43, %v8722_v42  ;;  %v8767_v40 = vrot.slane %v8766_v9, 4  ;;  %v8768_v42 = vld [vmem:[#allocation54_spill] sm:$0xff]  ;;  %v8771_v4 = vrot.slane %v8770_v60, 4 }
 0x2ba   : > { %v1336_v8 = vsel %vm768_vm6, %v8762_v17, %v8724_v58  ;;  %v1630_v24 = vsel %vm768_vm6, %v7444_v51, %v8765_v11  ;;  %v8769_v43 = vrot.slane %v8768_v42, 4  ;;  %v7485_v58 = vperm.slane %v1224_v33, %v5622_v61 }
 0x2bb   : > { %v1742_v21 = vsel %vm768_vm6, %v7447_v62, %v8767_v40  ;;  %v3870_v11 = vsel %vm768_vm6, %v7459_v55, %v8771_v4  ;;  %v7493_v25 = vperm.slane %v1336_v8, %v5622_v61  ;;  %v4620_v40 = vpop.permute.xlu0 %4619  ;;  %v4581_v9 = vunpack.i.l.bf16 %v7298_v20 }
 0x2bc   : > { %v3758_v2 = vsel %vm768_vm6, %v7450_v15, %v8769_v43  ;;  %v4683_v17 = vpack.i.bf16 %v1742_v21, %v1630_v24  ;;  %v8773_v33 = vrot.slane %v8772_v41, 4  ;;  %v8774_v24 = vld [vmem:[#allocation12_spill] sm:$0xff]  ;;  %v4622_v8 = vunpack.i.h.bf16 %v4620_v40 }
 0x2bd   : > { %v4713_v43 = vpack.i.bf16 %v3870_v11, %v3758_v2  ;;  %v8775_v21 = vrot.slane %v8774_v24, 4  ;;  %v4621_v20 = vunpack.i.l.bf16 %v4620_v40  ;;  %v1635_v11 = vrot.slane %v7124_v56, 4 }
 0x2be   : > { %v1250_v12 = vsel %vm768_vm6, %v7485_v58, %v8773_v33  ;;  %v1747_v33 = vrot.slane %v7134_v3, 4  ;;  %v2127_v24 = vsel %vm1050_vm10, %v7364_v54, %v4622_v8  ;;  %v3875_v41 = vrot.slane %v7230_v57, 4  ;;  %4684 = vrot.lane.b32.xlu0 %v4683_v17, %s4926_s8  ;;  %v8776_v3 = vld [vmem:[#allocation58_spill] sm:$0xff] }
 0x2bf   : > { %v1362_v4 = vsel %vm768_vm6, %v7493_v25, %v8775_v21  ;;  %v2120_v22 = vsel %vm1050_vm10, %v7368_v32, %v4621_v20  ;;  %v3763_v21 = vrot.slane %v7226_v6, 4  ;;  %v1636_v56 = vsel %vm768_vm6, %v1635_v11, %v6458_v34  ;;  %v7521_v32 = vpop.permute.xlu1 %4599  ;;  %4714 = vrot.lane.b32.xlu2 %v4713_v43, %s4926_s8 }
 0x2c0   : > { %v4748_v2 = vpack.i.bf16 %v1362_v4, %v1250_v12  ;;  %v2121_v40 = vsel %vm1052_vm11, %v2120_v22, %v4571_v53  ;;  %v2128_v12 = vsel %vm1052_vm11, %v2127_v24, %v4572_v5  ;;  %v1748_v4 = vsel %vm768_vm6, %v1747_v33, %v8776_v3 }
 0x2c1   : > { %v2122_v6 = vsel %vm1054_vm12, %v2121_v40, %v4626_v1  ;;  %v8777_v57 = vunpack.i.h.bf16 %v7360_v39  ;;  %v4693_v17 = vpack.i.bf16 %v1748_v4, %v1636_v56  ;;  %v3764_v5 = vsel %vm768_vm6, %v3763_v21, %v6506_v46  ;;  %v8778_v46 = vld [vmem:[#allocation70_spill] sm:$0xff] }
 0x2c2   : > { %v2123_v53 = vsel %vm1056_vm13, %v2122_v6, %v4576_v0  ;;  %v3876_v24 = vsel %vm768_vm6, %v3875_v41, %v6510_v35  ;;  %v1255_v8 = vrot.slane %v7325_v30, 4  ;;  %v1367_v20 = vrot.slane %v7333_v26, 4  ;;  %4749 = vrot.lane.b32.xlu1 %v4748_v2, %s4929_s16  ;;  %v8783_v56 = vld [vmem:[#allocation82_spill] sm:$0xff] }
 0x2c3   : > { %v2129_v54 = vsel %vm1054_vm12, %v2128_v12, %v8777_v57  ;;  %v2124_v43 = vsel %vm1058_vm14, %v2123_v53, %v4581_v9  ;;  %v4723_v39 = vpack.i.bf16 %v3876_v24, %v3764_v5  ;;  %v4567_v11 = vunpack.i.h.bf16 %v7279_v28  ;;  %v8782_v12 = vld [vmem:[#allocation7_spill] sm:$0xff]  ;;  %v8786_v57 = vld [vmem:[#allocation81_spill] sm:$0xff]  ;;  %v8789_v53 = vld [vmem:[#allocation78_spill] sm:$0xff]  ;;  %v7576_v24 = vpop.permute.xlu0 %4634 }
 0x2c4   : > { %v2130_v34 = vsel %vm1056_vm13, %v2129_v54, %v4577_v50  ;;  %v8779_v0 = vunpack.i.l.bf16 %v8778_v46  ;;  %v8780_v33 = vunpack.i.h.bf16 %v8778_v46  ;;  %v1256_v30 = vsel %vm768_vm6, %v1255_v8, %v8732_v23 }
 0x2c5   : > { %v2131_v1 = vsel %vm1058_vm14, %v2130_v34, %v4582_v27  ;;  %v4566_v27 = vunpack.i.l.bf16 %v7279_v28  ;;  %v1368_v41 = vsel %vm768_vm6, %v1367_v20, %v8734_v19  ;;  %v4591_v2 = vunpack.i.l.bf16 %v7375_v14  ;;  %v8785_v19 = vld [vmem:[#allocation43_spill] sm:$0xff]  ;;  %v8835_v28 = vld [vmem:[#allocation93_spill] sm:$0xff] }
 0x2c6   : > { %v2125_v50 = vsel %vm1060_vm15, %v2124_v43, %v8779_v0  ;;  %v2132_v35 = vsel %vm1060_vm15, %v2131_v1, %v8780_v33  ;;  %v4758_v22 = vpack.i.bf16 %v1368_v41, %v1256_v30  ;;  %v8781_v21 = vrot.slane %v7101_v18, 4  ;;  %v8788_v18 = vld [vmem:[#allocation45_spill] sm:$0xff]  ;;  %4694 = vrot.lane.b32.xlu0 %v4693_v17, %s4927_s9  ;;  %v8795_v30 = vld [vmem:[#allocation26_spill] sm:$0xff]  ;;  %v8797_v41 = vld [vmem:[#allocation8_spill] sm:$0xff] }
 0x2c7   : > { %v2133_v9 = vpack.c.bf16 %v2132_v35, %v2125_v50  ;;  %v8784_v3 = vrot.slane %v8783_v56, 4  ;;  %v8787_v54 = vrot.slane %v8786_v57, 4  ;;  %v8791_v1 = vrot.slane %v7037_v31, 4  ;;  %v4610_v50 = vpop.permute.xlu1 %4609  ;;  %4724 = vrot.lane.b32.xlu2 %v4723_v39, %s4927_s9  ;;  %v8793_v17 = vld [vmem:[#allocation25_spill] sm:$0xff] }
 0x2c8   : > { %v3364_v40 = vsel %vm768_vm6, %v8781_v21, %v6929_v38  ;;  %v8790_v38 = vrot.slane %v8789_v53, 4  ;;  %v8792_v46 = vrot.slane %v7031_v45, 4  ;;  %v8794_v33 = vrot.slane %v8793_v17, 4  ;;  %v8801_v57 = vld [vmem:[#allocation21_spill] sm:$0xff] }
 0x2c9   : > { %v3476_v23 = vsel %vm768_vm6, %v8784_v3, %v8782_v12  ;;  %2134 = vst [vmem:[#allocation3 + $0x18] sm:$0xff] %v2133_v9  ;;  %v7562_v4 = vperm.slane %v3364_v40, %v5622_v61  ;;  %v2300_v5 = vsel %vm768_vm6, %v8787_v54, %v8785_v19  ;;  %v1600_v20 = vsel %vm768_vm6, %v8791_v1, %v8753_v29  ;;  %v8799_v40 = vld [vmem:[#allocation29_spill] sm:$0xff] }
 0x2ca   : > { %v7565_v6 = vperm.slane %v3476_v23, %v5622_v61  ;;  %v2412_v34 = vsel %vm768_vm6, %v8790_v38, %v8788_v18  ;;  %v7579_v8 = vperm.slane %v2300_v5, %v5622_v61  ;;  %v1712_v0 = vsel %vm768_vm6, %v8792_v46, %v8755_v16  ;;  %v8803_v18 = vld [vmem:[#allocation22_spill] sm:$0xff]  ;;  %4759 = vrot.lane.b32.xlu1 %v4758_v22, %s4930_s17 }
 0x2cb   : > { %v7582_v43 = vperm.slane %v2412_v34, %v5622_v61  ;;  %v3386_v35 = vsel %vm768_vm6, %v7562_v4, %v8794_v33  ;;  %v8796_v9 = vrot.slane %v8795_v30, 4  ;;  %v7602_v29 = vperm.slane %v1600_v20, %v5622_v61  ;;  %v8805_v20 = vld [vmem:[#allocation35_spill] sm:$0xff]  ;;  %v8806_v33 = vld [vmem:[#allocation85_spill] sm:$0xff] }
 0x2cc   : > { %v7605_v45 = vperm.slane %v1712_v0, %v5622_v61  ;;  %v8798_v21 = vrot.slane %v8797_v41, 4  ;;  %v8800_v12 = vrot.slane %v8799_v40, 4  ;;  %v4602_v3 = vunpack.i.h.bf16 %v7521_v32 }
 0x2cd   : > { %v3498_v31 = vsel %vm768_vm6, %v7565_v6, %v8796_v9  ;;  %v4637_v23 = vunpack.i.h.bf16 %v7576_v24  ;;  %v8802_v54 = vrot.slane %v8801_v57, 4  ;;  %v8804_v53 = vrot.slane %v8803_v18, 4 }
 0x2ce   : > { %v4733_v16 = vpack.i.bf16 %v3498_v31, %v3386_v35  ;;  %v2322_v39 = vsel %vm768_vm6, %v7579_v8, %v8798_v21  ;;  %v2434_v56 = vsel %vm768_vm6, %v7582_v43, %v8800_v12  ;;  %v4636_v34 = vunpack.i.l.bf16 %v7576_v24 }
 0x2cf   : > { %v4703_v19 = vpack.i.bf16 %v2434_v56, %v2322_v39  ;;  %v1626_v5 = vsel %vm768_vm6, %v7602_v29, %v8802_v54  ;;  %v1738_v38 = vsel %vm768_vm6, %v7605_v45, %v8804_v53  ;;  %v1062_v46 = vsel %vm1048_vm9, %v8805_v20, %v4602_v3  ;;  %v8808_v39 = vld [vmem:[#allocation71_spill] sm:$0xff]  ;;  %v8811_v54 = vld [vmem:[#allocation37_spill] sm:$0xff] }
 0x2d0   : > { %v4763_v1 = vpack.i.bf16 %v1738_v38, %v1626_v5  ;;  %v4601_v0 = vunpack.i.l.bf16 %v7521_v32  ;;  %v8807_v35 = vunpack.i.h.bf16 %v8806_v33  ;;  %v3387_v31 = vrot.slane %v7248_v13, 4  ;;  %v8810_v56 = vld [vmem:[#allocation87_spill] sm:$0xff]  ;;  %v8812_v32 = vld [vmem:[#allocation72_spill] sm:$0xff]  ;;  %4734 = vrot.lane.b32.xlu2 %v4733_v16, %s4925_s21 }
 0x2d1   : > { %v3499_v21 = vrot.slane %v7251_v52, 4  ;;  %v8809_v12 = vrot.slane %v8808_v39, 4  ;;  %v8813_v53 = vrot.slane %v8812_v32, 4  ;;  %v8814_v38 = vld [vmem:[#allocation83_spill] sm:$0xff]  ;;  %v1631_v13 = vrot.slane %v7399_v7, 4  ;;  %4704 = vrot.lane.b32.xlu0 %v4703_v19, %s4925_s21 }
 0x2d2   : > { %v1063_v9 = vsel %vm1050_vm10, %v1062_v46, %v8807_v35  ;;  %v1049_v5 = vsel %vm1048_vm9, %v8811_v54, %v4601_v0  ;;  %v8815_v52 = vunpack.i.l.bf16 %v8806_v33  ;;  %v3388_v35 = vsel %vm768_vm6, %v3387_v31, %v8710_v10  ;;  %v8816_v54 = vld [vmem:[#allocation30_spill] sm:$0xff]  ;;  %v4630_v10 = vpop.permute.xlu1 %4629  ;;  %4764 = vrot.lane.b32.xlu1 %v4763_v1, %s4929_s16  ;;  %v8829_v1 = vld [vmem:[#allocation59_spill] sm:$0xff] }
 0x2d3   : > { %v3354_v22 = vsel %vm768_vm6, %v8810_v56, %v8809_v12  ;;  %v3466_v20 = vsel %vm768_vm6, %v8814_v38, %v8813_v53  ;;  %v3500_v0 = vsel %vm768_vm6, %v3499_v21, %v8712_v37  ;;  %v8817_v53 = vrot.slane %v8816_v54, 4  ;;  %v8818_v37 = vld [vmem:[#allocation9_spill] sm:$0xff] }
 0x2d4   : > { %v7642_v3 = vperm.slane %v3354_v22, %v5622_v61  ;;  %v1051_v46 = vsel %vm1050_vm10, %v1049_v5, %v8815_v52  ;;  %v7657_v12 = vperm.slane %v3466_v20, %v5622_v61  ;;  %v4738_v22 = vpack.i.bf16 %v3500_v0, %v3388_v35 }
 0x2d5   : > { %v1632_v33 = vsel %vm768_vm6, %v1631_v13, %v8745_v63  ;;  %v1743_v5 = vrot.slane %v7402_v47, 4  ;;  %v8819_v31 = vrot.slane %v8818_v37, 4  ;;  %v4612_v19 = vunpack.i.h.bf16 %v4610_v50 }
 0x2d6   : > { %v3382_v7 = vsel %vm768_vm6, %v7642_v3, %v8817_v53  ;;  %v4611_v20 = vunpack.i.l.bf16 %v4610_v50  ;;  %v8820_v52 = vunpack.i.l.bf16 %v7169_v44  ;;  %v8821_v47 = vunpack.i.h.bf16 %v7169_v44 }
 0x2d7   : > { %v3494_v21 = vsel %vm768_vm6, %v7657_v12, %v8819_v31  ;;  %v1744_v63 = vsel %vm768_vm6, %v1743_v5, %v8747_v36  ;;  %v1251_v16 = vrot.slane %v7319_v48, 4  ;;  %v1363_v50 = vrot.slane %v7322_v59, 4 }
 0x2d8   : > { %v1053_v35 = vsel %vm1052_vm11, %v1051_v46, %v8820_v52  ;;  %v4728_v0 = vpack.i.bf16 %v3494_v21, %v3382_v7  ;;  %v1064_v13 = vsel %vm1052_vm11, %v1063_v9, %v8821_v47  ;;  %v4773_v53 = vpack.i.bf16 %v1744_v63, %v1632_v33  ;;  %v8822_v46 = vld [vmem:[#allocation73_spill] sm:$0xff]  ;;  %v8825_v9 = vld [vmem:[#allocation68_spill] sm:$0xff]  ;;  %4739 = vrot.lane.b32.xlu2 %v4738_v22, %s4927_s9 }
 0x2d9   : > { %v1055_v26 = vsel %vm1054_vm12, %v1053_v35, %v4611_v20  ;;  %v1065_v31 = vsel %vm1054_vm12, %v1064_v13, %v4612_v19  ;;  %v8823_v7 = vunpack.i.l.bf16 %v8822_v46  ;;  %v8824_v36 = vunpack.i.h.bf16 %v8822_v46  ;;  %v8826_v33 = vld [vmem:[#allocation48_spill] sm:$0xff]  ;;  %v8828_v20 = vld [vmem:[#allocation94_spill] sm:$0xff]  ;;  %v8830_v63 = vld [vmem:[#allocation77_spill] sm:$0xff] }
 0x2da   : > { %v1252_v48 = vsel %vm768_vm6, %v1251_v16, %v8825_v9  ;;  %v8827_v5 = vrot.slane %v8826_v33, 4  ;;  %v1364_v52 = vsel %vm768_vm6, %v1363_v50, %v8829_v1  ;;  %v8831_v47 = vunpack.i.l.bf16 %v8830_v63  ;;  %4729 = vrot.lane.b32.xlu0 %v4728_v0, %s4926_s8  ;;  %v8838_v1 = vld [vmem:[#allocation27_spill] sm:$0xff]  ;;  %4774 = vrot.lane.b32.xlu1 %v4773_v53, %s4930_s17 }
 0x2db   : > { %v1057_v21 = vsel %vm1056_vm13, %v1055_v26, %v8823_v7  ;;  %v1066_v44 = vsel %vm1056_vm13, %v1065_v31, %v8824_v36  ;;  %v8832_v16 = vunpack.i.h.bf16 %v8830_v63  ;;  %v4753_v46 = vpack.i.bf16 %v1364_v52, %v1252_v48  ;;  %v8836_v36 = vld [vmem:[#allocation10_spill] sm:$0xff]  ;;  %v8845_v53 = vld [vmem:[#allocation79_spill] sm:$0xff] }
 0x2dc   : > { %v2666_v19 = vsel %vm768_vm6, %v8828_v20, %v8827_v5  ;;  %v1059_v59 = vsel %vm1058_vm14, %v1057_v21, %v4566_v27  ;;  %v1067_v26 = vsel %vm1058_vm14, %v1066_v44, %v4567_v11  ;;  %v8833_v27 = vld [vmem:[#allocation49_spill] sm:$0xff]  ;;  %v8837_v50 = vrot.slane %v8836_v36, 4 }
 0x2dd   : > { %v7706_v35 = vperm.slane %v2666_v19, %v5622_v61  ;;  %v1061_v13 = vsel %vm1060_vm15, %v1059_v59, %v8831_v47  ;;  %v1068_v31 = vsel %vm1060_vm15, %v1067_v26, %v8832_v16  ;;  %v8834_v7 = vrot.slane %v8833_v27, 4 }
 0x2de   : > { %v1069_v21 = vpack.c.bf16 %v1068_v31, %v1061_v13  ;;  %v3755_v5 = vrot.slane %v7450_v15, 4  ;;  %v3867_v48 = vrot.slane %v7459_v55, 4  ;;  %v4632_v19 = vunpack.i.h.bf16 %v4630_v10  ;;  %v8841_v13 = vld [vmem:[#allocation38_spill] sm:$0xff]  ;;  %v4640_v31 = vpop.permute.xlu1 %4639 }
 0x2df   : > { %v2778_v11 = vsel %vm768_vm6, %v8835_v28, %v8834_v7  ;;  %v2694_v44 = vsel %vm768_vm6, %v7706_v35, %v8837_v50  ;;  %v4631_v59 = vunpack.i.l.bf16 %v4630_v10  ;;  %v1627_v26 = vrot.slane %v7444_v51, 4  ;;  %v8840_v51 = vld [vmem:[#allocation39_spill] sm:$0xff] }
 0x2e0   : > { %v7723_v9 = vperm.slane %v2778_v11, %v5622_v61  ;;  %1070 = vst [vmem:[#allocation3] sm:$0xff] %v1069_v21  ;;  %v8839_v52 = vrot.slane %v8838_v1, 4  ;;  %v3756_v47 = vsel %vm768_vm6, %v3755_v5, %v8768_v42  ;;  %v1739_v15 = vrot.slane %v7447_v62, 4  ;;  %v8843_v21 = vld [vmem:[#allocation55_spill] sm:$0xff]  ;;  %4754 = vrot.lane.b32.xlu2 %v4753_v46, %s4928_s15 }
 0x2e1   : > { %v3379_v0 = vrot.slane %v7642_v3, 4  ;;  %v3868_v10 = vsel %vm768_vm6, %v3867_v48, %v8770_v60  ;;  %v3190_v22 = vsel %vm1048_vm9, %v8840_v51, %v4632_v19  ;;  %v3183_v16 = vsel %vm1048_vm9, %v8841_v13, %v4631_v59  ;;  %v8842_v60 = vld [vmem:[#allocation66_spill] sm:$0xff]  ;;  %v8849_v51 = vld [vmem:[#allocation84_spill] sm:$0xff] }
 0x2e2   : > { %v2806_v63 = vsel %vm768_vm6, %v7723_v9, %v8839_v52  ;;  %v4798_v7 = vpack.i.bf16 %v3868_v10, %v3756_v47  ;;  %v3191_v42 = vsel %vm1050_vm10, %v3190_v22, %v4637_v23  ;;  %v3184_v62 = vsel %vm1050_vm10, %v3183_v16, %v4636_v34  ;;  %v8844_v19 = vld [vmem:[#allocation14_spill] sm:$0xff]  ;;  %v8848_v47 = vld [vmem:[#allocation15_spill] sm:$0xff] }
 0x2e3   : > { %v4743_v55 = vpack.i.bf16 %v2806_v63, %v2694_v44  ;;  %v1628_v3 = vsel %vm768_vm6, %v1627_v26, %v8764_v49  ;;  %v4597_v11 = vunpack.i.h.bf16 %v8842_v60  ;;  %v1740_v50 = vsel %vm768_vm6, %v1739_v15, %v8843_v21 }
 0x2e4   : > { %v7758_v44 = vsel %vm768_vm6, %v3379_v0, %v8816_v54  ;;  %v3491_v23 = vrot.slane %v7657_v12, 4  ;;  %v4596_v24 = vunpack.i.l.bf16 %v8842_v60  ;;  %v4768_v5 = vpack.i.bf16 %v1740_v50, %v1628_v3  ;;  %v8854_v50 = vld [vmem:[#allocation47_spill] sm:$0xff]  ;;  %4799 = vrot.lane.b32.xlu1 %v4798_v7, %s4928_s15 }
 0x2e5   : > { %v4642_v34 = vunpack.i.h.bf16 %v4640_v31  ;;  %v4641_v48 = vunpack.i.l.bf16 %v4640_v31  ;;  %v2315_v59 = vrot.slane %v8844_v19, 4  ;;  %v8846_v26 = vunpack.i.l.bf16 %v8845_v53  ;;  %4744 = vrot.lane.b32.xlu0 %v4743_v55, %s4926_s8  ;;  %v8851_v31 = vld [vmem:[#allocation46_spill] sm:$0xff]  ;;  %s4082_s8 = sshll.u32 %s277_s29, 4  ;;  %s4083_s8 = int_to_ptr.vmem [resolvable:$true] %s4082_s8 }
 0x2e6   : > { %v3492_v49 = vsel %vm768_vm6, %v3491_v23, %v8818_v37  ;;  %v8847_v63 = vunpack.i.h.bf16 %v8845_v53  ;;  %v2427_v15 = vrot.slane %v8848_v47, 4  ;;  %v4551_v37 = vunpack.i.l.bf16 %v8849_v51  ;;  %v8857_v23 = vld [vmem:[#allocation20_spill] sm:$0xff] }
 0x2e7   : > { %v3185_v52 = vsel %vm1052_vm11, %v3184_v62, %v8846_v26  ;;  %v4813_v12 = vpack.i.bf16 %v3492_v49, %v7758_v44  ;;  %v8850_v13 = vunpack.i.h.bf16 %v7375_v14  ;;  %v8858_v49 = vunpack.i.h.bf16 %v8849_v51  ;;  %v8860_v26 = vld [vmem:[#allocation28_spill] sm:$0xff] }
 0x2e8   : > { %v3192_v54 = vsel %vm1052_vm11, %v3191_v42, %v8847_v63  ;;  %v3186_v0 = vsel %vm1054_vm12, %v3185_v52, %v4641_v48  ;;  %v8852_v42 = vld [vmem:[#allocation90_spill] sm:$0xff]  ;;  %v8861_v52 = vrot.slane %v8860_v26, 4  ;;  %4769 = vrot.lane.b32.xlu2 %v4768_v5, %s4928_s15  ;;  %v8886_v5 = vld [vmem:[#allocation11_spill] sm:$0xff] }
 0x2e9   : > { %v3193_v10 = vsel %vm1054_vm12, %v3192_v54, %v4642_v34  ;;  %v3187_v22 = vsel %vm1056_vm13, %v3186_v0, %v4591_v2  ;;  %v8853_v62 = vrot.slane %v8852_v42, 4  ;;  %v8855_v2 = vld [vmem:[#allocation89_spill] sm:$0xff]  ;;  %v2316_v34 = vsel %vm768_vm6, %v2315_v59, %v8857_v23  ;;  %v8862_v59 = vld [vmem:[#allocation75_spill] sm:$0xff]  ;;  %v8863_v54 = vld [vmem:[#allocation88_spill] sm:$0xff] }
 0x2ea   : > { %v3194_v16 = vsel %vm1056_vm13, %v3193_v10, %v8850_v13  ;;  %v3188_v60 = vsel %vm1058_vm14, %v3187_v22, %v4596_v24  ;;  %v8856_v44 = vrot.slane %v8855_v2, 4  ;;  %v8864_v47 = vrot.slane %v8863_v54, 4  ;;  %v8865_v10 = vld [vmem:[#allocation31_spill] sm:$0xff]  ;;  %v8868_v22 = vld [vmem:[#allocation86_spill] sm:$0xff]  ;;  %v8871_v42 = vld [vmem:[#allocation80_spill] sm:$0xff] }
 0x2eb   : > { %v2676_v3 = vsel %vm768_vm6, %v8853_v62, %v8851_v31  ;;  %v3195_v21 = vsel %vm1058_vm14, %v3194_v16, %v4597_v11  ;;  %v3189_v48 = vsel %vm1060_vm15, %v3188_v60, %v4551_v37  ;;  %v8859_v11 = vld [vmem:[#allocation23_spill] sm:$0xff]  ;;  %v8866_v51 = vrot.slane %v8865_v10, 4  ;;  %v8870_v31 = vld [vmem:[#allocation42_spill] sm:$0xff]  ;;  %v8873_v60 = vld [vmem:[#allocation44_spill] sm:$0xff] }
 0x2ec   : > { %v7791_v55 = vperm.slane %v2676_v3, %v5622_v61  ;;  %v2788_v14 = vsel %vm768_vm6, %v8856_v44, %v8854_v50  ;;  %v3196_v46 = vsel %vm1060_vm15, %v3195_v21, %v8858_v49  ;;  %v2428_v19 = vsel %vm768_vm6, %v2427_v15, %v8859_v11  ;;  %v8867_v15 = vld [vmem:[#allocation74_spill] sm:$0xff]  ;;  %v8874_v21 = vld [vmem:[#allocation76_spill] sm:$0xff]  ;;  %4814 = vrot.lane.b32.xlu1 %v4813_v12, %s4928_s15 }
 0x2ed   : > { %v7804_v24 = vperm.slane %v2788_v14, %v5622_v61  ;;  %v3197_v53 = vpack.c.bf16 %v3196_v46, %v3189_v48  ;;  %v3728_v0 = vsel %vm768_vm6, %v8864_v47, %v8862_v59  ;;  %v8869_v13 = vrot.slane %v8868_v22, 4  ;;  %v8876_v23 = vld [vmem:[#allocation34_spill] sm:$0xff] }
 0x2ee   : > { %v7812_v63 = vsel %vm768_vm6, %v7791_v55, %v8861_v52  ;;  %v8872_v62 = vrot.slane %v8871_v42, 4  ;;  %v8875_v50 = vrot.slane %v8874_v21, 4  ;;  %v2663_v2 = vrot.slane %v8828_v20, 4  ;;  %v8877_v52 = vld [vmem:[#allocation40_spill] sm:$0xff] }
 0x2ef   : > { %v7823_v37 = vsel %vm768_vm6, %v7804_v24, %v8866_v51  ;;  %v3840_v16 = vsel %vm768_vm6, %v8869_v13, %v8867_v15  ;;  %3198 = vst [vmem:[#allocation3 + $0x30] sm:$0xff] %v3197_v53  ;;  %v2801_v48 = vrot.slane %v8876_v23, 4  ;;  %v2775_v49 = vrot.slane %v8835_v28, 4  ;;  %v8878_v53 = vld [vmem:[#allocation32_spill] sm:$0xff]  ;;  %v8880_v15 = vld [vmem:[#allocation41_spill] sm:$0xff]  ;;  %v8881_v28 = vld [vmem:[#allocation19_spill] sm:$0xff] }
 0x2f0   : > { %v2288_v3 = vsel %vm768_vm6, %v8872_v62, %v8870_v31  ;;  %v2400_v7 = vsel %vm768_vm6, %v8875_v50, %v8873_v60  ;;  %v4818_v44 = vpack.i.bf16 %v7823_v37, %v7812_v63  ;;  %v4783_v46 = vpack.i.bf16 %v2428_v19, %v2316_v34  ;;  %v8883_v13 = vld [vmem:[#allocation52_spill] sm:$0xff]  ;;  %v8884_v31 = vld [vmem:[#allocation50_spill] sm:$0xff] }
 0x2f1   : > { %v7841_v14 = vperm.slane %v2288_v3, %v5622_v61  ;;  %v7846_v11 = vperm.slane %v2400_v7, %v5622_v61  ;;  %v3759_v59 = vrot.slane %v8877_v52, 4  ;;  %v7850_v54 = vperm.slane %v3728_v0, %v5622_v61  ;;  %v8885_v3 = vld [vmem:[#allocation13_spill] sm:$0xff] }
 0x2f2   : > { %v7853_v20 = vperm.slane %v3840_v16, %v5622_v61  ;;  %v8879_v47 = vrot.slane %v8878_v53, 4  ;;  %v3871_v22 = vrot.slane %v8880_v15, 4  ;;  %4784 = vrot.lane.b32.xlu0 %v4783_v46, %s4928_s15  ;;  %v8882_v34 = vrot.slane %v8881_v28, 4 }
 0x2f3   : > { %v3760_v0 = vsel %vm768_vm6, %v3759_v59, %v8883_v13  ;;  %v2319_v16 = vrot.slane %v7579_v8, 4  ;;  %v2662_v42 = vperm.slane %v8884_v31, %v5622_v61  ;;  %v2431_v21 = vrot.slane %v7582_v43, 4  ;;  %v8893_v13 = vld [vmem:[#allocation60_spill] sm:$0xff]  ;;  %v8896_v31 = vld [vmem:[#allocation61_spill] sm:$0xff] }
 0x2f4   : > { %v2314_v51 = vsel %vm768_vm6, %v7841_v14, %v8879_v47  ;;  %v2426_v19 = vsel %vm768_vm6, %v7846_v11, %v8882_v34  ;;  %v3872_v60 = vsel %vm768_vm6, %v3871_v22, %v8885_v3  ;;  %v2664_v50 = vsel %vm768_vm6, %v2663_v2, %v8826_v33  ;;  %4819 = vrot.lane.b32.xlu1 %v4818_v44, %s4925_s21  ;;  %s4080_s21 = scalar_lea.hbm %s8238_s5, %s4244_s22 }
 0x2f5   : > { %v4778_v62 = vpack.i.bf16 %v2426_v19, %v2314_v51  ;;  %v4803_v7 = vpack.i.bf16 %v3872_v60, %v3760_v0  ;;  %v2320_v46 = vsel %vm768_vm6, %v2319_v16, %v8797_v41  ;;  %v7879_v8 = vperm.slane %v2664_v50, %v5622_v61  ;;  %v8888_v51 = vld [vmem:[#allocation24_spill] sm:$0xff] }
 0x2f6   : > { %v2776_v52 = vsel %vm768_vm6, %v2775_v49, %v8833_v27  ;;  %v8887_v59 = vrot.slane %v8886_v5, 4  ;;  %v8889_v43 = vrot.slane %v8888_v51, 4  ;;  %v2432_v2 = vsel %vm768_vm6, %v2431_v21, %v8799_v40  ;;  %v8890_v27 = vld [vmem:[#allocation33_spill] sm:$0xff]  ;;  %v8892_v19 = vld [vmem:[#allocation64_spill] sm:$0xff] }
 0x2f7   : > { %v7894_v41 = vperm.slane %v2776_v52, %v5622_v61  ;;  %v4788_v15 = vpack.i.bf16 %v2432_v2, %v2320_v46  ;;  %v8891_v49 = vrot.slane %v8890_v27, 4  ;;  %v8894_v0 = vrot.slane %v8893_v13, 4  ;;  %v8895_v40 = vld [vmem:[#allocation69_spill] sm:$0xff]  ;;  %v8898_v52 = vld [vmem:[#allocation51_spill] sm:$0xff]  ;;  %4779 = vrot.lane.b32.xlu2 %v4778_v62, %s4929_s16 }
 0x2f8   : > { %v3754_v47 = vsel %vm768_vm6, %v7850_v54, %v8887_v59  ;;  %v3866_v33 = vsel %vm768_vm6, %v7853_v20, %v8889_v43  ;;  %v8897_v3 = vrot.slane %v8896_v31, 4  ;;  %v2691_v12 = vrot.slane %v7706_v35, 4 }
 0x2f9   : > { %v2690_v22 = vsel %vm768_vm6, %v7879_v8, %v8891_v49  ;;  %v2802_v34 = vsel %vm768_vm6, %v7894_v41, %v2801_v48  ;;  %v3328_v16 = vsel %vm768_vm6, %v8894_v0, %v8892_v19  ;;  %v4793_v21 = vpack.i.bf16 %v3866_v33, %v3754_v47  ;;  %v8899_v33 = vld [vmem:[#allocation92_spill] sm:$0xff] }
 0x2fa   : > { %v3440_v60 = vsel %vm768_vm6, %v8897_v3, %v8895_v40  ;;  %v4833_v50 = vpack.i.bf16 %v2802_v34, %v2690_v22  ;;  %v2803_v46 = vrot.slane %v7723_v9, 4  ;;  %v2774_v59 = vperm.slane %v8898_v52, %v5622_v61 }
 0x2fb   : > { %v3463_v48 = vrot.slane %v8814_v38, 4  ;;  %v2692_v43 = vsel %vm768_vm6, %v2691_v12, %v8836_v36  ;;  %v3383_v2 = vrot.slane %v7562_v4, 4  ;;  %v2701_v49 = vrot.slane %v2662_v42, 4  ;;  %4794 = vrot.lane.b32.xlu0 %v4793_v21, %s4929_s16 }
 0x2fc   : > { %v3351_v19 = vrot.slane %v8810_v56, 4  ;;  %v2804_v35 = vsel %vm768_vm6, %v2803_v46, %v8838_v1  ;;  %v3495_v9 = vrot.slane %v7565_v6, 4  ;;  %v2695_v47 = vrot.slane %v7791_v55, 4  ;;  %v8900_v6 = vld [vmem:[#allocation91_spill] sm:$0xff] }
 0x2fd   : > { %v4838_v38 = vpack.i.bf16 %v2804_v35, %v2692_v43  ;;  %v3384_v36 = vsel %vm768_vm6, %v3383_v2, %v8793_v17  ;;  %v2807_v4 = vrot.slane %v7804_v24, 4  ;;  %v2686_v56 = vperm.slane %v8899_v33, %v5622_v61 }
 0x2fe   : > { %v3496_v22 = vsel %vm768_vm6, %v3495_v9, %v8795_v30  ;;  %v2696_v1 = vsel %vm768_vm6, %v2695_v47, %v8860_v26  ;;  %v2798_v55 = vperm.slane %v8900_v6, %v5622_v61  ;;  %v2813_v34 = vrot.slane %v2774_v59, 4 }
 0x2ff   : > { %v4823_v62 = vpack.i.bf16 %v3496_v22, %v3384_v36  ;;  %v2808_v13 = vsel %vm768_vm6, %v2807_v4, %v8865_v10  ;;  %v2699_v17 = vrot.slane %v2686_v56, 4  ;;  %v2702_v24 = vsel %vm768_vm6, %v2686_v56, %v2701_v49  ;;  %4789 = vrot.lane.b32.xlu2 %v4788_v15, %s4930_s17 }
 0x300   : > { %v4843_v30 = vpack.i.bf16 %v2808_v13, %v2696_v1  ;;  %v2811_v0 = vrot.slane %v2798_v55, 4  ;;  %v2814_v26 = vsel %vm768_vm6, %v2798_v55, %v2813_v34  ;;  %v3352_v40 = vsel %vm768_vm6, %v3351_v19, %v8808_v39  ;;  %v4645_v15 = vpop.permute.xlu1 %4644 }
 0x301   : > { %v3464_v31 = vsel %vm768_vm6, %v3463_v48, %v8812_v32  ;;  %v2700_v10 = vsel %vm768_vm6, %v2699_v17, %v2662_v42  ;;  %v4848_v3 = vpack.i.bf16 %v2814_v26, %v2702_v24  ;;  %v7951_v12 = vperm.slane %v3328_v16, %v5622_v61  ;;  %v7965_v32 = vpop.permute.xlu2 %4654  ;;  %v8902_v17 = vld [vmem:[#allocation12_spill] sm:$0xff] }
 0x302   : > { %v7954_v21 = vperm.slane %v3440_v60, %v5622_v61  ;;  %v2812_v63 = vsel %vm768_vm6, %v2811_v0, %v2774_v59  ;;  %v7959_v44 = vperm.slane %v3352_v40, %v5622_v61  ;;  %v7962_v39 = vperm.slane %v3464_v31, %v5622_v61 }
 0x303   : > { %v4828_v37 = vpack.i.bf16 %v2812_v63, %v2700_v10  ;;  %4804 = vrot.lane.b32.xlu0 %v4803_v7, %s4930_s17  ;;  %v3377_v42 = vrot.slane %v7951_v12, 4  ;;  %v1359_v56 = vrot.slane %v7493_v25, 4  ;;  %v1247_v22 = vrot.slane %v7485_v58, 4 }
 0x304   : > { %v3489_v16 = vrot.slane %v7954_v21, 4 }
 0x305   : > { %v3378_v60 = vsel %vm768_vm6, %v7959_v44, %v3377_v42  ;;  %v1360_v24 = vsel %vm768_vm6, %v1359_v56, %v8902_v17 }
 0x306   : > { %v3490_v7 = vsel %vm768_vm6, %v7962_v39, %v3489_v16 }
 0x307   : > { %v4808_v46 = vpack.i.bf16 %v3490_v7, %v3378_v60 }
 0x309   : > { %4809 = vrot.lane.b32.xlu2 %v4808_v46, %s4929_s16  ;;  %v7975_v61 = vpop.permute.xlu2 %4664 }
 0x30a   : > { %v7983_v48 = vpop.permute.xlu1 %4649 }
 0x30b   : > { %4834 = vrot.lane.b32.xlu0 %v4833_v50, %s4929_s16 }
 0x311   : > { %4824 = vrot.lane.b32.xlu2 %v4823_v62, %s4930_s17  ;;  %v4675_v52 = vpop.permute.xlu2 %4674  ;;  %v8901_v62 = vld [vmem:[#allocation67_spill] sm:$0xff] }
 0x312   : > { %v1248_v13 = vsel %vm768_vm6, %v1247_v22, %v8901_v62  ;;  %v4677_v60 = vunpack.i.h.bf16 %v4675_v52  ;;  %v4676_v7 = vunpack.i.l.bf16 %v4675_v52  ;;  %v4647_v22 = vunpack.i.h.bf16 %v4645_v15 }
 0x313   : > { %4839 = vrot.lane.b32.xlu0 %v4838_v38, %s4928_s15  ;;  %s4069_s15 = scalar_lea.sflag [#allocation5], %s275_s13 }
 0x314   : > { %v7986_v50 = vpop.permute.xlu0 %4659 }
 0x319   : > { %4829 = vrot.lane.b32.xlu2 %v4828_v37, %s4927_s9  ;;  %v7981_v59 = vpop.permute.xlu2 %4689  ;;  %v7990_v2 = vpop.permute.xlu1 %4699  ;;  %s4084_s9 = sshll.u32 %s4080_s21, 4  ;;  %s4085_s9 = int_to_ptr.hbm [resolvable:$true] %s4084_s9 }
 0x31a   : > { %s4867_s16 = sshra.s32 %s4085_s9, 4  ;;  %s4868_s16 = int_to_ptr.hbm [resolvable:$true] %s4867_s16 }
 0x31b   : > { %4844 = vrot.lane.b32.xlu0 %v4843_v30, %s4930_s17  ;;  %s4869_s17 = scalar_lea.hbm %s4868_s16, 8  ;;  %p4874_p1 = scmp.lt.s32.totalorder %s4868_s16, %s8238_s5 }
 0x31c   : > { %p4870_p12 = scmp.ne.s32.totalorder %s4868_s16, %s4869_s17  ;;  %p4875_p2 = scmp.lt.s32.totalorder %s4873_s19, %s4869_s17 }
 0x31e   : > { %p4871_p13 = pnand %p4870_p12, %p5009_p5  ;;  %p4876_p3 = por %p4875_p2, %p4874_p1 }
 0x31f   : > { %v4670_v49 = vpop.permute.xlu0 %4669 }
 0x320   : > { %v4672_v26 = vunpack.i.h.bf16 %v4670_v49  ;;  %v4671_v40 = vunpack.i.l.bf16 %v4670_v49  ;;  %p4872_p0 = pneg %p4871_p13 }
 0x321   : > { %v7988_v43 = vpop.permute.xlu2 %4714  ;;  %v7994_v35 = vpop.permute.xlu1 %4709 }
 0x322   : > { %p4877_p4 = pnand %p4876_p3, %p4872_p0 }
 0x323   : > { %4849 = vrot.lane.b32.xlu0 %v4848_v3, %s4924_s20 }
 0x327   : > { %v4680_v9 = vpop.permute.xlu0 %4679 }
 0x328   : > { %v4682_v46 = vunpack.i.h.bf16 %v4680_v9 }
 0x329   : > { %v7992_v19 = vpop.permute.xlu2 %4724  ;;  %v7998_v38 = vpop.permute.xlu1 %4719 }
 0x330   : > { %v8000_v36 = vpop.permute.xlu0 %4684 }
 0x331   : > { %v7996_v47 = vpop.permute.xlu2 %4734 }
 0x334   : > { %v4750_v33 = vpop.permute.xlu1 %4749 }
 0x335   : > { %v4752_v1 = vunpack.i.h.bf16 %v4750_v33  ;;  %v4751_v6 = vunpack.i.l.bf16 %v4750_v33  ;;  %v4681_v33 = vunpack.i.l.bf16 %v4680_v9 }
 0x337   : > { %v1438_v31 = vsel %vm1048_vm9, %v1360_v24, %v4752_v1  ;;  %v1431_v25 = vsel %vm1048_vm9, %v1248_v13, %v4751_v6  ;;  %v4646_v1 = vunpack.i.l.bf16 %v4645_v15 }
 0x338   : > { %v8006_v55 = vpop.permute.xlu0 %4694 }
 0x339   : > { %v8002_v4 = vpop.permute.xlu2 %4739 }
 0x33c   : > { %v4760_v3 = vpop.permute.xlu1 %4759 }
 0x33d   : > { %v4762_v63 = vunpack.i.h.bf16 %v4760_v3  ;;  %v4761_v37 = vunpack.i.l.bf16 %v4760_v3 }
 0x341   : > { %v4755_v34 = vpop.permute.xlu2 %4754 }
 0x342   : > { %v4757_v30 = vunpack.i.h.bf16 %v4755_v34  ;;  %v4756_v0 = vunpack.i.l.bf16 %v4755_v34 }
 0x343   : > { %v8022_v62 = vpop.permute.xlu0 %4704 }
 0x344   : > { %v1432_v58 = vsel %vm1050_vm10, %v1431_v25, %v4756_v0  ;;  %v1439_v10 = vsel %vm1050_vm10, %v1438_v31, %v4757_v30  ;;  %v1735_v30 = vrot.slane %v7605_v45, 4  ;;  %v1623_v0 = vrot.slane %v7602_v29, 4 }
 0x345   : > { %v1433_v42 = vsel %vm1052_vm11, %v1432_v58, %v4671_v40  ;;  %v1440_v16 = vsel %vm1052_vm11, %v1439_v10, %v4672_v26  ;;  %v4765_v26 = vpop.permute.xlu1 %4764 }
 0x346   : > { %v1434_v49 = vsel %vm1054_vm12, %v1433_v42, %v4761_v37  ;;  %v1441_v56 = vsel %vm1054_vm12, %v1440_v16, %v4762_v63  ;;  %v4767_v40 = vunpack.i.h.bf16 %v4765_v26  ;;  %v4766_v31 = vunpack.i.l.bf16 %v4765_v26 }
 0x347   : > { %v1435_v6 = vsel %vm1056_vm13, %v1434_v49, %v4676_v7  ;;  %v1442_v34 = vsel %vm1056_vm13, %v1441_v56, %v4677_v60  ;;  %v1624_v10 = vsel %vm768_vm6, %v1623_v0, %v8801_v57  ;;  %v1736_v3 = vsel %vm768_vm6, %v1735_v30, %v8803_v18 }
 0x348   : > { %v1436_v13 = vsel %vm1058_vm14, %v1435_v6, %v4681_v33  ;;  %v1443_v17 = vsel %vm1058_vm14, %v1442_v34, %v4682_v46  ;;  %v1814_v63 = vsel %vm1048_vm9, %v1736_v3, %v4767_v40  ;;  %v1807_v37 = vsel %vm1048_vm9, %v1624_v10, %v4766_v31 }
 0x349   : > { %v4770_v24 = vpop.permute.xlu2 %4769  ;;  %v1437_v52 = vsel %vm1060_vm15, %v1436_v13, %v4646_v1  ;;  %v1444_v9 = vsel %vm1060_vm15, %v1443_v17, %v4647_v22  ;;  %v3751_v60 = vrot.slane %v7850_v54, 4  ;;  %v4687_v7 = vunpack.i.h.bf16 %v8000_v36 }
 0x34a   : > { %v1445_v15 = vpack.c.bf16 %v1444_v9, %v1437_v52  ;;  %v4772_v25 = vunpack.i.h.bf16 %v4770_v24  ;;  %v4771_v58 = vunpack.i.l.bf16 %v4770_v24  ;;  %v4686_v57 = vunpack.i.l.bf16 %v8000_v36 }
 0x34b   : > { %v2423_v18 = vrot.slane %v7846_v11, 4  ;;  %v2311_v33 = vrot.slane %v7841_v14, 4  ;;  %v4692_v22 = vunpack.i.h.bf16 %v7981_v59  ;;  %v4691_v1 = vunpack.i.l.bf16 %v7981_v59 }
 0x34c   : > { %1446 = vst [vmem:[#allocation3 + $0x8] sm:$0xff] %v1445_v15  ;;  %v8036_v45 = vpop.permute.xlu0 %4729  ;;  %v1815_v42 = vsel %vm1050_vm10, %v1814_v63, %v4772_v25  ;;  %v1808_v16 = vsel %vm1050_vm10, %v1807_v37, %v4771_v58  ;;  %v4697_v54 = vunpack.i.h.bf16 %v8006_v55  ;;  %v4696_v13 = vunpack.i.l.bf16 %v8006_v55 }
 0x34d   : > { %v4775_v46 = vpop.permute.xlu1 %4774  ;;  %v1809_v6 = vsel %vm1052_vm11, %v1808_v16, %v4686_v57  ;;  %v1816_v34 = vsel %vm1052_vm11, %v1815_v42, %v4687_v7  ;;  %v4652_v14 = vunpack.i.h.bf16 %v7983_v48  ;;  %v4651_v17 = vunpack.i.l.bf16 %v7983_v48 }
 0x34e   : > { %v4777_v49 = vunpack.i.h.bf16 %v4775_v46  ;;  %v4776_v56 = vunpack.i.l.bf16 %v4775_v46  ;;  %v3487_v9 = vrot.slane %v7962_v39, 4  ;;  %v3375_v30 = vrot.slane %v7959_v44, 4 }
 0x34f   : > { %v3863_v26 = vrot.slane %v7853_v20, 4  ;;  %v2424_v25 = vsel %vm768_vm6, %v2423_v18, %v8881_v28  ;;  %v2312_v44 = vsel %vm768_vm6, %v2311_v33, %v8878_v53  ;;  %v3752_v10 = vsel %vm768_vm6, %v3751_v60, %v8886_v5 }
 0x350   : > { %v1810_v36 = vsel %vm1054_vm12, %v1809_v6, %v4776_v56  ;;  %v1817_v11 = vsel %vm1054_vm12, %v1816_v34, %v4777_v49  ;;  %v3376_v39 = vsel %vm768_vm6, %v3375_v30, %v7951_v12  ;;  %v3488_v20 = vsel %vm768_vm6, %v3487_v9, %v7954_v21 }
 0x351   : > { %v4780_v29 = vpop.permute.xlu2 %4779  ;;  %v1811_v24 = vsel %vm1056_vm13, %v1810_v36, %v4691_v1  ;;  %v1818_v59 = vsel %vm1056_vm13, %v1817_v11, %v4692_v22  ;;  %v4657_v3 = vunpack.i.h.bf16 %v7965_v32  ;;  %v3864_v28 = vsel %vm768_vm6, %v3863_v26, %v8888_v51 }
 0x352   : > { %v1812_v55 = vsel %vm1058_vm14, %v1811_v24, %v4696_v13  ;;  %v1819_v0 = vsel %vm1058_vm14, %v1818_v59, %v4697_v54  ;;  %v4782_v63 = vunpack.i.h.bf16 %v4780_v29  ;;  %v4781_v37 = vunpack.i.l.bf16 %v4780_v29 }
 0x353   : > { %v1813_v40 = vsel %vm1060_vm15, %v1812_v55, %v4651_v17  ;;  %v1820_v48 = vsel %vm1060_vm15, %v1819_v0, %v4652_v14  ;;  %v4656_v42 = vunpack.i.l.bf16 %v7965_v32  ;;  %v4717_v53 = vunpack.i.h.bf16 %v7988_v43 }
 0x354   : > { %v1821_v31 = vpack.c.bf16 %v1820_v48, %v1813_v40  ;;  %v4716_v16 = vunpack.i.l.bf16 %v7988_v43  ;;  %v4702_v12 = vunpack.i.h.bf16 %v7990_v2  ;;  %v4701_v21 = vunpack.i.l.bf16 %v7990_v2 }
 0x355   : > { %v4712_v7 = vunpack.i.h.bf16 %v7994_v35  ;;  %v4711_v5 = vunpack.i.l.bf16 %v7994_v35  ;;  %v4737_v60 = vunpack.i.h.bf16 %v7996_v47  ;;  %v4707_v57 = vunpack.i.h.bf16 %v8022_v62 }
 0x356   : > { %v8068_v58 = vpop.permute.xlu1 %4799  ;;  %1822 = vst [vmem:[#allocation3 + $0x10] sm:$0xff] %v1821_v31  ;;  %v4706_v51 = vunpack.i.l.bf16 %v8022_v62  ;;  %v2502_v33 = vsel %vm1048_vm9, %v2424_v25, %v4782_v63  ;;  %v2495_v49 = vsel %vm1048_vm9, %v2312_v44, %v4781_v37  ;;  %v4736_v59 = vunpack.i.l.bf16 %v7996_v47 }
 0x357   : > { %v8057_v52 = vpop.permute.xlu0 %4744  ;;  %v4742_v9 = vunpack.i.h.bf16 %v8002_v4  ;;  %v4741_v0 = vunpack.i.l.bf16 %v8002_v4 }
 0x359   : > { %v4790_v15 = vpop.permute.xlu2 %4789 }
 0x35a   : > { %v4792_v22 = vunpack.i.h.bf16 %v4790_v15  ;;  %v4791_v1 = vunpack.i.l.bf16 %v4790_v15  ;;  %v4732_v15 = vunpack.i.h.bf16 %v8036_v45 }
 0x35e   : > { %v4815_v34 = vpop.permute.xlu1 %4814 }
 0x35f   : > { %v4817_v11 = vunpack.i.h.bf16 %v4815_v34  ;;  %v4816_v14 = vunpack.i.l.bf16 %v4815_v34  ;;  %v4722_v34 = vunpack.i.h.bf16 %v7998_v38 }
 0x363   : > { %v4810_v18 = vpop.permute.xlu2 %4809 }
 0x364   : > { %v4785_v29 = vpop.permute.xlu0 %4784  ;;  %v4812_v56 = vunpack.i.h.bf16 %v4810_v18  ;;  %v4811_v2 = vunpack.i.l.bf16 %v4810_v18  ;;  %v4666_v18 = vunpack.i.l.bf16 %v7975_v61 }
 0x365   : > { %v4787_v32 = vunpack.i.h.bf16 %v4785_v29  ;;  %v4786_v46 = vunpack.i.l.bf16 %v4785_v29 }
 0x366   : > { %v3566_v13 = vsel %vm1048_vm9, %v3488_v20, %v4812_v56  ;;  %v3559_v36 = vsel %vm1048_vm9, %v3376_v39, %v4811_v2  ;;  %v4731_v39 = vunpack.i.l.bf16 %v8036_v45 }
 0x367   : > { %v2496_v35 = vsel %vm1050_vm10, %v2495_v49, %v4786_v46  ;;  %v2503_v6 = vsel %vm1050_vm10, %v2502_v33, %v4787_v32  ;;  %v3567_v47 = vsel %vm1050_vm10, %v3566_v13, %v4817_v11  ;;  %v3560_v25 = vsel %vm1050_vm10, %v3559_v36, %v4816_v14 }
 0x368   : > { %v2497_v54 = vsel %vm1052_vm11, %v2496_v35, %v4701_v21  ;;  %v2504_v62 = vsel %vm1052_vm11, %v2503_v6, %v4702_v12  ;;  %v4802_v12 = vunpack.i.h.bf16 %v8068_v58  ;;  %v4801_v21 = vunpack.i.l.bf16 %v8068_v58 }
 0x369   : > { %v2498_v17 = vsel %vm1054_vm12, %v2497_v54, %v4791_v1  ;;  %v2505_v24 = vsel %vm1054_vm12, %v2504_v62, %v4792_v22  ;;  %v3561_v29 = vsel %vm1052_vm11, %v3560_v25, %v4731_v39  ;;  %v4667_v58 = vunpack.i.h.bf16 %v7975_v61 }
 0x36a   : > { %v2499_v30 = vsel %vm1056_vm13, %v2498_v17, %v4706_v51  ;;  %v2506_v55 = vsel %vm1056_vm13, %v2505_v24, %v4707_v57  ;;  %v3568_v57 = vsel %vm1052_vm11, %v3567_v47, %v4732_v15  ;;  %v4721_v54 = vunpack.i.l.bf16 %v7998_v38  ;;  %v4242_v47 = vld [vmem:[#allocation3 + $0x34] sm:$0xf] }
 0x36b   : > { %v2500_v26 = vsel %vm1058_vm14, %v2499_v30, %v4711_v5  ;;  %v2507_v40 = vsel %vm1058_vm14, %v2506_v55, %v4712_v7  ;;  %v4825_v37 = vpop.permute.xlu2 %4824  ;;  %v4727_v62 = vunpack.i.h.bf16 %v7992_v19  ;;  %v4662_v13 = vunpack.i.h.bf16 %v7986_v50 }
 0x36c   : > { %v2501_v48 = vsel %vm1060_vm15, %v2500_v26, %v4656_v42  ;;  %v2508_v31 = vsel %vm1060_vm15, %v2507_v40, %v4657_v3  ;;  %v4827_v7 = vunpack.i.h.bf16 %v4825_v37  ;;  %v4826_v5 = vunpack.i.l.bf16 %v4825_v37 }
 0x36d   : > { %v4795_v44 = vpop.permute.xlu0 %4794  ;;  %v2509_v20 = vpack.c.bf16 %v2508_v31, %v2501_v48  ;;  %v4661_v36 = vunpack.i.l.bf16 %v7986_v50  ;;  %v4221_v31 = vld [vmem:[#allocation3 + $0x30] sm:$0xf] }
 0x36e   : > { %v4797_v63 = vunpack.i.h.bf16 %v4795_v44  ;;  %v4796_v4 = vunpack.i.l.bf16 %v4795_v44  ;;  %v3562_v32 = vsel %vm1054_vm12, %v3561_v29, %v4826_v5  ;;  %v3569_v46 = vsel %vm1054_vm12, %v3568_v57, %v4827_v7 }
 0x36f   : > { %2510 = vst [vmem:[#allocation3 + $0x20] sm:$0xff] %v2509_v20  ;;  %v2799_v20 = vrot.slane %v7894_v41, 4  ;;  %v4747_v57 = vunpack.i.h.bf16 %v8057_v52 }
 0x370   : > { %v3942_v3 = vsel %vm1048_vm9, %v3864_v28, %v4797_v63  ;;  %v3935_v42 = vsel %vm1048_vm9, %v3752_v10, %v4796_v4  ;;  %v3563_v28 = vsel %vm1056_vm13, %v3562_v32, %v4736_v59  ;;  %v3570_v10 = vsel %vm1056_vm13, %v3569_v46, %v4737_v60  ;;  %v4820_v46 = vpop.permute.xlu1 %4819 }
 0x371   : > { %v3943_v45 = vsel %vm1050_vm10, %v3942_v3, %v4802_v12  ;;  %v3936_v51 = vsel %vm1050_vm10, %v3935_v42, %v4801_v21  ;;  %v3564_v33 = vsel %vm1058_vm14, %v3563_v28, %v4741_v0  ;;  %v3571_v49 = vsel %vm1058_vm14, %v3570_v10, %v4742_v9 }
 0x372   : > { %v3937_v56 = vsel %vm1052_vm11, %v3936_v51, %v4716_v16  ;;  %v3944_v2 = vsel %vm1052_vm11, %v3943_v45, %v4717_v53  ;;  %v3565_v22 = vsel %vm1060_vm15, %v3564_v33, %v4666_v18  ;;  %v3572_v61 = vsel %vm1060_vm15, %v3571_v49, %v4667_v58 }
 0x373   : > { %v3573_v1 = vpack.c.bf16 %v3572_v61, %v3565_v22  ;;  %v4726_v16 = vunpack.i.l.bf16 %v7992_v19  ;;  %v2687_v63 = vrot.slane %v7879_v8, 4  ;;  %v2800_v5 = vsel %vm768_vm6, %v2799_v20, %v8876_v23  ;;  %v4830_v33 = vpop.permute.xlu2 %4829 }
 0x374   : > { %v4746_v45 = vunpack.i.l.bf16 %v8057_v52  ;;  %v4822_v28 = vunpack.i.h.bf16 %v4820_v46  ;;  %v4821_v10 = vunpack.i.l.bf16 %v4820_v46  ;;  %v4831_v52 = vunpack.i.l.bf16 %v4830_v33 }
 0x375   : > { %v4805_v35 = vpop.permute.xlu0 %4804  ;;  %3574 = vst [vmem:[#allocation3 + $0x38] sm:$0xff] %v3573_v1  ;;  %v2688_v7 = vsel %vm768_vm6, %v2687_v63, %v8890_v27 }
 0x376   : > { %v4807_v6 = vunpack.i.h.bf16 %v4805_v35  ;;  %v4806_v60 = vunpack.i.l.bf16 %v4805_v35 }
 0x378   : > { %v3938_v43 = vsel %vm1054_vm12, %v3937_v56, %v4806_v60  ;;  %v3945_v53 = vsel %vm1054_vm12, %v3944_v2, %v4807_v6  ;;  %v4832_v2 = vunpack.i.h.bf16 %v4830_v33 }
 0x379   : > { %v3939_v11 = vsel %vm1056_vm13, %v3938_v43, %v4721_v54  ;;  %v3946_v14 = vsel %vm1056_vm13, %v3945_v53, %v4722_v34  ;;  %v4240_v43 = vld [vmem:[#allocation3 + $0x24] sm:$0xf] }
 0x37a   : > { %v3940_v17 = vsel %vm1058_vm14, %v3939_v11, %v4726_v16  ;;  %v3947_v38 = vsel %vm1058_vm14, %v3946_v14, %v4727_v62  ;;  %v4213_v62 = vld [vmem:[#allocation3 + $0x20] sm:$0xf]  ;;  %v4205_v11 = vld [vmem:[#allocation3 + $0x10] sm:$0xf]  ;;  %v4238_v14 = vld [vmem:[#allocation3 + $0x14] sm:$0xf] }
 0x37b   : > { %v3941_v24 = vsel %vm1060_vm15, %v3940_v17, %v4661_v36  ;;  %v3948_v19 = vsel %vm1060_vm15, %v3947_v38, %v4662_v13  ;;  %v4239_v17 = vld [vmem:[#allocation3 + $0x14] sm:$0xf0]  ;;  %v4207_v38 = vld [vmem:[#allocation3 + $0x18] sm:$0xf0] }
 0x37c   : > { %v3949_v59 = vpack.c.bf16 %v3948_v19, %v3941_v24  ;;  %v4243_v40 = vld [vmem:[#allocation3 + $0x34] sm:$0xf0]  ;;  %v4223_v48 = vld [vmem:[#allocation3 + $0x38] sm:$0xf0]  ;;  %v4206_v24 = vor.u32 %v4239_v17, %v4205_v11  ;;  %v4210_v19 = vor.u32 %v4238_v14, %v4207_v38 }
 0x37d   : > { %v4835_v9 = vpop.permute.xlu0 %4834  ;;  %v4222_v44 = vor.u32 %v4243_v40, %v4221_v31  ;;  %v4226_v39 = vor.u32 %v4242_v47, %v4223_v48 }
 0x37e   : > { %v3986_v30 = vunpack.c.l.b16 %v3949_v59  ;;  %v3987_v55 = vunpack.c.h.b16 %v3949_v59  ;;  %v4837_v4 = vunpack.i.h.bf16 %v4835_v9  ;;  %v4836_v37 = vunpack.i.l.bf16 %v4835_v9  ;;  %v4237_v59 = vld [vmem:[#allocation3 + $0x4] sm:$0xf0]  ;;  %v4199_v9 = vld [vmem:[#allocation3 + $0x8] sm:$0xf0] }
 0x380   : > { %v3996_v0 = vpack.c.b16 %v3986_v30, %v3986_v30  ;;  %v3997_v15 = vpack.c.b16 %v3987_v55, %v3987_v55  ;;  %v2878_v3 = vsel %vm1048_vm9, %v2800_v5, %v4837_v4  ;;  %v2871_v42 = vsel %vm1048_vm9, %v2688_v7, %v4836_v37  ;;  %v4197_v30 = vld [vmem:[#allocation3] sm:$0xf]  ;;  %v4236_v55 = vld [vmem:[#allocation3 + $0x4] sm:$0xf] }
 0x382   : > { %v4012_v50 = vsel %vm4010_vm0, %v3996_v0, 0  ;;  %v4015_v26 = vsel %vm4010_vm0, %v3997_v15, 0  ;;  %v4198_v0 = vor.u32 %v4237_v59, %v4197_v30  ;;  %v4202_v15 = vor.u32 %v4236_v55, %v4199_v9 }
 0x383   : > { %4020 = vmatpush.bf16.msrb.mxu2 %v4012_v50  ;;  %4033 = vmatpush.bf16.msrb.mxu3 %v4015_v26  ;;  %v3951_v50 = vld [vmem:[%s8237_s4] sm:$0x3] }
 0x385   : > { %v4840_v25 = vpop.permute.xlu0 %4839 }
 0x386   : > { %v4842_v12 = vunpack.i.h.bf16 %v4840_v25  ;;  %v4841_v21 = vunpack.i.l.bf16 %v4840_v25 }
 0x387   : > { %4021 = vmatpush.bf16.msrb.mxu2 %v4222_v44  ;;  %4034 = vmatpush.bf16.msrb.mxu3 %v4226_v39 }
 0x388   : > { %v2872_v41 = vsel %vm1050_vm10, %v2871_v42, %v4841_v21  ;;  %v2879_v8 = vsel %vm1050_vm10, %v2878_v3, %v4842_v12 }
 0x389   : > { %v2873_v27 = vsel %vm1052_vm11, %v2872_v41, %v4746_v45  ;;  %v2880_v23 = vsel %vm1052_vm11, %v2879_v8, %v4747_v57 }
 0x38d   : > { %v4845_v29 = vpop.permute.xlu0 %4844 }
 0x38e   : > { %v4847_v51 = vunpack.i.h.bf16 %v4845_v29  ;;  %v4846_v32 = vunpack.i.l.bf16 %v4845_v29 }
 0x390   : > { %v2874_v58 = vsel %vm1054_vm12, %v2873_v27, %v4846_v32  ;;  %v2881_v18 = vsel %vm1054_vm12, %v2880_v23, %v4847_v51 }
 0x391   : > { %v2875_v49 = vsel %vm1056_vm13, %v2874_v58, %v4821_v10  ;;  %v2882_v56 = vsel %vm1056_vm13, %v2881_v18, %v4822_v28 }
 0x392   : > { %v2876_v35 = vsel %vm1058_vm14, %v2875_v49, %v4831_v52  ;;  %v2883_v6 = vsel %vm1058_vm14, %v2882_v56, %v4832_v2 }
 0x395   : > { %v4850_v22 = vpop.permute.xlu0 %4849 }
 0x396   : > { %v4852_v61 = vunpack.i.h.bf16 %v4850_v22  ;;  %v4851_v1 = vunpack.i.l.bf16 %v4850_v22 }
 0x398   : > { %v2877_v60 = vsel %vm1060_vm15, %v2876_v35, %v4851_v1  ;;  %v2884_v34 = vsel %vm1060_vm15, %v2883_v6, %v4852_v61 }
 0x399   : > { %v2885_v54 = vpack.c.bf16 %v2884_v34, %v2877_v60 }
 0x39b   : > { %2886 = vst [vmem:[#allocation3 + $0x28] sm:$0xff] %v2885_v54 }
 0x3a2   : > { %v4241_v16 = vld [vmem:[#allocation3 + $0x24] sm:$0xf0]  ;;  %v4215_v53 = vld [vmem:[#allocation3 + $0x28] sm:$0xf0] }
 0x3a3   : > { %v4214_v13 = vor.u32 %v4241_v16, %v4213_v62  ;;  %v4218_v36 = vor.u32 %v4240_v43, %v4215_v53 }
 0x3a5   : > { %4022 = vmatpush.bf16.msrb.mxu2 %v4214_v13  ;;  %4035 = vmatpush.bf16.msrb.mxu3 %v4218_v36 }
 0x3a9   : > { %4023 = vmatpush.bf16.msrb.mxu2 %v4206_v24  ;;  %4036 = vmatpush.bf16.msrb.mxu3 %v4210_v19 }
 0x3ad   : > { %4024 = vmatpush.bf16.msrb.mxu2 %v4198_v0  ;;  %4037 = vmatpush.bf16.msrb.mxu3 %v4202_v15 }
 0x3b0   : > { %4227 = vmatmul.msk.bf16.vlgmr.msrb.gmra.mxu2 %vm4006_vm1, %v3951_v50  ;;  %4228 = vmatmul.msk.bf16.vlgmr.msrb.gmra.mxu3 %vm4006_vm1, %v3951_v50 }
 0x433   : > { %v4026_v26 = vpop.f32.mrf.mxu2  ;;  %v4039_v40 = vpop.f32.mrf.mxu3 }
 0x434   : > { %v4059_v48 = vmul.f32 %v4026_v26, %v4026_v26  ;;  %v4060_v31 = vmul.f32 %v4039_v40, %v4039_v40  ;;  %v4050_v47 = vsel %vm4010_vm0, %v4026_v26, 0.0  ;;  %v4051_v25 = vsel %vm4010_vm0, %v4039_v40, 0.0 }
 0x435   : > { %v4052_v44 = vadd.f32 %v4051_v25, %v4050_v47  ;;  %v4045_v12 = vrot.slane %v4039_v40, 4 }
 0x436   : > { %v4061_v39 = vsel %vm4010_vm0, %v4059_v48, 0.0  ;;  %v4062_v20 = vsel %vm4010_vm0, %v4060_v31, 0.0 }
 0x437   : > { %v4063_v63 = vadd.f32 %v4062_v20, %v4061_v39  ;;  %4053 = vadd.xlane.f32.xlu1 %v4052_v44  ;;  %v4046_v21 = vsel %vm4010_vm0, %v4026_v26, %v4045_v12 }
 0x438   : > { %4048 = vst [vmem:[%s277_s29] sm:$0xff] %v4046_v21 }
 0x439   : > { %4064 = vadd.xlane.f32.xlu2 %v4063_v63 }
 0x43b   : > { %v4028_v4 = vpop.f32.mrf.mxu2  ;;  %v4041_v37 = vpop.f32.mrf.mxu3 }
 0x43c   : > { %4880 = shalt.err (!%p4877_p4)
}
 0x43d   : > { %4245 = dma.vmem_to_hbm [thread:$0]  (%p5009_p5), %s4083_s8, 128, %s4085_s9, %s4069_s15   ;;  %v4049_v7 = vld [vmem:[%s8239_s6] sm:$0xf]  ;;  %vm4056_vm2 = vcmask 3072  }
 0x43e   : > { %v4058_v5 = vld [vmem:[%s8240_s7] sm:$0xf] }
 0x4aa   : > { %v4054_v3 = vpop.xlane.xlu1 %4053 }
 0x4ab   : > { %v4055_v42 = vadd.f32 %v4054_v3, %v4049_v7 }
 0x4ac   : > { %v4065_v41 = vpop.xlane.xlu2 %4064 }
 0x4ad   : > { %v4066_v8 = vadd.f32 %v4065_v41, %v4058_v5  ;;  %4057 = vst.msk [vmem:[%s8239_s6] sm:$0xf] %vm4056_vm2, %v4055_v42 }
 0x4af   : > { %4067 = vst.msk [vmem:[%s8240_s7] sm:$0xf] %vm4056_vm2, %v4066_v8 }
 0x4b0 PF: > { %p4251_p5 = scmp.ge.s32.totalorder %s4915_s27, 2  ;;  %s4108_s8 = sand.u32 1, %s4903_s24  }
 0x4b1   : > { %s4109_s9 = scalar_lea.sflag [#allocation5], %s4108_s8 }
 0x4b2   : > { %p4248_p7 = pnand %p4251_p5, %p5013_p6 }
 0x4b4   : > { %p4249_p8 = pneg %p4248_p7 }
 0x4b6   : > { %4898 = dma.done.wait (%p4249_p8), %s4109_s9, 128  }
 0x4b7   : > { %4900 = vsyncadd (%p4249_p8), %s4109_s9, 4294967168  ;;  %p18_p9 = scmp.ge.s32.totalorder %s4996_s30, 4   ;;  %s8903_s24 = smov %s4907_s25 }
 0x4b8   : > { %s8904_s25 = smov %s4911_s26  ;;  %s8905_s26 = smov %s5007_s10 }
 0x4b9   : > { %s8906_s27 = smov %s4996_s30  ;;  %20 = sbr.rel (!%p18_p9) target bundleno = 3 (0x3), region = 133 }
 0x4be   :  { %4115 = vsyncpa [#allocation5], 1 }
 0x4bf   :  { %4117 = vsyncpa [#allocation5 + $0x1], 1 }

</bundles_post_ra>
